<compile_context>
chip_gen: v7x
topology: tpu7x:2x2x1
jax: 0.10.0
libtpu: 0.0.40
codegen_flags: <defaults>
</compile_context>

<pallas_src>
import jax
import jax.numpy as jnp
import numpy as np
from jax import lax
from jax.experimental import pallas as pl
from jax.experimental.pallas import tpu as pltpu


def _resblock_kernel(x_ref, w1_ref, b1_ref, w2_ref, b2_ref, o_ref,
                     xpad_ref, midpad_ref, col_ref):
    # x_ref   : (1, H, W, C)      f32 input tile (one batch element, NHWC)
    # w1_ref  : (9*C, C)          bf16 conv1 weights, rows ordered (dy, dx, cin)
    # b1_ref  : (1, C)            f32 conv1 bias
    # w2_ref  : (9*C, C)          bf16 conv2 weights
    # b2_ref  : (1, C)            f32 conv2 bias
    # o_ref   : (1, H*W, C)       f32 output tile
    # xpad_ref: (H+2, W+2, C)     f32 VMEM scratch, padded input
    # midpad_ref: (H+2, W+2, C)   f32 VMEM scratch, padded intermediate
    # col_ref : (H*W, 9*C)        bf16 VMEM scratch, im2col matrix (MXU LHS)
    _, H, W, C = x_ref.shape
    HW = H * W

    # ---- zero only the 1-pixel halo of the padded scratches (cheap; the
    #      interior is fully overwritten below).  Done every grid step so the
    #      kernel is correct under megacore sharding of the batch axis. ----
    for pref in (xpad_ref, midpad_ref):
        pref[0:1, :, :] = jnp.zeros((1, W + 2, C), jnp.float32)
        pref[H + 1:H + 2, :, :] = jnp.zeros((1, W + 2, C), jnp.float32)
        pref[1:1 + H, 0:1, :] = jnp.zeros((H, 1, C), jnp.float32)
        pref[1:1 + H, W + 1:W + 2, :] = jnp.zeros((H, 1, C), jnp.float32)

    # ---- stage input into the padded scratch (padding folded into kernel);
    #      keep the f32 value around for the residual add. ----
    xv = x_ref[0]                                  # (H, W, C) f32
    xpad_ref[1:1 + H, 1:1 + W, :] = xv

    def im2col(src_ref):
        # 9 shifted patches -> (H*W, 9*C) bf16 column matrix (one gather pass
        # per conv; the matmul itself is a single deep K=9*C MXU op).
        for t in range(9):
            dy, dx = t // 3, t % 3
            patch = src_ref[dy:dy + H, dx:dx + W, :].reshape(HW, C)
            col_ref[:, t * C:(t + 1) * C] = patch.astype(jnp.bfloat16)

    # ---- conv1: single (HW, 9C) @ (9C, C) matmul, f32 accumulate ----
    im2col(xpad_ref)
    h1 = jnp.dot(col_ref[...], w1_ref[...],
                 preferred_element_type=jnp.float32)        # (HW, C) f32
    h1 = jnp.maximum(h1 + b1_ref[0], 0.0)                   # ReLU(conv1 + b1)

    # stage intermediate (f32) for conv2 patch extraction
    midpad_ref[1:1 + H, 1:1 + W, :] = h1.reshape(H, W, C)

    # ---- conv2 ----
    im2col(midpad_ref)
    h2 = jnp.dot(col_ref[...], w2_ref[...],
                 preferred_element_type=jnp.float32)        # (HW, C) f32

    # residual add + bias + final ReLU, all in f32, single store
    out = jnp.maximum(h2 + b2_ref[0] + xv.reshape(HW, C), 0.0)
    o_ref[...] = out.reshape(1, HW, C).astype(o_ref.dtype)


@jax.jit
def resblock_pallas(x_nchw, w1, b1, w2, b2):
    """x_nchw: (N, C, H, W) f32; w1/w2: (3, 3, C, C) HWIO; b1/b2: (C,).
    Returns (N, C, H, W)."""
    N, C, H, W = x_nchw.shape
    x_nhwc = jnp.transpose(x_nchw, (0, 2, 3, 1))            # layout glue (no pad!)
    # (dy, dx, cin, cout) -> (9*C, C) rows ordered (dy, dx, cin); bf16 halves
    # the weight DMA and matches the MXU's fast operand dtype.
    w1_flat = w1.reshape(9 * C, C).astype(jnp.bfloat16)
    w2_flat = w2.reshape(9 * C, C).astype(jnp.bfloat16)
    b1_2d = b1.reshape(1, C).astype(jnp.float32)
    b2_2d = b2.reshape(1, C).astype(jnp.float32)

    out_flat = pl.pallas_call(
        _resblock_kernel,
        out_shape=jax.ShapeDtypeStruct((N, H * W, C), x_nchw.dtype),
        grid_spec=pltpu.PrefetchScalarGridSpec(
            num_scalar_prefetch=0,
            grid=(N,),
            in_specs=[
                pl.BlockSpec((1, H, W, C), lambda n: (n, 0, 0, 0)),   # x
                pl.BlockSpec((9 * C, C), lambda n: (0, 0)),           # w1 (resident)
                pl.BlockSpec((1, C), lambda n: (0, 0)),               # b1
                pl.BlockSpec((9 * C, C), lambda n: (0, 0)),           # w2 (resident)
                pl.BlockSpec((1, C), lambda n: (0, 0)),               # b2
            ],
            out_specs=pl.BlockSpec((1, H * W, C), lambda n: (n, 0, 0)),
            scratch_shapes=[
                pltpu.VMEM((H + 2, W + 2, C), jnp.float32),     # padded input
                pltpu.VMEM((H + 2, W + 2, C), jnp.float32),     # padded intermediate
                pltpu.VMEM((H * W, 9 * C), jnp.bfloat16),       # im2col matrix
            ],
        ),
        compiler_params=pltpu.CompilerParams(
            dimension_semantics=("parallel",)),                 # 2 steps -> 2 TCs on v7x
    )(x_nhwc, w1_flat, b1_2d, w2_flat, b2_2d)

    out_nhwc = out_flat.reshape(N, H, W, C)
    return jnp.transpose(out_nhwc, (0, 3, 1, 2))                # back to NCHW


def resblock_reference(x_nchw, w1, b1, w2, b2, mxu_dtype=jnp.float32):
    """Pure-JAX reference.  mxu_dtype=float32 reproduces the PyTorch module
    exactly; mxu_dtype=bfloat16 mirrors the kernel's MXU operand precision
    (bf16 operands, f32 accumulation, f32 bias/residual/ReLU)."""
    x_nhwc = jnp.transpose(x_nchw, (0, 2, 3, 1))
    dn = ("NHWC", "HWIO", "NHWC")
    h = lax.conv_general_dilated(
        x_nhwc.astype(mxu_dtype), w1.astype(mxu_dtype), (1, 1), ((1, 1), (1, 1)),
        dimension_numbers=dn, preferred_element_type=jnp.float32) + b1
    h = jnp.maximum(h, 0.0)
    h = lax.conv_general_dilated(
        h.astype(mxu_dtype), w2.astype(mxu_dtype), (1, 1), ((1, 1), (1, 1)),
        dimension_numbers=dn, preferred_element_type=jnp.float32) + b2
    out = jnp.maximum(h + x_nhwc, 0.0)
    return jnp.transpose(out, (0, 3, 1, 2))


if __name__ == "__main__":
    N_FILTERS = 64            # module default n_filters=64
    N, H, W = 2, 16, 16

    key = jax.random.PRNGKey(0)
    kx, k1, kb1, k2, kb2 = jax.random.split(key, 5)

    x = jax.random.normal(kx, (N, N_FILTERS, H, W), dtype=jnp.float32)
    # deterministic synthetic parameters (HWIO layout), fan-in-ish scale
    w1 = jax.random.normal(k1, (3, 3, N_FILTERS, N_FILTERS), jnp.float32) * 0.05
    b1 = jax.random.normal(kb1, (N_FILTERS,), jnp.float32) * 0.05
    w2 = jax.random.normal(k2, (3, 3, N_FILTERS, N_FILTERS), jnp.float32) * 0.05
    b2 = jax.random.normal(kb2, (N_FILTERS,), jnp.float32) * 0.05

    out = jax.block_until_ready(resblock_pallas(x, w1, b1, w2, b2))

    # Primary correctness gate: same math as the kernel (bf16 MXU operands,
    # f32 accumulation) -> differences are only accumulation order.
    ref_bf16 = jax.block_until_ready(
        resblock_reference(x, w1, b1, w2, b2, mxu_dtype=jnp.bfloat16))
    np.testing.assert_allclose(np.asarray(out), np.asarray(ref_bf16),
                               rtol=2e-3, atol=2e-3)

    # Sanity check against the exact-f32 PyTorch module math (loose tolerance
    # accounts for the intentional bf16 operand quantization on the MXU).
    ref_f32 = jax.block_until_ready(
        resblock_reference(x, w1, b1, w2, b2, mxu_dtype=jnp.float32))
    np.testing.assert_allclose(np.asarray(out), np.asarray(ref_f32),
                               rtol=1e-1, atol=1e-1)

    print("KERNEL_OK")
</pallas_src>

<mosaic_0001>
module attributes {stable_mosaic.version = 11 : i64} {
  func.func @_resblock_kernel(%arg0: i32, %arg1: memref<1x16x16x64xf32, #tpu.memory_space<vmem>>, %arg2: memref<576x64xbf16, #tpu.memory_space<vmem>>, %arg3: memref<1x64xf32, #tpu.memory_space<vmem>>, %arg4: memref<576x64xbf16, #tpu.memory_space<vmem>>, %arg5: memref<1x64xf32, #tpu.memory_space<vmem>>, %arg6: memref<1x256x64xf32, #tpu.memory_space<vmem>>, %arg7: memref<18x18x64xf32, #tpu.memory_space<vmem>>, %arg8: memref<18x18x64xf32, #tpu.memory_space<vmem>>, %arg9: memref<256x576xbf16, #tpu.memory_space<vmem>>) attributes {dimension_semantics = [#tpu.dimension_semantics<parallel>], iteration_bounds = array<i64: 2>, scalar_prefetch = 0 : i64, scratch_operands = 3 : i64, tpu.core_type = #tpu.core_type<tc>, window_params = [{transform_indices = @transform_0, window_bounds = array<i64: 1, 16, 16, 64>}, {pipeline_mode = #tpu.pipeline_mode<synchronous>, transform_indices = @transform_1, window_bounds = array<i64: 576, 64>}, {pipeline_mode = #tpu.pipeline_mode<synchronous>, transform_indices = @transform_2, window_bounds = array<i64: 1, 64>}, {pipeline_mode = #tpu.pipeline_mode<synchronous>, transform_indices = @transform_3, window_bounds = array<i64: 576, 64>}, {pipeline_mode = #tpu.pipeline_mode<synchronous>, transform_indices = @transform_4, window_bounds = array<i64: 1, 64>}, {transform_indices = @transform_5, window_bounds = array<i64: 1, 256, 64>}]} {
    %cst = arith.constant 0.000000e+00 : f32
    %0 = vector.broadcast %cst : f32 to vector<1x18x64xf32>
    %c0 = arith.constant 0 : index
    %c0_0 = arith.constant 0 : index
    %c0_1 = arith.constant 0 : index
    %1 = vector.load %arg7[%c0, %c0_0, %c0_1] : memref<18x18x64xf32, #tpu.memory_space<vmem>>, vector<1x18x64xf32>
    tpu.vector_store %arg7[%c0, %c0_0, %c0_1], %0 {strides = array<i32>} : memref<18x18x64xf32, #tpu.memory_space<vmem>>, vector<1x18x64xf32>,
    %cst_2 = arith.constant 0.000000e+00 : f32
    %2 = vector.broadcast %cst_2 : f32 to vector<1x18x64xf32>
    %c17 = arith.constant 17 : index
    %c0_3 = arith.constant 0 : index
    %c0_4 = arith.constant 0 : index
    %3 = vector.load %arg7[%c17, %c0_3, %c0_4] : memref<18x18x64xf32, #tpu.memory_space<vmem>>, vector<1x18x64xf32>
    tpu.vector_store %arg7[%c17, %c0_3, %c0_4], %2 {strides = array<i32>} : memref<18x18x64xf32, #tpu.memory_space<vmem>>, vector<1x18x64xf32>,
    %cst_5 = arith.constant 0.000000e+00 : f32
    %4 = vector.broadcast %cst_5 : f32 to vector<16x1x64xf32>
    %c1 = arith.constant 1 : index
    %c0_6 = arith.constant 0 : index
    %c0_7 = arith.constant 0 : index
    %5 = vector.load %arg7[%c1, %c0_6, %c0_7] : memref<18x18x64xf32, #tpu.memory_space<vmem>>, vector<16x1x64xf32>
    tpu.vector_store %arg7[%c1, %c0_6, %c0_7], %4 {strides = array<i32>} : memref<18x18x64xf32, #tpu.memory_space<vmem>>, vector<16x1x64xf32>,
    %cst_8 = arith.constant 0.000000e+00 : f32
    %6 = vector.broadcast %cst_8 : f32 to vector<16x1x64xf32>
    %c1_9 = arith.constant 1 : index
    %c17_10 = arith.constant 17 : index
    %c0_11 = arith.constant 0 : index
    %7 = vector.load %arg7[%c1_9, %c17_10, %c0_11] : memref<18x18x64xf32, #tpu.memory_space<vmem>>, vector<16x1x64xf32>
    tpu.vector_store %arg7[%c1_9, %c17_10, %c0_11], %6 {strides = array<i32>} : memref<18x18x64xf32, #tpu.memory_space<vmem>>, vector<16x1x64xf32>,
    %cst_12 = arith.constant 0.000000e+00 : f32
    %8 = vector.broadcast %cst_12 : f32 to vector<1x18x64xf32>
    %c0_13 = arith.constant 0 : index
    %c0_14 = arith.constant 0 : index
    %c0_15 = arith.constant 0 : index
    %9 = vector.load %arg8[%c0_13, %c0_14, %c0_15] : memref<18x18x64xf32, #tpu.memory_space<vmem>>, vector<1x18x64xf32>
    tpu.vector_store %arg8[%c0_13, %c0_14, %c0_15], %8 {strides = array<i32>} : memref<18x18x64xf32, #tpu.memory_space<vmem>>, vector<1x18x64xf32>,
    %cst_16 = arith.constant 0.000000e+00 : f32
    %10 = vector.broadcast %cst_16 : f32 to vector<1x18x64xf32>
    %c17_17 = arith.constant 17 : index
    %c0_18 = arith.constant 0 : index
    %c0_19 = arith.constant 0 : index
    %11 = vector.load %arg8[%c17_17, %c0_18, %c0_19] : memref<18x18x64xf32, #tpu.memory_space<vmem>>, vector<1x18x64xf32>
    tpu.vector_store %arg8[%c17_17, %c0_18, %c0_19], %10 {strides = array<i32>} : memref<18x18x64xf32, #tpu.memory_space<vmem>>, vector<1x18x64xf32>,
    %cst_20 = arith.constant 0.000000e+00 : f32
    %12 = vector.broadcast %cst_20 : f32 to vector<16x1x64xf32>
    %c1_21 = arith.constant 1 : index
    %c0_22 = arith.constant 0 : index
    %c0_23 = arith.constant 0 : index
    %13 = vector.load %arg8[%c1_21, %c0_22, %c0_23] : memref<18x18x64xf32, #tpu.memory_space<vmem>>, vector<16x1x64xf32>
    tpu.vector_store %arg8[%c1_21, %c0_22, %c0_23], %12 {strides = array<i32>} : memref<18x18x64xf32, #tpu.memory_space<vmem>>, vector<16x1x64xf32>,
    %cst_24 = arith.constant 0.000000e+00 : f32
    %14 = vector.broadcast %cst_24 : f32 to vector<16x1x64xf32>
    %c1_25 = arith.constant 1 : index
    %c17_26 = arith.constant 17 : index
    %c0_27 = arith.constant 0 : index
    %15 = vector.load %arg8[%c1_25, %c17_26, %c0_27] : memref<18x18x64xf32, #tpu.memory_space<vmem>>, vector<16x1x64xf32>
    tpu.vector_store %arg8[%c1_25, %c17_26, %c0_27], %14 {strides = array<i32>} : memref<18x18x64xf32, #tpu.memory_space<vmem>>, vector<16x1x64xf32>,
    %c0_28 = arith.constant 0 : index
    %c0_29 = arith.constant 0 : index
    %c0_30 = arith.constant 0 : index
    %c0_31 = arith.constant 0 : index
    %16 = vector.load %arg1[%c0_28, %c0_29, %c0_30, %c0_31] : memref<1x16x16x64xf32, #tpu.memory_space<vmem>>, vector<1x16x16x64xf32>
    %17 = vector.shape_cast %16 : vector<1x16x16x64xf32> to vector<16x16x64xf32>
    %c1_32 = arith.constant 1 : index
    %c1_33 = arith.constant 1 : index
    %c0_34 = arith.constant 0 : index
    %18 = vector.load %arg7[%c1_32, %c1_33, %c0_34] : memref<18x18x64xf32, #tpu.memory_space<vmem>>, vector<16x16x64xf32>
    tpu.vector_store %arg7[%c1_32, %c1_33, %c0_34], %17 {strides = array<i32>} : memref<18x18x64xf32, #tpu.memory_space<vmem>>, vector<16x16x64xf32>,
    %c0_35 = arith.constant 0 : index
    %c0_36 = arith.constant 0 : index
    %c0_37 = arith.constant 0 : index
    %19 = vector.load %arg7[%c0_35, %c0_36, %c0_37] : memref<18x18x64xf32, #tpu.memory_space<vmem>>, vector<16x16x64xf32>
    %20 = vector.shape_cast %19 : vector<16x16x64xf32> to vector<256x64xf32>
    %21 = arith.truncf %20 : vector<256x64xf32> to vector<256x64xbf16>
    %c0_38 = arith.constant 0 : index
    %c0_39 = arith.constant 0 : index
    %22 = vector.load %arg9[%c0_38, %c0_39] : memref<256x576xbf16, #tpu.memory_space<vmem>>, vector<256x64xbf16>
    tpu.vector_store %arg9[%c0_38, %c0_39], %21 {strides = array<i32>} : memref<256x576xbf16, #tpu.memory_space<vmem>>, vector<256x64xbf16>,
    %c0_40 = arith.constant 0 : index
    %c1_41 = arith.constant 1 : index
    %c0_42 = arith.constant 0 : index
    %23 = vector.load %arg7[%c0_40, %c1_41, %c0_42] : memref<18x18x64xf32, #tpu.memory_space<vmem>>, vector<16x16x64xf32>
    %24 = vector.shape_cast %23 : vector<16x16x64xf32> to vector<256x64xf32>
    %25 = arith.truncf %24 : vector<256x64xf32> to vector<256x64xbf16>
    %c0_43 = arith.constant 0 : index
    %c64 = arith.constant 64 : index
    %26 = vector.load %arg9[%c0_43, %c64] : memref<256x576xbf16, #tpu.memory_space<vmem>>, vector<256x64xbf16>
    tpu.vector_store %arg9[%c0_43, %c64], %25 {strides = array<i32>} : memref<256x576xbf16, #tpu.memory_space<vmem>>, vector<256x64xbf16>,
    %c0_44 = arith.constant 0 : index
    %c2 = arith.constant 2 : index
    %c0_45 = arith.constant 0 : index
    %27 = vector.load %arg7[%c0_44, %c2, %c0_45] : memref<18x18x64xf32, #tpu.memory_space<vmem>>, vector<16x16x64xf32>
    %28 = vector.shape_cast %27 : vector<16x16x64xf32> to vector<256x64xf32>
    %29 = arith.truncf %28 : vector<256x64xf32> to vector<256x64xbf16>
    %c0_46 = arith.constant 0 : index
    %c128 = arith.constant 128 : index
    %30 = vector.load %arg9[%c0_46, %c128] : memref<256x576xbf16, #tpu.memory_space<vmem>>, vector<256x64xbf16>
    tpu.vector_store %arg9[%c0_46, %c128], %29 {strides = array<i32>} : memref<256x576xbf16, #tpu.memory_space<vmem>>, vector<256x64xbf16>,
    %c1_47 = arith.constant 1 : index
    %c0_48 = arith.constant 0 : index
    %c0_49 = arith.constant 0 : index
    %31 = vector.load %arg7[%c1_47, %c0_48, %c0_49] : memref<18x18x64xf32, #tpu.memory_space<vmem>>, vector<16x16x64xf32>
    %32 = vector.shape_cast %31 : vector<16x16x64xf32> to vector<256x64xf32>
    %33 = arith.truncf %32 : vector<256x64xf32> to vector<256x64xbf16>
    %c0_50 = arith.constant 0 : index
    %c192 = arith.constant 192 : index
    %34 = vector.load %arg9[%c0_50, %c192] : memref<256x576xbf16, #tpu.memory_space<vmem>>, vector<256x64xbf16>
    tpu.vector_store %arg9[%c0_50, %c192], %33 {strides = array<i32>} : memref<256x576xbf16, #tpu.memory_space<vmem>>, vector<256x64xbf16>,
    %c1_51 = arith.constant 1 : index
    %c1_52 = arith.constant 1 : index
    %c0_53 = arith.constant 0 : index
    %35 = vector.load %arg7[%c1_51, %c1_52, %c0_53] : memref<18x18x64xf32, #tpu.memory_space<vmem>>, vector<16x16x64xf32>
    %36 = vector.shape_cast %35 : vector<16x16x64xf32> to vector<256x64xf32>
    %37 = arith.truncf %36 : vector<256x64xf32> to vector<256x64xbf16>
    %c0_54 = arith.constant 0 : index
    %c256 = arith.constant 256 : index
    %38 = vector.load %arg9[%c0_54, %c256] : memref<256x576xbf16, #tpu.memory_space<vmem>>, vector<256x64xbf16>
    tpu.vector_store %arg9[%c0_54, %c256], %37 {strides = array<i32>} : memref<256x576xbf16, #tpu.memory_space<vmem>>, vector<256x64xbf16>,
    %c1_55 = arith.constant 1 : index
    %c2_56 = arith.constant 2 : index
    %c0_57 = arith.constant 0 : index
    %39 = vector.load %arg7[%c1_55, %c2_56, %c0_57] : memref<18x18x64xf32, #tpu.memory_space<vmem>>, vector<16x16x64xf32>
    %40 = vector.shape_cast %39 : vector<16x16x64xf32> to vector<256x64xf32>
    %41 = arith.truncf %40 : vector<256x64xf32> to vector<256x64xbf16>
    %c0_58 = arith.constant 0 : index
    %c320 = arith.constant 320 : index
    %42 = vector.load %arg9[%c0_58, %c320] : memref<256x576xbf16, #tpu.memory_space<vmem>>, vector<256x64xbf16>
    tpu.vector_store %arg9[%c0_58, %c320], %41 {strides = array<i32>} : memref<256x576xbf16, #tpu.memory_space<vmem>>, vector<256x64xbf16>,
    %c2_59 = arith.constant 2 : index
    %c0_60 = arith.constant 0 : index
    %c0_61 = arith.constant 0 : index
    %43 = vector.load %arg7[%c2_59, %c0_60, %c0_61] : memref<18x18x64xf32, #tpu.memory_space<vmem>>, vector<16x16x64xf32>
    %44 = vector.shape_cast %43 : vector<16x16x64xf32> to vector<256x64xf32>
    %45 = arith.truncf %44 : vector<256x64xf32> to vector<256x64xbf16>
    %c0_62 = arith.constant 0 : index
    %c384 = arith.constant 384 : index
    %46 = vector.load %arg9[%c0_62, %c384] : memref<256x576xbf16, #tpu.memory_space<vmem>>, vector<256x64xbf16>
    tpu.vector_store %arg9[%c0_62, %c384], %45 {strides = array<i32>} : memref<256x576xbf16, #tpu.memory_space<vmem>>, vector<256x64xbf16>,
    %c2_63 = arith.constant 2 : index
    %c1_64 = arith.constant 1 : index
    %c0_65 = arith.constant 0 : index
    %47 = vector.load %arg7[%c2_63, %c1_64, %c0_65] : memref<18x18x64xf32, #tpu.memory_space<vmem>>, vector<16x16x64xf32>
    %48 = vector.shape_cast %47 : vector<16x16x64xf32> to vector<256x64xf32>
    %49 = arith.truncf %48 : vector<256x64xf32> to vector<256x64xbf16>
    %c0_66 = arith.constant 0 : index
    %c448 = arith.constant 448 : index
    %50 = vector.load %arg9[%c0_66, %c448] : memref<256x576xbf16, #tpu.memory_space<vmem>>, vector<256x64xbf16>
    tpu.vector_store %arg9[%c0_66, %c448], %49 {strides = array<i32>} : memref<256x576xbf16, #tpu.memory_space<vmem>>, vector<256x64xbf16>,
    %c2_67 = arith.constant 2 : index
    %c2_68 = arith.constant 2 : index
    %c0_69 = arith.constant 0 : index
    %51 = vector.load %arg7[%c2_67, %c2_68, %c0_69] : memref<18x18x64xf32, #tpu.memory_space<vmem>>, vector<16x16x64xf32>
    %52 = vector.shape_cast %51 : vector<16x16x64xf32> to vector<256x64xf32>
    %53 = arith.truncf %52 : vector<256x64xf32> to vector<256x64xbf16>
    %c0_70 = arith.constant 0 : index
    %c512 = arith.constant 512 : index
    %54 = vector.load %arg9[%c0_70, %c512] : memref<256x576xbf16, #tpu.memory_space<vmem>>, vector<256x64xbf16>
    tpu.vector_store %arg9[%c0_70, %c512], %53 {strides = array<i32>} : memref<256x576xbf16, #tpu.memory_space<vmem>>, vector<256x64xbf16>,
    %c0_71 = arith.constant 0 : index
    %c0_72 = arith.constant 0 : index
    %55 = vector.load %arg9[%c0_71, %c0_72] : memref<256x576xbf16, #tpu.memory_space<vmem>>, vector<256x576xbf16>
    %c0_73 = arith.constant 0 : index
    %c0_74 = arith.constant 0 : index
    %56 = vector.load %arg2[%c0_73, %c0_74] : memref<576x64xbf16, #tpu.memory_space<vmem>>, vector<576x64xbf16>
    %cst_75 = arith.constant dense<0.000000e+00> : vector<256x64xf32>
    %57 = tpu.matmul %55, %56, %cst_75 {dimension_numbers = #tpu.dot_dimension_numbers<[1], [0], [0], [1], [0, 0, 1, 1], [], []>} : vector<256x576xbf16>, vector<576x64xbf16>, vector<256x64xf32> -> vector<256x64xf32>
    %c0_76 = arith.constant 0 : index
    %c0_77 = arith.constant 0 : index
    %58 = vector.load %arg3[%c0_76, %c0_77] : memref<1x64xf32, #tpu.memory_space<vmem>>, vector<1x64xf32>
    %59 = vector.shape_cast %58 : vector<1x64xf32> to vector<64xf32>
    %60 = vector.shape_cast %59 : vector<64xf32> to vector<1x64xf32>
    %61 = vector.broadcast %60 : vector<1x64xf32> to vector<256x64xf32>
    %62 = arith.addf %57, %61 : vector<256x64xf32>
    %cst_78 = arith.constant 0.000000e+00 : f32
    %63 = vector.broadcast %cst_78 : f32 to vector<256x64xf32>
    %64 = arith.maximumf %62, %63 : vector<256x64xf32>
    %65 = vector.shape_cast %64 : vector<256x64xf32> to vector<16x16x64xf32>
    %c1_79 = arith.constant 1 : index
    %c1_80 = arith.constant 1 : index
    %c0_81 = arith.constant 0 : index
    %66 = vector.load %arg8[%c1_79, %c1_80, %c0_81] : memref<18x18x64xf32, #tpu.memory_space<vmem>>, vector<16x16x64xf32>
    tpu.vector_store %arg8[%c1_79, %c1_80, %c0_81], %65 {strides = array<i32>} : memref<18x18x64xf32, #tpu.memory_space<vmem>>, vector<16x16x64xf32>,
    %c0_82 = arith.constant 0 : index
    %c0_83 = arith.constant 0 : index
    %c0_84 = arith.constant 0 : index
    %67 = vector.load %arg8[%c0_82, %c0_83, %c0_84] : memref<18x18x64xf32, #tpu.memory_space<vmem>>, vector<16x16x64xf32>
    %68 = vector.shape_cast %67 : vector<16x16x64xf32> to vector<256x64xf32>
    %69 = arith.truncf %68 : vector<256x64xf32> to vector<256x64xbf16>
    %c0_85 = arith.constant 0 : index
    %c0_86 = arith.constant 0 : index
    %70 = vector.load %arg9[%c0_85, %c0_86] : memref<256x576xbf16, #tpu.memory_space<vmem>>, vector<256x64xbf16>
    tpu.vector_store %arg9[%c0_85, %c0_86], %69 {strides = array<i32>} : memref<256x576xbf16, #tpu.memory_space<vmem>>, vector<256x64xbf16>,
    %c0_87 = arith.constant 0 : index
    %c1_88 = arith.constant 1 : index
    %c0_89 = arith.constant 0 : index
    %71 = vector.load %arg8[%c0_87, %c1_88, %c0_89] : memref<18x18x64xf32, #tpu.memory_space<vmem>>, vector<16x16x64xf32>
    %72 = vector.shape_cast %71 : vector<16x16x64xf32> to vector<256x64xf32>
    %73 = arith.truncf %72 : vector<256x64xf32> to vector<256x64xbf16>
    %c0_90 = arith.constant 0 : index
    %c64_91 = arith.constant 64 : index
    %74 = vector.load %arg9[%c0_90, %c64_91] : memref<256x576xbf16, #tpu.memory_space<vmem>>, vector<256x64xbf16>
    tpu.vector_store %arg9[%c0_90, %c64_91], %73 {strides = array<i32>} : memref<256x576xbf16, #tpu.memory_space<vmem>>, vector<256x64xbf16>,
    %c0_92 = arith.constant 0 : index
    %c2_93 = arith.constant 2 : index
    %c0_94 = arith.constant 0 : index
    %75 = vector.load %arg8[%c0_92, %c2_93, %c0_94] : memref<18x18x64xf32, #tpu.memory_space<vmem>>, vector<16x16x64xf32>
    %76 = vector.shape_cast %75 : vector<16x16x64xf32> to vector<256x64xf32>
    %77 = arith.truncf %76 : vector<256x64xf32> to vector<256x64xbf16>
    %c0_95 = arith.constant 0 : index
    %c128_96 = arith.constant 128 : index
    %78 = vector.load %arg9[%c0_95, %c128_96] : memref<256x576xbf16, #tpu.memory_space<vmem>>, vector<256x64xbf16>
    tpu.vector_store %arg9[%c0_95, %c128_96], %77 {strides = array<i32>} : memref<256x576xbf16, #tpu.memory_space<vmem>>, vector<256x64xbf16>,
    %c1_97 = arith.constant 1 : index
    %c0_98 = arith.constant 0 : index
    %c0_99 = arith.constant 0 : index
    %79 = vector.load %arg8[%c1_97, %c0_98, %c0_99] : memref<18x18x64xf32, #tpu.memory_space<vmem>>, vector<16x16x64xf32>
    %80 = vector.shape_cast %79 : vector<16x16x64xf32> to vector<256x64xf32>
    %81 = arith.truncf %80 : vector<256x64xf32> to vector<256x64xbf16>
    %c0_100 = arith.constant 0 : index
    %c192_101 = arith.constant 192 : index
    %82 = vector.load %arg9[%c0_100, %c192_101] : memref<256x576xbf16, #tpu.memory_space<vmem>>, vector<256x64xbf16>
    tpu.vector_store %arg9[%c0_100, %c192_101], %81 {strides = array<i32>} : memref<256x576xbf16, #tpu.memory_space<vmem>>, vector<256x64xbf16>,
    %c1_102 = arith.constant 1 : index
    %c1_103 = arith.constant 1 : index
    %c0_104 = arith.constant 0 : index
    %83 = vector.load %arg8[%c1_102, %c1_103, %c0_104] : memref<18x18x64xf32, #tpu.memory_space<vmem>>, vector<16x16x64xf32>
    %84 = vector.shape_cast %83 : vector<16x16x64xf32> to vector<256x64xf32>
    %85 = arith.truncf %84 : vector<256x64xf32> to vector<256x64xbf16>
    %c0_105 = arith.constant 0 : index
    %c256_106 = arith.constant 256 : index
    %86 = vector.load %arg9[%c0_105, %c256_106] : memref<256x576xbf16, #tpu.memory_space<vmem>>, vector<256x64xbf16>
    tpu.vector_store %arg9[%c0_105, %c256_106], %85 {strides = array<i32>} : memref<256x576xbf16, #tpu.memory_space<vmem>>, vector<256x64xbf16>,
    %c1_107 = arith.constant 1 : index
    %c2_108 = arith.constant 2 : index
    %c0_109 = arith.constant 0 : index
    %87 = vector.load %arg8[%c1_107, %c2_108, %c0_109] : memref<18x18x64xf32, #tpu.memory_space<vmem>>, vector<16x16x64xf32>
    %88 = vector.shape_cast %87 : vector<16x16x64xf32> to vector<256x64xf32>
    %89 = arith.truncf %88 : vector<256x64xf32> to vector<256x64xbf16>
    %c0_110 = arith.constant 0 : index
    %c320_111 = arith.constant 320 : index
    %90 = vector.load %arg9[%c0_110, %c320_111] : memref<256x576xbf16, #tpu.memory_space<vmem>>, vector<256x64xbf16>
    tpu.vector_store %arg9[%c0_110, %c320_111], %89 {strides = array<i32>} : memref<256x576xbf16, #tpu.memory_space<vmem>>, vector<256x64xbf16>,
    %c2_112 = arith.constant 2 : index
    %c0_113 = arith.constant 0 : index
    %c0_114 = arith.constant 0 : index
    %91 = vector.load %arg8[%c2_112, %c0_113, %c0_114] : memref<18x18x64xf32, #tpu.memory_space<vmem>>, vector<16x16x64xf32>
    %92 = vector.shape_cast %91 : vector<16x16x64xf32> to vector<256x64xf32>
    %93 = arith.truncf %92 : vector<256x64xf32> to vector<256x64xbf16>
    %c0_115 = arith.constant 0 : index
    %c384_116 = arith.constant 384 : index
    %94 = vector.load %arg9[%c0_115, %c384_116] : memref<256x576xbf16, #tpu.memory_space<vmem>>, vector<256x64xbf16>
    tpu.vector_store %arg9[%c0_115, %c384_116], %93 {strides = array<i32>} : memref<256x576xbf16, #tpu.memory_space<vmem>>, vector<256x64xbf16>,
    %c2_117 = arith.constant 2 : index
    %c1_118 = arith.constant 1 : index
    %c0_119 = arith.constant 0 : index
    %95 = vector.load %arg8[%c2_117, %c1_118, %c0_119] : memref<18x18x64xf32, #tpu.memory_space<vmem>>, vector<16x16x64xf32>
    %96 = vector.shape_cast %95 : vector<16x16x64xf32> to vector<256x64xf32>
    %97 = arith.truncf %96 : vector<256x64xf32> to vector<256x64xbf16>
    %c0_120 = arith.constant 0 : index
    %c448_121 = arith.constant 448 : index
    %98 = vector.load %arg9[%c0_120, %c448_121] : memref<256x576xbf16, #tpu.memory_space<vmem>>, vector<256x64xbf16>
    tpu.vector_store %arg9[%c0_120, %c448_121], %97 {strides = array<i32>} : memref<256x576xbf16, #tpu.memory_space<vmem>>, vector<256x64xbf16>,
    %c2_122 = arith.constant 2 : index
    %c2_123 = arith.constant 2 : index
    %c0_124 = arith.constant 0 : index
    %99 = vector.load %arg8[%c2_122, %c2_123, %c0_124] : memref<18x18x64xf32, #tpu.memory_space<vmem>>, vector<16x16x64xf32>
    %100 = vector.shape_cast %99 : vector<16x16x64xf32> to vector<256x64xf32>
    %101 = arith.truncf %100 : vector<256x64xf32> to vector<256x64xbf16>
    %c0_125 = arith.constant 0 : index
    %c512_126 = arith.constant 512 : index
    %102 = vector.load %arg9[%c0_125, %c512_126] : memref<256x576xbf16, #tpu.memory_space<vmem>>, vector<256x64xbf16>
    tpu.vector_store %arg9[%c0_125, %c512_126], %101 {strides = array<i32>} : memref<256x576xbf16, #tpu.memory_space<vmem>>, vector<256x64xbf16>,
    %c0_127 = arith.constant 0 : index
    %c0_128 = arith.constant 0 : index
    %103 = vector.load %arg9[%c0_127, %c0_128] : memref<256x576xbf16, #tpu.memory_space<vmem>>, vector<256x576xbf16>
    %c0_129 = arith.constant 0 : index
    %c0_130 = arith.constant 0 : index
    %104 = vector.load %arg4[%c0_129, %c0_130] : memref<576x64xbf16, #tpu.memory_space<vmem>>, vector<576x64xbf16>
    %cst_131 = arith.constant dense<0.000000e+00> : vector<256x64xf32>
    %105 = tpu.matmul %103, %104, %cst_131 {dimension_numbers = #tpu.dot_dimension_numbers<[1], [0], [0], [1], [0, 0, 1, 1], [], []>} : vector<256x576xbf16>, vector<576x64xbf16>, vector<256x64xf32> -> vector<256x64xf32>
    %c0_132 = arith.constant 0 : index
    %c0_133 = arith.constant 0 : index
    %106 = vector.load %arg5[%c0_132, %c0_133] : memref<1x64xf32, #tpu.memory_space<vmem>>, vector<1x64xf32>
    %107 = vector.shape_cast %106 : vector<1x64xf32> to vector<64xf32>
    %108 = vector.shape_cast %107 : vector<64xf32> to vector<1x64xf32>
    %109 = vector.broadcast %108 : vector<1x64xf32> to vector<256x64xf32>
    %110 = arith.addf %105, %109 : vector<256x64xf32>
    %111 = vector.shape_cast %17 : vector<16x16x64xf32> to vector<256x64xf32>
    %112 = arith.addf %110, %111 : vector<256x64xf32>
    %cst_134 = arith.constant 0.000000e+00 : f32
    %113 = vector.broadcast %cst_134 : f32 to vector<256x64xf32>
    %114 = arith.maximumf %112, %113 : vector<256x64xf32>
    %115 = vector.shape_cast %114 : vector<256x64xf32> to vector<1x256x64xf32>
    %c0_135 = arith.constant 0 : index
    %c0_136 = arith.constant 0 : index
    %c0_137 = arith.constant 0 : index
    %116 = vector.load %arg6[%c0_135, %c0_136, %c0_137] : memref<1x256x64xf32, #tpu.memory_space<vmem>>, vector<1x256x64xf32>
    tpu.vector_store %arg6[%c0_135, %c0_136, %c0_137], %115 {strides = array<i32>} : memref<1x256x64xf32, #tpu.memory_space<vmem>>, vector<1x256x64xf32>,
    return
  }
  func.func @transform_0(%arg0: i32) -> (i32, i32, i32, i32) {
    %c0_i32 = arith.constant 0 : i32
    %c0_i32_0 = arith.constant 0 : i32
    %c0_i32_1 = arith.constant 0 : i32
    %c0_i32_2 = arith.constant 0 : i32
    return %arg0, %c0_i32, %c0_i32_0, %c0_i32_1 : i32, i32, i32, i32
  }
  func.func @transform_1(%arg0: i32) -> (i32, i32) {
    %c0_i32 = arith.constant 0 : i32
    %c0_i32_0 = arith.constant 0 : i32
    %c0_i32_1 = arith.constant 0 : i32
    return %c0_i32, %c0_i32_0 : i32, i32
  }
  func.func @transform_2(%arg0: i32) -> (i32, i32) {
    %c0_i32 = arith.constant 0 : i32
    %c0_i32_0 = arith.constant 0 : i32
    %c0_i32_1 = arith.constant 0 : i32
    return %c0_i32, %c0_i32_0 : i32, i32
  }
  func.func @transform_3(%arg0: i32) -> (i32, i32) {
    %c0_i32 = arith.constant 0 : i32
    %c0_i32_0 = arith.constant 0 : i32
    %c0_i32_1 = arith.constant 0 : i32
    return %c0_i32, %c0_i32_0 : i32, i32
  }
  func.func @transform_4(%arg0: i32) -> (i32, i32) {
    %c0_i32 = arith.constant 0 : i32
    %c0_i32_0 = arith.constant 0 : i32
    %c0_i32_1 = arith.constant 0 : i32
    return %c0_i32, %c0_i32_0 : i32, i32
  }
  func.func @transform_5(%arg0: i32) -> (i32, i32, i32) {
    %c0_i32 = arith.constant 0 : i32
    %c0_i32_0 = arith.constant 0 : i32
    %c0_i32_1 = arith.constant 0 : i32
    return %arg0, %c0_i32, %c0_i32_0 : i32, i32, i32
  }
}

</mosaic_0001>

<bundles_post_ra>
// kernel: resblock_pallas.1
= control target key start
LH: loop header
LB: loop body
LE: loop exit
PB: predicated region body
PF: predicated region fallthrough
CT: control target
= control target key end

     0   :  { %10 = vsyncpa [#allocation6], 0  ;;  %s6946_s0 = inlined_call_operand.vmem [shape: f32[2,16,16,64], index: 0, kind: input, shape index: {}]   ;;  %s6947_s1 = inlined_call_operand.vmem [shape: bf16[576,64], index: 1, kind: input, shape index: {}]   ;;  %s6948_s2 = inlined_call_operand.vmem [shape: f32[1,64], index: 2, kind: input, shape index: {}]   ;;  %s6949_s3 = inlined_call_operand.vmem [shape: bf16[576,64], index: 3, kind: input, shape index: {}]   ;;  %s6950_s4 = inlined_call_operand.vmem [shape: f32[1,64], index: 4, kind: input, shape index: {}]   ;;  %s6951_s5 = inlined_call_operand.hbm [shape: f32[2,256,64], index: 5, kind: output, shape index: {}]  }
   0x1   :  { %12 = vsyncpa [#allocation6 + $0x1], 0  ;;  %s4990_s18 = smov 0   ;;  %s4992_s19 = smov 0  }
   0x2   :  { %s4994_s20 = smov 0   ;;  %s4996_s21 = smov 0  }
   0x3 LB: > { %s5011_s22 = sadd.s32 4294967295, %s4953_s21   ;;  %s4086_s23 = sadd.s32 4294967294, %s4953_s21   ;;  %s4953_s21 = sphi %s4996_s21, %s7014_s21   ;;  %s4949_s20 = sphi %s4994_s20, %s7013_s20   ;;  %s4945_s19 = sphi %s4992_s19, %s7012_s19   ;;  %s4941_s18 = sphi %s4990_s18, %s7011_s18  }
   0x4   : > { %s5015_s24 = sadd.s32 1, %s4953_s21   ;;  %s135_s25 = sadd.s32 1, %s4949_s20 }
   0x5   : > { %s132_s26 = ssub.s32 %s4953_s21, %s5015_s24  ;;  %p145_p0 = scmp.ne.s32.totalorder %s4949_s20, %s4945_s19 }
   0x6   : > { %p133_p1 = scmp.eq.s32.totalorder %s132_s26, 0  ;;  %p146_p2 = scmp.eq.s32.totalorder %s5011_s22, 1 }
   0x7   : > { %p151_p3 = scmp.ne.s32.totalorder %s4945_s19, %s4941_s18  ;;  %p152_p4 = scmp.eq.s32.totalorder %s4086_s23, 1 }
   0x8   : > { %s5026_s27 = scalar_select %p133_p1, %s4949_s20, %s135_s25  }
   0x9   : > { %p5028_p5 = por %p146_p2, %p145_p0  ;;  %p5032_p6 = por %p152_p4, %p151_p3 }
   0xa   : > { %p4089_p7 = scmp.ge.s32.totalorder %s4953_s21, 1  ;;  %p190_p8 = scmp.lt.s32.totalorder %s4953_s21, 3 }
   0xc   : > { %p191_p9 = pnand %p4089_p7, %p190_p8 }
   0xe   : > { %194 = sbr.rel (%p191_p9) target bundleno = 1099 (0x44b), region = 40 }
  0x15   : > { %p218_p10 = scmp.lt.s32.totalorder %s5011_s22, 1  ;;  %vm224_vm0 = vcmask 523264   ;;  %vm234_vm1 = vcmask 516096   ;;  %vm227_vm2 = vcmask 517120   ;;  %v4955_v0 = vmov 0.0   ;;  %v4817_v1 = vld [vmem:[%s6947_s1 + $0x40] sm:$0xff]  }
  0x16   : > { %235 = vst.msk [vmem:[#allocation2 + $0x18] sm:$0x1] %vm234_vm1, %v4955_v0  ;;  %236 = vst.msk [vmem:[#allocation2 + $0x30] sm:$0x1] %vm234_vm1, %v4955_v0  ;;  %v4818_v2 = vld [vmem:[%s6947_s1] sm:$0xff]   ;;  %4206 = vmatprep.subr.bf16.mxu0 %v4817_v1  ;;  %v4819_v3 = vld [vmem:[%s6947_s1 + $0x48] sm:$0xff]  }
  0x17   : > { %225 = vst.msk [vmem:[#allocation2] sm:$0xff] %vm224_vm0, %v4955_v0  ;;  %226 = vst.msk [vmem:[#allocation2 + $0x8] sm:$0xff] %vm224_vm0, %v4955_v0  ;;  %s219_s7 = scalar_select %p218_p10, %s5011_s22, 1  ;;  %4207 = vmatpush3.bf16.msra.mxu0 %v4818_v2  ;;  %v4820_v4 = vld [vmem:[%s6947_s1 + $0x8] sm:$0xff]   ;;  %v4821_v5 = vld [vmem:[%s6947_s1 + $0x50] sm:$0xff]   ;;  %vm547_vm3 = vcmask 1048064  }
  0x18   : > { %230 = vst.msk [vmem:[#allocation2 + $0x198] sm:$0xff] %vm224_vm0, %v4955_v0  ;;  %231 = vst.msk [vmem:[#allocation2 + $0x1a0] sm:$0xff] %vm224_vm0, %v4955_v0  ;;  %4208 = vmatprep.subr.bf16.mxu0 %v4819_v3  ;;  %s4956_s26 = smov 64   ;;  %s215_s11 = sand.u32 1, %s4945_s19  }
  0x19   : > { %237 = vst.msk [vmem:[#allocation2 + $0x48] sm:$0x1] %vm234_vm1, %v4955_v0  ;;  %238 = vst.msk [vmem:[#allocation2 + $0x60] sm:$0x1] %vm234_vm1, %v4955_v0  ;;  %s4204_s12 = sshll.u32 %s219_s7, 8  ;;  %s4205_s14 = sshll.u32 %s5011_s22, 12 }
  0x1a   : > { %239 = vst.msk [vmem:[#allocation2 + $0x78] sm:$0x1] %vm234_vm1, %v4955_v0  ;;  %240 = vst.msk [vmem:[#allocation2 + $0x90] sm:$0x1] %vm234_vm1, %v4955_v0  ;;  %s5209_s17 = scalar_lea.vmem %s6946_s0, %s4204_s12  ;;  %s4090_s12 = sshll.u32 %s215_s11, 8 }
  0x1b   : > { %241 = vst.msk [vmem:[#allocation2 + $0xa8] sm:$0x1] %vm234_vm1, %v4955_v0  ;;  %242 = vst.msk [vmem:[#allocation2 + $0xc0] sm:$0x1] %vm234_vm1, %v4955_v0  ;;  %v5215_v6 = vld [vmem:[%s5209_s17] sm:$0xff]  ;;  %v5218_v7 = vld [vmem:[%s5209_s17 + $0x8] sm:$0xff]  ;;  %4209 = vmatpush3.bf16.msra.mxu0 %v4820_v4  ;;  %s6893_s23 = scalar_lea.hbm %s6951_s5, %s4205_s14 }
  0x1c   : > { %243 = vst.msk [vmem:[#allocation2 + $0xd8] sm:$0x1] %vm234_vm1, %v4955_v0  ;;  %244 = vst.msk [vmem:[#allocation2 + $0xf0] sm:$0x1] %vm234_vm1, %v4955_v0  ;;  %v5221_v8 = vld [vmem:[%s5209_s17 + $0x10] sm:$0xff]  ;;  %v5228_v9 = vld [vmem:[%s5209_s17 + $0x18] sm:$0xff]  ;;  %4210 = vmatprep.subr.bf16.mxu0 %v4821_v5 }
  0x1d   : > { %245 = vst.msk [vmem:[#allocation2 + $0x108] sm:$0x1] %vm234_vm1, %v4955_v0  ;;  %246 = vst.msk [vmem:[#allocation2 + $0x120] sm:$0x1] %vm234_vm1, %v4955_v0  ;;  %v5233_v10 = vld [vmem:[%s5209_s17 + $0x20] sm:$0xff]  ;;  %v5236_v11 = vld [vmem:[%s5209_s17 + $0x28] sm:$0xff] }
  0x1e   : > { %247 = vst.msk [vmem:[#allocation2 + $0x138] sm:$0x1] %vm234_vm1, %v4955_v0  ;;  %248 = vst.msk [vmem:[#allocation2 + $0x150] sm:$0x1] %vm234_vm1, %v4955_v0  ;;  %v5245_v12 = vld [vmem:[%s5209_s17 + $0x30] sm:$0xff]  ;;  %v5248_v13 = vld [vmem:[%s5209_s17 + $0x38] sm:$0xff] }
  0x1f   : > { %249 = vst.msk [vmem:[#allocation2 + $0x168] sm:$0x1] %vm234_vm1, %v4955_v0  ;;  %250 = vst.msk [vmem:[#allocation2 + $0x180] sm:$0x1] %vm234_vm1, %v4955_v0  ;;  %v5253_v14 = vld [vmem:[%s5209_s17 + $0x40] sm:$0xff]  ;;  %v5256_v15 = vld [vmem:[%s5209_s17 + $0x48] sm:$0xff] }
  0x20   : > { %251 = vst.msk [vmem:[#allocation2 + $0x29] sm:$0x1] %vm234_vm1, %v4955_v0  ;;  %252 = vst.msk [vmem:[#allocation2 + $0x41] sm:$0x1] %vm234_vm1, %v4955_v0  ;;  %v5265_v16 = vld [vmem:[%s5209_s17 + $0x50] sm:$0xff]  ;;  %v5268_v17 = vld [vmem:[%s5209_s17 + $0x58] sm:$0xff] }
  0x21   : > { %253 = vst.msk [vmem:[#allocation2 + $0x59] sm:$0x1] %vm234_vm1, %v4955_v0  ;;  %254 = vst.msk [vmem:[#allocation2 + $0x71] sm:$0x1] %vm234_vm1, %v4955_v0  ;;  %v5271_v18 = vld [vmem:[%s5209_s17 + $0x60] sm:$0xff]  ;;  %v5278_v19 = vld [vmem:[%s5209_s17 + $0x68] sm:$0xff] }
  0x22   : > { %255 = vst.msk [vmem:[#allocation2 + $0x89] sm:$0x1] %vm234_vm1, %v4955_v0  ;;  %256 = vst.msk [vmem:[#allocation2 + $0xa1] sm:$0x1] %vm234_vm1, %v4955_v0  ;;  %v5283_v20 = vld [vmem:[%s5209_s17 + $0x70] sm:$0xff]  ;;  %v5286_v21 = vld [vmem:[%s5209_s17 + $0x78] sm:$0xff] }
  0x23   : > { %257 = vst.msk [vmem:[#allocation2 + $0xb9] sm:$0x1] %vm234_vm1, %v4955_v0  ;;  %258 = vst.msk [vmem:[#allocation2 + $0xd1] sm:$0x1] %vm234_vm1, %v4955_v0  ;;  %v435_v22 = vld [vmem:[#allocation2 + $0x1] sm:$0xff]  ;;  %v5301_v26 = vld [vmem:[%s5209_s17 + $0x90] sm:$0xff] }
  0x24   : > { %259 = vst.msk [vmem:[#allocation2 + $0xe9] sm:$0x1] %vm234_vm1, %v4955_v0  ;;  %260 = vst.msk [vmem:[#allocation2 + $0x101] sm:$0x1] %vm234_vm1, %v4955_v0  ;;  %v5295_v24 = vld [vmem:[%s5209_s17 + $0x80] sm:$0xff]  ;;  %v5298_v25 = vld [vmem:[%s5209_s17 + $0x88] sm:$0xff] }
  0x25   : > { %261 = vst.msk [vmem:[#allocation2 + $0x119] sm:$0x1] %vm234_vm1, %v4955_v0  ;;  %262 = vst.msk [vmem:[#allocation2 + $0x131] sm:$0x1] %vm234_vm1, %v4955_v0  ;;  %v5308_v27 = vld [vmem:[%s5209_s17 + $0x98] sm:$0xff]  ;;  %v5313_v28 = vld [vmem:[%s5209_s17 + $0xa0] sm:$0xff] }
  0x26   : > { %263 = vst.msk [vmem:[#allocation2 + $0x149] sm:$0x1] %vm234_vm1, %v4955_v0  ;;  %264 = vst.msk [vmem:[#allocation2 + $0x161] sm:$0x1] %vm234_vm1, %v4955_v0  ;;  %v5316_v29 = vld [vmem:[%s5209_s17 + $0xa8] sm:$0xff]  ;;  %s6748_s13 = scalar_lea.vmem [#allocation5], %s4090_s12 }
  0x27   : > { %265 = vst.msk [vmem:[#allocation2 + $0x179] sm:$0x1] %vm234_vm1, %v4955_v0  ;;  %266 = vst.msk [vmem:[#allocation2 + $0x191] sm:$0x1] %vm234_vm1, %v4955_v0  ;;  %s4024_s15 = sshll.u32 %s6748_s13, 4  ;;  %s6905_s22 = scalar_lea.sflag [#allocation6], %s215_s11  ;;  %s6895_s15 = int_to_ptr.vmem [resolvable:$true] %s4024_s15 }
  0x28   : > { %267 = vst.msk [vmem:[#allocation3] sm:$0xff] %vm224_vm0, %v4955_v0  ;;  %268 = vst.msk [vmem:[#allocation3 + $0x8] sm:$0xff] %vm224_vm0, %v4955_v0  ;;  %s4891_s25 = scalar_lea.vmem %s6895_s15, 4096  ;;  %s4957_s30 = smov [#allocation5]  }
  0x29   : > { %271 = vst.msk [vmem:[#allocation3 + $0x198] sm:$0xff] %vm224_vm0, %v4955_v0  ;;  %272 = vst.msk [vmem:[#allocation3 + $0x1a0] sm:$0xff] %vm224_vm0, %v4955_v0  ;;  %p4892_p11 = scmp.ne.s32.totalorder %s6895_s15, %s4891_s25  ;;  %s4895_s6 = sshll.u32 %s4957_s30, 4  ;;  %s4896_s6 = int_to_ptr.vmem [resolvable:$false] %s4895_s6 }
  0x2a   : > { %275 = vst.msk [vmem:[#allocation3 + $0x18] sm:$0x1] %vm234_vm1, %v4955_v0  ;;  %276 = vst.msk [vmem:[#allocation3 + $0x30] sm:$0x1] %vm234_vm1, %v4955_v0  ;;  %s4897_s7 = scalar_lea.vmem %s4896_s6, 8192  ;;  %p4898_p0 = scmp.lt.s32.totalorder %s6895_s15, %s4896_s6 }
  0x2b   : > { %277 = vst.msk [vmem:[#allocation3 + $0x48] sm:$0x1] %vm234_vm1, %v4955_v0  ;;  %278 = vst.msk [vmem:[#allocation3 + $0x60] sm:$0x1] %vm234_vm1, %v4955_v0  ;;  %p4893_p12 = pnand %p4892_p11, %p5028_p5  ;;  %p4899_p1 = scmp.lt.s32.totalorder %s4897_s7, %s4891_s25 }
  0x2c   : > { %279 = vst.msk [vmem:[#allocation3 + $0x78] sm:$0x1] %vm234_vm1, %v4955_v0  ;;  %280 = vst.msk [vmem:[#allocation3 + $0x90] sm:$0x1] %vm234_vm1, %v4955_v0 }
  0x2d   : > { %281 = vst.msk [vmem:[#allocation3 + $0xa8] sm:$0x1] %vm234_vm1, %v4955_v0  ;;  %282 = vst.msk [vmem:[#allocation3 + $0xc0] sm:$0x1] %vm234_vm1, %v4955_v0  ;;  %p4894_p13 = pneg %p4893_p12  ;;  %p4900_p2 = por %p4899_p1, %p4898_p0 }
  0x2e   : > { %283 = vst.msk [vmem:[#allocation3 + $0xd8] sm:$0x1] %vm234_vm1, %v4955_v0  ;;  %284 = vst.msk [vmem:[#allocation3 + $0xf0] sm:$0x1] %vm234_vm1, %v4955_v0 }
  0x2f   : > { %285 = vst.msk [vmem:[#allocation3 + $0x108] sm:$0x1] %vm234_vm1, %v4955_v0  ;;  %286 = vst.msk [vmem:[#allocation3 + $0x120] sm:$0x1] %vm234_vm1, %v4955_v0  ;;  %p4901_p3 = pnand %p4900_p2, %p4894_p13 }
  0x30   : > { %287 = vst.msk [vmem:[#allocation3 + $0x138] sm:$0x1] %vm234_vm1, %v4955_v0  ;;  %288 = vst.msk [vmem:[#allocation3 + $0x150] sm:$0x1] %vm234_vm1, %v4955_v0 }
  0x31   : > { %289 = vst.msk [vmem:[#allocation3 + $0x168] sm:$0x1] %vm234_vm1, %v4955_v0  ;;  %290 = vst.msk [vmem:[#allocation3 + $0x180] sm:$0x1] %vm234_vm1, %v4955_v0 }
  0x32   : > { %291 = vst.msk [vmem:[#allocation3 + $0x29] sm:$0x1] %vm234_vm1, %v4955_v0  ;;  %292 = vst.msk [vmem:[#allocation3 + $0x41] sm:$0x1] %vm234_vm1, %v4955_v0 }
  0x33   : > { %293 = vst.msk [vmem:[#allocation3 + $0x59] sm:$0x1] %vm234_vm1, %v4955_v0  ;;  %294 = vst.msk [vmem:[#allocation3 + $0x71] sm:$0x1] %vm234_vm1, %v4955_v0 }
  0x34   : > { %295 = vst.msk [vmem:[#allocation3 + $0x89] sm:$0x1] %vm234_vm1, %v4955_v0  ;;  %296 = vst.msk [vmem:[#allocation3 + $0xa1] sm:$0x1] %vm234_vm1, %v4955_v0 }
  0x35   : > { %297 = vst.msk [vmem:[#allocation3 + $0xb9] sm:$0x1] %vm234_vm1, %v4955_v0  ;;  %298 = vst.msk [vmem:[#allocation3 + $0xd1] sm:$0x1] %vm234_vm1, %v4955_v0 }
  0x36   : > { %299 = vst.msk [vmem:[#allocation3 + $0xe9] sm:$0x1] %vm234_vm1, %v4955_v0  ;;  %300 = vst.msk [vmem:[#allocation3 + $0x101] sm:$0x1] %vm234_vm1, %v4955_v0 }
  0x37   : > { %301 = vst.msk [vmem:[#allocation3 + $0x119] sm:$0x1] %vm234_vm1, %v4955_v0  ;;  %302 = vst.msk [vmem:[#allocation3 + $0x131] sm:$0x1] %vm234_vm1, %v4955_v0 }
  0x38   : > { %303 = vst.msk [vmem:[#allocation3 + $0x149] sm:$0x1] %vm234_vm1, %v4955_v0  ;;  %304 = vst.msk [vmem:[#allocation3 + $0x161] sm:$0x1] %vm234_vm1, %v4955_v0 }
  0x39   : > { %305 = vst.msk [vmem:[#allocation3 + $0x179] sm:$0x1] %vm234_vm1, %v4955_v0  ;;  %306 = vst.msk [vmem:[#allocation3 + $0x191] sm:$0x1] %vm234_vm1, %v4955_v0 }
  0x3a   : > { %228 = vst.msk [vmem:[#allocation2 + $0x10] sm:$0x3] %vm227_vm2, %v4955_v0  ;;  %232 = vst.msk [vmem:[#allocation2 + $0x1a8] sm:$0x3] %vm227_vm2, %v4955_v0 }
  0x3b   : > { %269 = vst.msk [vmem:[#allocation3 + $0x10] sm:$0x3] %vm227_vm2, %v4955_v0  ;;  %273 = vst.msk [vmem:[#allocation3 + $0x1a8] sm:$0x3] %vm227_vm2, %v4955_v0 }
  0x3c   : > { %339 = vst.msk [vmem:[#allocation2 + $0x19] sm:$0xff] %vm224_vm0, %v5215_v6  ;;  %340 = vst.msk [vmem:[#allocation2 + $0x21] sm:$0xff] %vm224_vm0, %v5218_v7 }
  0x3d   : > { %341 = vst.msk [vmem:[#allocation2 + $0x31] sm:$0xff] %vm224_vm0, %v5221_v8  ;;  %342 = vst.msk [vmem:[#allocation2 + $0x39] sm:$0xff] %vm224_vm0, %v5228_v9 }
  0x3e   : > { %343 = vst.msk [vmem:[#allocation2 + $0x49] sm:$0xff] %vm224_vm0, %v5233_v10  ;;  %344 = vst.msk [vmem:[#allocation2 + $0x51] sm:$0xff] %vm224_vm0, %v5236_v11 }
  0x3f   : > { %345 = vst.msk [vmem:[#allocation2 + $0x61] sm:$0xff] %vm224_vm0, %v5245_v12  ;;  %346 = vst.msk [vmem:[#allocation2 + $0x69] sm:$0xff] %vm224_vm0, %v5248_v13 }
  0x40   : > { %347 = vst.msk [vmem:[#allocation2 + $0x79] sm:$0xff] %vm224_vm0, %v5253_v14  ;;  %348 = vst.msk [vmem:[#allocation2 + $0x81] sm:$0xff] %vm224_vm0, %v5256_v15 }
  0x41   : > { %6973 = vst [vmem:[#allocation8_spill] sm:$0xff] %v5271_v18  ;;  %349 = vst.msk [vmem:[#allocation2 + $0x91] sm:$0xff] %vm224_vm0, %v5265_v16  ;;  %v436_v23 = vld [vmem:[#allocation2 + $0x9] sm:$0xff] }
  0x42   : > { %350 = vst.msk [vmem:[#allocation2 + $0x99] sm:$0xff] %vm224_vm0, %v5268_v17  ;;  %6974 = vst [vmem:[#allocation9_spill] sm:$0xff] %v5278_v19  ;;  %v467_v40 = vpack.c.bf16 %v436_v23, %v435_v22 }
  0x43   : > { %351 = vst.msk [vmem:[#allocation2 + $0xa9] sm:$0xff] %vm224_vm0, %v5271_v18  ;;  %6975 = vst [vmem:[#allocation10_spill] sm:$0xff] %v5286_v21  ;;  %v628_v30 = vld [vmem:[#allocation2 + $0x18] sm:$0xff]  ;;  %v629_v31 = vld [vmem:[#allocation2 + $0x20] sm:$0xff] }
  0x44   : > { %352 = vst.msk [vmem:[#allocation2 + $0xb1] sm:$0xff] %vm224_vm0, %v5278_v19  ;;  %353 = vst.msk [vmem:[#allocation2 + $0xc1] sm:$0xff] %vm224_vm0, %v5283_v20  ;;  %v630_v32 = vld [vmem:[#allocation2 + $0x30] sm:$0xff]  ;;  %v660_v33 = vpack.c.bf16 %v629_v31, %v628_v30  ;;  %v631_v34 = vld [vmem:[#allocation2 + $0x38] sm:$0xff] }
  0x45   : > { %354 = vst.msk [vmem:[#allocation2 + $0xc9] sm:$0xff] %vm224_vm0, %v5286_v21  ;;  %6976 = vst [vmem:[#allocation11_spill] sm:$0xff] %v5295_v24  ;;  %v437_v35 = vld [vmem:[#allocation2 + $0x19] sm:$0xff]  ;;  %v438_v36 = vld [vmem:[#allocation2 + $0x21] sm:$0xff]  ;;  %v661_v37 = vpack.c.bf16 %v631_v34, %v630_v32 }
  0x46   : > { %6977 = vst [vmem:[#allocation12_spill] sm:$0xff] %v5298_v25  ;;  %6978 = vst [vmem:[#allocation13_spill] sm:$0xff] %v5301_v26  ;;  %v632_v38 = vld [vmem:[#allocation2 + $0x48] sm:$0xff]  ;;  %v633_v39 = vld [vmem:[#allocation2 + $0x50] sm:$0xff]  ;;  %692 = vrot.lane.b32.xlu0 %v660_v33, %s4956_s26  ;;  %v468_v44 = vpack.c.bf16 %v438_v36, %v437_v35 }
  0x47   : > { %355 = vst.msk [vmem:[#allocation2 + $0xd9] sm:$0xff] %vm224_vm0, %v5295_v24  ;;  %356 = vst.msk [vmem:[#allocation2 + $0xe1] sm:$0xff] %vm224_vm0, %v5298_v25  ;;  %v662_v41 = vpack.c.bf16 %v633_v39, %v632_v38  ;;  %v634_v42 = vld [vmem:[#allocation2 + $0x60] sm:$0xff]  ;;  %v635_v43 = vld [vmem:[#allocation2 + $0x68] sm:$0xff]  ;;  %694 = vrot.lane.b32.xlu1 %v661_v37, %s4956_s26 }
  0x48   : > { %6979 = vst [vmem:[#allocation14_spill] sm:$0xff] %v5308_v27  ;;  %357 = vst.msk [vmem:[#allocation2 + $0xf1] sm:$0xff] %vm224_vm0, %v5301_v26  ;;  %v663_v45 = vpack.c.bf16 %v635_v43, %v634_v42  ;;  %v636_v46 = vld [vmem:[#allocation2 + $0x78] sm:$0xff]  ;;  %v637_v49 = vld [vmem:[#allocation2 + $0x80] sm:$0xff] }
  0x49   : > { %6980 = vst [vmem:[#allocation15_spill] sm:$0xff] %v5313_v28  ;;  %6981 = vst [vmem:[#allocation16_spill] sm:$0xff] %v5316_v29  ;;  %v439_v47 = vld [vmem:[#allocation2 + $0x31] sm:$0xff]  ;;  %v440_v48 = vld [vmem:[#allocation2 + $0x39] sm:$0xff]  ;;  %v5329_v50 = vpack.c.bf16 %v637_v49, %v636_v46 }
  0x4a   : > { %358 = vst.msk [vmem:[#allocation2 + $0xf9] sm:$0xff] %vm224_vm0, %v5308_v27  ;;  %359 = vst.msk [vmem:[#allocation2 + $0x109] sm:$0xff] %vm224_vm0, %v5313_v28  ;;  %v638_v51 = vld [vmem:[#allocation2 + $0x90] sm:$0xff]  ;;  %v639_v52 = vld [vmem:[#allocation2 + $0x98] sm:$0xff]  ;;  %499 = vrot.lane.b32.xlu0 %v467_v40, %s4956_s26  ;;  %v5336_v56 = vpack.c.bf16 %v440_v48, %v439_v47 }
  0x4b   : > { %360 = vst.msk [vmem:[#allocation2 + $0x111] sm:$0xff] %vm224_vm0, %v5316_v29  ;;  %420 = vst.msk [vmem:[#allocation4 + $0x28] sm:$0xff] %vm224_vm0, %v660_v33  ;;  %v5333_v53 = vpack.c.bf16 %v639_v52, %v638_v51  ;;  %v640_v54 = vld [vmem:[#allocation2 + $0xa8] sm:$0xff]  ;;  %v641_v55 = vld [vmem:[#allocation2 + $0xb0] sm:$0xff]  ;;  %501 = vrot.lane.b32.xlu1 %v468_v44, %s4956_s26 }
  0x4c   : > { %421 = vst.msk [vmem:[#allocation4 + $0x50] sm:$0xff] %vm224_vm0, %v661_v37  ;;  %422 = vst.msk [vmem:[#allocation4 + $0x78] sm:$0xff] %vm224_vm0, %v662_v41  ;;  %v5338_v57 = vpack.c.bf16 %v641_v55, %v640_v54  ;;  %v642_v58 = vld [vmem:[#allocation2 + $0xc0] sm:$0xff]  ;;  %v441_v59 = vld [vmem:[#allocation2 + $0x49] sm:$0xff] }
  0x4d   : > { %423 = vst.msk [vmem:[#allocation4 + $0xa0] sm:$0xff] %vm224_vm0, %v663_v45  ;;  %424 = vst.msk [vmem:[#allocation4 + $0xc8] sm:$0xff] %vm224_vm0, %v5329_v50  ;;  %v442_v60 = vld [vmem:[#allocation2 + $0x51] sm:$0xff]  ;;  %v643_v61 = vld [vmem:[#allocation2 + $0xc8] sm:$0xff] }
  0x4e   : > { %425 = vst.msk [vmem:[#allocation4 + $0xf0] sm:$0xff] %vm224_vm0, %v5333_v53  ;;  %v5344_v62 = vpack.c.bf16 %v643_v61, %v642_v58  ;;  %v644_v63 = vld [vmem:[#allocation2 + $0xd8] sm:$0xff]  ;;  %v645_v0 = vld [vmem:[#allocation2 + $0xe0] sm:$0xff]  ;;  %426 = vst.msk [vmem:[#allocation4 + $0x118] sm:$0xff] %vm224_vm0, %v5338_v57  ;;  %696 = vrot.lane.b32.xlu0 %v662_v41, %s4956_s26  ;;  %v5353_v4 = vpack.c.bf16 %v442_v60, %v441_v59 }
  0x4f   : > { %v5349_v1 = vpack.c.bf16 %v645_v0, %v644_v63  ;;  %v646_v2 = vld [vmem:[#allocation2 + $0xf0] sm:$0xff]  ;;  %503 = vrot.lane.b32.xlu1 %v5336_v56, %s4956_s26  ;;  %v443_v23 = vld [vmem:[#allocation2 + $0x61] sm:$0xff]  ;;  %v5367_v34 = vld [vmem:[%s5209_s17 + $0xb8] sm:$0xff] }
  0x50   : > { %427 = vst.msk [vmem:[#allocation4 + $0x140] sm:$0xff] %vm224_vm0, %v5344_v62  ;;  %v444_v30 = vld [vmem:[#allocation2 + $0x69] sm:$0xff]  ;;  %6983 = vst [vmem:[#allocation18_spill] sm:$0xff] %v5367_v34  ;;  %v445_v35 = vld [vmem:[#allocation2 + $0x79] sm:$0xff] }
  0x51   : > { %v647_v3 = vld [vmem:[#allocation2 + $0xf8] sm:$0xff]  ;;  %v648_v22 = vld [vmem:[#allocation2 + $0x108] sm:$0xff]  ;;  %428 = vst.msk [vmem:[#allocation4 + $0x168] sm:$0xff] %vm224_vm0, %v5349_v1  ;;  %v5364_v33 = vld [vmem:[%s5209_s17 + $0xb0] sm:$0xff]  ;;  %v5384_v39 = vpack.c.bf16 %v444_v30, %v443_v23 }
  0x52   : > { %v5355_v5 = vpack.c.bf16 %v647_v3, %v646_v2  ;;  %v649_v31 = vld [vmem:[#allocation2 + $0x110] sm:$0xff]  ;;  %6982 = vst [vmem:[#allocation17_spill] sm:$0xff] %v5364_v33  ;;  %698 = vrot.lane.b32.xlu0 %v663_v45, %s4956_s26  ;;  %v446_v36 = vld [vmem:[#allocation2 + $0x81] sm:$0xff]  ;;  %361 = vst.msk [vmem:[#allocation2 + $0x121] sm:$0xff] %vm224_vm0, %v5364_v33 }
  0x53   : > { %v5361_v32 = vpack.c.bf16 %v649_v31, %v648_v22  ;;  %362 = vst.msk [vmem:[#allocation2 + $0x129] sm:$0xff] %vm224_vm0, %v5367_v34  ;;  %v5377_v37 = vld [vmem:[%s5209_s17 + $0xc0] sm:$0xff]  ;;  %v5380_v38 = vld [vmem:[%s5209_s17 + $0xc8] sm:$0xff]  ;;  %505 = vrot.lane.b32.xlu1 %v5353_v4, %s4956_s26  ;;  %v5391_v40 = vld [vmem:[%s5209_s17 + $0xd0] sm:$0xff]  ;;  %v5428_v59 = vpack.c.bf16 %v446_v36, %v445_v35 }
  0x54   : > { %429 = vst.msk [vmem:[#allocation4 + $0x190] sm:$0xff] %vm224_vm0, %v5355_v5  ;;  %6984 = vst [vmem:[#allocation19_spill] sm:$0xff] %v5377_v37  ;;  %v5394_v41 = vld [vmem:[%s5209_s17 + $0xd8] sm:$0xff]  ;;  %v5397_v42 = vld [vmem:[%s5209_s17 + $0xe0] sm:$0xff] }
  0x55   : > { %6985 = vst [vmem:[#allocation20_spill] sm:$0xff] %v5380_v38  ;;  %363 = vst.msk [vmem:[#allocation2 + $0x139] sm:$0xff] %vm224_vm0, %v5377_v37  ;;  %v5406_v43 = vld [vmem:[%s5209_s17 + $0xe8] sm:$0xff]  ;;  %v5411_v44 = vld [vmem:[%s5209_s17 + $0xf0] sm:$0xff] }
  0x56   : > { %364 = vst.msk [vmem:[#allocation2 + $0x141] sm:$0xff] %vm224_vm0, %v5380_v38  ;;  %6986 = vst [vmem:[#allocation21_spill] sm:$0xff] %v5391_v40  ;;  %v5414_v45 = vld [vmem:[%s5209_s17 + $0xf8] sm:$0xff]  ;;  %v821_v47 = vld [vmem:[#allocation2 + $0x22] sm:$0xff]  ;;  %700 = vrot.lane.b32.xlu0 %v5329_v50, %s4956_s26 }
  0x57   : > { %6987 = vst [vmem:[#allocation22_spill] sm:$0xff] %v5394_v41  ;;  %6988 = vst [vmem:[#allocation23_spill] sm:$0xff] %v5397_v42  ;;  %v820_v46 = vld [vmem:[#allocation2 + $0x1a] sm:$0xff]  ;;  %v822_v48 = vld [vmem:[#allocation2 + $0x32] sm:$0xff]  ;;  %507 = vrot.lane.b32.xlu1 %v5384_v39, %s4956_s26 }
  0x58   : > { %430 = vst.msk [vmem:[#allocation4 + $0x1b8] sm:$0xff] %vm224_vm0, %v5361_v32  ;;  %365 = vst.msk [vmem:[#allocation2 + $0x151] sm:$0xff] %vm224_vm0, %v5391_v40  ;;  %v447_v49 = vld [vmem:[#allocation2 + $0x91] sm:$0xff]  ;;  %v448_v51 = vld [vmem:[#allocation2 + $0x99] sm:$0xff]  ;;  %v5424_v52 = vpack.c.bf16 %v821_v47, %v820_v46 }
  0x59   : > { %366 = vst.msk [vmem:[#allocation2 + $0x159] sm:$0xff] %vm224_vm0, %v5394_v41  ;;  %6989 = vst [vmem:[#allocation24_spill] sm:$0xff] %v5406_v43  ;;  %v823_v54 = vld [vmem:[#allocation2 + $0x3a] sm:$0xff]  ;;  %v824_v55 = vld [vmem:[#allocation2 + $0x4a] sm:$0xff]  ;;  %v5452_v46 = vpack.c.bf16 %v448_v51, %v447_v49 }
  0x5a   : > { %367 = vst.msk [vmem:[#allocation2 + $0x169] sm:$0xff] %vm224_vm0, %v5397_v42  ;;  %6990 = vst [vmem:[#allocation25_spill] sm:$0xff] %v5411_v44  ;;  %v825_v58 = vld [vmem:[#allocation2 + $0x52] sm:$0xff]  ;;  %v5430_v60 = vpack.c.bf16 %v823_v54, %v822_v48  ;;  %v826_v63 = vld [vmem:[#allocation2 + $0x62] sm:$0xff]  ;;  %702 = vrot.lane.b32.xlu0 %v5333_v53, %s4956_s26 }
  0x5b   : > { %6991 = vst [vmem:[#allocation26_spill] sm:$0xff] %v5414_v45  ;;  %368 = vst.msk [vmem:[#allocation2 + $0x171] sm:$0xff] %vm224_vm0, %v5406_v43  ;;  %v5432_v61 = vpack.c.bf16 %v825_v58, %v824_v55  ;;  %v827_v0 = vld [vmem:[#allocation2 + $0x6a] sm:$0xff]  ;;  %v828_v2 = vld [vmem:[#allocation2 + $0x7a] sm:$0xff]  ;;  %509 = vrot.lane.b32.xlu1 %v5428_v59, %s4956_s26 }
  0x5c   : > { %369 = vst.msk [vmem:[#allocation2 + $0x181] sm:$0xff] %vm224_vm0, %v5411_v44  ;;  %370 = vst.msk [vmem:[#allocation2 + $0x189] sm:$0xff] %vm224_vm0, %v5414_v45  ;;  %v5434_v50 = vpack.c.bf16 %v827_v0, %v826_v63  ;;  %v829_v3 = vld [vmem:[#allocation2 + $0x82] sm:$0xff]  ;;  %v652_v35 = vld [vmem:[#allocation2 + $0x138] sm:$0xff] }
  0x5d   : > { %613 = vst.msk [vmem:[#allocation4 + $0x30] sm:$0xff] %vm224_vm0, %v5424_v52  ;;  %v650_v22 = vld [vmem:[#allocation2 + $0x120] sm:$0xff]  ;;  %v651_v23 = vld [vmem:[#allocation2 + $0x128] sm:$0xff]  ;;  %v5438_v30 = vpack.c.bf16 %v829_v3, %v828_v2  ;;  %614 = vst.msk [vmem:[#allocation4 + $0x58] sm:$0xff] %vm224_vm0, %v5430_v60 }
  0x5e   : > { %615 = vst.msk [vmem:[#allocation4 + $0x80] sm:$0xff] %vm224_vm0, %v5432_v61  ;;  %v5446_v31 = vpack.c.bf16 %v651_v23, %v650_v22  ;;  %v653_v36 = vld [vmem:[#allocation2 + $0x140] sm:$0xff]  ;;  %616 = vst.msk [vmem:[#allocation4 + $0xa8] sm:$0xff] %vm224_vm0, %v5434_v50  ;;  %v449_v47 = vld [vmem:[#allocation2 + $0xa9] sm:$0xff]  ;;  %704 = vrot.lane.b32.xlu0 %v5338_v57, %s4956_s26 }
  0x5f   : > { %v5454_v48 = vpack.c.bf16 %v653_v36, %v652_v35  ;;  %v654_v54 = vld [vmem:[#allocation2 + $0x150] sm:$0xff]  ;;  %617 = vst.msk [vmem:[#allocation4 + $0xd0] sm:$0xff] %vm224_vm0, %v5438_v30  ;;  %v451_v49 = vld [vmem:[#allocation2 + $0xc1] sm:$0xff]  ;;  %511 = vrot.lane.b32.xlu1 %v5452_v46, %s4956_s26  ;;  %v4823_v36 = vld [vmem:[%s6947_s1 + $0x58] sm:$0xff]  }
  0x60   : > { %v655_v55 = vld [vmem:[#allocation2 + $0x158] sm:$0xff]  ;;  %431 = vst.msk [vmem:[#allocation4 + $0x1e0] sm:$0xff] %vm224_vm0, %v5446_v31  ;;  %v452_v51 = vld [vmem:[#allocation2 + $0xc9] sm:$0xff] }
  0x61   : > { %v450_v53 = vld [vmem:[#allocation2 + $0xb1] sm:$0xff]  ;;  %v5458_v58 = vpack.c.bf16 %v655_v55, %v654_v54  ;;  %v656_v63 = vld [vmem:[#allocation2 + $0x168] sm:$0xff]  ;;  %432 = vst.msk [vmem:[#allocation4 + $0x208] sm:$0xff] %vm224_vm0, %v5454_v48  ;;  %v831_v35 = vld [vmem:[#allocation2 + $0x9a] sm:$0xff] }
  0x62   : > { %v657_v0 = vld [vmem:[#allocation2 + $0x170] sm:$0xff]  ;;  %v5472_v3 = vpack.c.bf16 %v450_v53, %v449_v47  ;;  %v4824_v47 = vld [vmem:[%s6947_s1 + $0x18] sm:$0xff]   ;;  %706 = vrot.lane.b32.xlu0 %v5344_v62, %s4956_s26  ;;  %v454_v55 = vld [vmem:[#allocation2 + $0xe1] sm:$0xff] }
  0x63   : > { %v5462_v2 = vpack.c.bf16 %v657_v0, %v656_v63  ;;  %433 = vst.msk [vmem:[#allocation4 + $0x230] sm:$0xff] %vm224_vm0, %v5458_v58  ;;  %v4822_v22 = vld [vmem:[%s6947_s1 + $0x10] sm:$0xff]   ;;  %v453_v54 = vld [vmem:[#allocation2 + $0xd9] sm:$0xff]  ;;  %v5496_v63 = vpack.c.bf16 %v452_v51, %v451_v49  ;;  %v372_v42 = vld [vmem:[#allocation2 + $0x8] sm:$0xff] }
  0x64   : > { %v830_v23 = vld [vmem:[#allocation2 + $0x92] sm:$0xff]  ;;  %4211 = vmatpush3.bf16.msra.mxu0 %v4822_v22  ;;  %v4825_v53 = vld [vmem:[%s6947_s1 + $0x60] sm:$0xff]   ;;  %513 = vrot.lane.b32.xlu1 %v5472_v3, %s4956_s26  ;;  %v832_v62 = vld [vmem:[#allocation2 + $0xaa] sm:$0xff]  ;;  %v5510_v51 = vpack.c.bf16 %v454_v55, %v453_v54 }
  0x65   : > { %434 = vst.msk [vmem:[#allocation4 + $0x258] sm:$0xff] %vm224_vm0, %v5462_v2  ;;  %v5479_v57 = vpack.c.bf16 %v831_v35, %v830_v23  ;;  %4212 = vmatprep.subr.bf16.mxu0 %v4823_v36  ;;  %v4826_v0 = vld [vmem:[%s6947_s1 + $0x20] sm:$0xff]   ;;  %v833_v22 = vld [vmem:[#allocation2 + $0xb2] sm:$0xff]  ;;  %v4827_v35 = vld [vmem:[%s6947_s1 + $0x68] sm:$0xff]  }
  0x66   : > { %v5501_v23 = vpack.c.bf16 %v833_v22, %v832_v62  ;;  %v564_v36 = vld [vmem:[#allocation2 + $0x2] sm:$0xff]  ;;  %708 = vrot.lane.b32.xlu0 %v5349_v1, %s4956_s26  ;;  %v455_v43 = vld [vmem:[#allocation2 + $0xf1] sm:$0xff]  ;;  %v456_v45 = vld [vmem:[#allocation2 + $0xf9] sm:$0xff] }
  0x67   : > { %618 = vst.msk [vmem:[#allocation4 + $0xf8] sm:$0xff] %vm224_vm0, %v5479_v57  ;;  %v565_v49 = vld [vmem:[#allocation2 + $0xa] sm:$0xff]  ;;  %v371_v22 = vld [vmem:[#allocation2] sm:$0xff]  ;;  %v841_v41 = vld [vmem:[#allocation2 + $0x112] sm:$0xff] }
  0x68   : > { %4213 = vmatpush3.bf16.msra.mxu0 %v4824_v47  ;;  %515 = vrot.lane.b32.xlu1 %v5496_v63, %s4956_s26  ;;  %v596_v47 = vpack.c.bf16 %v565_v49, %v564_v36  ;;  %619 = vst.msk [vmem:[#allocation4 + $0x120] sm:$0xff] %vm224_vm0, %v5501_v23  ;;  %v4828_v62 = vld [vmem:[%s6947_s1 + $0x28] sm:$0xff]   ;;  %v4829_v1 = vld [vmem:[%s6947_s1 + $0x70] sm:$0xff]   ;;  %v403_v54 = vpack.c.bf16 %v372_v42, %v371_v22 }
  0x69   : > { %4214 = vmatprep.subr.bf16.mxu0 %v4825_v53  ;;  %v457_v55 = vld [vmem:[#allocation2 + $0x109] sm:$0xff]  ;;  %v5525_v49 = vpack.c.bf16 %v456_v45, %v455_v43  ;;  %v459_v43 = vld [vmem:[#allocation2 + $0x121] sm:$0xff]  ;;  %v595_v28 = vld [vmem:[#allocation2 + $0x172] sm:$0xff] }
  0x6a   : > { %612 = vst.msk [vmem:[#allocation4 + $0x8] sm:$0xff] %vm224_vm0, %v596_v47  ;;  %710 = vrot.lane.b32.xlu0 %v5355_v5, %s4956_s26  ;;  %v834_v53 = vld [vmem:[#allocation2 + $0xc2] sm:$0xff]  ;;  %v835_v36 = vld [vmem:[#allocation2 + $0xca] sm:$0xff]  ;;  %419 = vst.msk [vmem:[#allocation4] sm:$0xff] %vm224_vm0, %v403_v54 }
  0x6b   : > { %v5528_v47 = vpack.c.bf16 %v835_v36, %v834_v53  ;;  %v4830_v42 = vld [vmem:[%s6947_s1 + $0x30] sm:$0xff]   ;;  %v4831_v5 = vld [vmem:[%s6947_s1 + $0x78] sm:$0xff]   ;;  %v837_v22 = vld [vmem:[#allocation2 + $0xe2] sm:$0xff] }
  0x6c   : > { %4215 = vmatpush3.bf16.msra.mxu0 %v4826_v0  ;;  %517 = vrot.lane.b32.xlu1 %v5510_v51, %s4956_s26  ;;  %v458_v0 = vld [vmem:[#allocation2 + $0x111] sm:$0xff]  ;;  %v460_v45 = vld [vmem:[#allocation2 + $0x129] sm:$0xff]  ;;  %v839_v53 = vld [vmem:[#allocation2 + $0xfa] sm:$0xff] }
  0x6d   : > { %4216 = vmatprep.subr.bf16.mxu0 %v4827_v35  ;;  %v836_v35 = vld [vmem:[#allocation2 + $0xda] sm:$0xff]  ;;  %620 = vst.msk [vmem:[#allocation4 + $0x148] sm:$0xff] %vm224_vm0, %v5528_v47  ;;  %v838_v54 = vld [vmem:[#allocation2 + $0xf2] sm:$0xff]  ;;  %v842_v37 = vld [vmem:[#allocation2 + $0x122] sm:$0xff] }
  0x6e   : > { %712 = vrot.lane.b32.xlu0 %v5361_v32, %s4956_s26  ;;  %v4832_v36 = vld [vmem:[%s6947_s1 + $0x38] sm:$0xff]   ;;  %v5547_v44 = vpack.c.bf16 %v837_v22, %v836_v35  ;;  %v5549_v38 = vpack.c.bf16 %v839_v53, %v838_v54  ;;  %v840_v32 = vld [vmem:[#allocation2 + $0x10a] sm:$0xff]  ;;  %v4834_v35 = vld [vmem:[%s6947_s1 + $0xc0] sm:$0xff]  }
  0x6f   : > { %v5556_v40 = vpack.c.bf16 %v841_v41, %v840_v32  ;;  %v461_v22 = vld [vmem:[#allocation2 + $0x139] sm:$0xff]  ;;  %4318 = vmatprep.subr.bf16.mxu1 %v4834_v35  ;;  %v845_v53 = vld [vmem:[#allocation2 + $0x142] sm:$0xff]  ;;  %v4839_v32 = vld [vmem:[%s6947_s1 + $0xd0] sm:$0xff]  }
  0x70   : > { %4217 = vmatpush3.bf16.msra.mxu0 %v4828_v62  ;;  %519 = vrot.lane.b32.xlu1 %v5525_v49, %s4956_s26  ;;  %v5542_v62 = vpack.c.bf16 %v458_v0, %v457_v55  ;;  %v843_v55 = vld [vmem:[#allocation2 + $0x12a] sm:$0xff]  ;;  %621 = vst.msk [vmem:[#allocation4 + $0x170] sm:$0xff] %vm224_vm0, %v5547_v44  ;;  %622 = vst.msk [vmem:[#allocation4 + $0x198] sm:$0xff] %vm224_vm0, %v5549_v38  ;;  %v4835_v41 = vld [vmem:[%s6947_s1 + $0x80] sm:$0xff]  }
  0x71   : > { %4218 = vmatprep.subr.bf16.mxu0 %v4829_v1  ;;  %v5554_v1 = vld [vmem:[%s6947_s1 + $0x100] sm:$0xff]   ;;  %v5560_v0 = vpack.c.bf16 %v843_v55, %v842_v37  ;;  %623 = vst.msk [vmem:[#allocation4 + $0x1c0] sm:$0xff] %vm224_vm0, %v5556_v40  ;;  %v5576_v37 = vpack.c.bf16 %v460_v45, %v459_v43  ;;  %4319 = vmatpush3.bf16.msra.mxu1 %v4835_v41  ;;  %v463_v43 = vld [vmem:[#allocation2 + $0x151] sm:$0xff]  ;;  %v659_v41 = vld [vmem:[#allocation2 + $0x188] sm:$0xff] }
  0x72   : > { %714 = vrot.lane.b32.xlu0 %v5446_v31, %s4956_s26  ;;  %v4837_v31 = vld [vmem:[%s6947_s1 + $0xc8] sm:$0xff]   ;;  %v844_v54 = vld [vmem:[#allocation2 + $0x13a] sm:$0xff] }
  0x73   : > { %624 = vst.msk [vmem:[#allocation4 + $0x1e8] sm:$0xff] %vm224_vm0, %v5560_v0  ;;  %v5589_v45 = vpack.c.bf16 %v845_v53, %v844_v54  ;;  %v464_v55 = vld [vmem:[#allocation2 + $0x159] sm:$0xff]  ;;  %4320 = vmatprep.subr.bf16.mxu1 %v4837_v31  ;;  %v466_v31 = vld [vmem:[#allocation2 + $0x171] sm:$0xff]  ;;  %v4845_v33 = vld [vmem:[%s6947_s1 + $0xe8] sm:$0xff]  }
  0x74   : > { %4219 = vmatpush3.bf16.msra.mxu0 %v4830_v42  ;;  %521 = vrot.lane.b32.xlu1 %v5542_v62, %s4956_s26  ;;  %v462_v42 = vld [vmem:[#allocation2 + $0x141] sm:$0xff]  ;;  %v5612_v53 = vpack.c.bf16 %v464_v55, %v463_v43  ;;  %v594_v34 = vld [vmem:[#allocation2 + $0x16a] sm:$0xff] }
  0x75   : > { %4220 = vmatprep.subr.bf16.mxu0 %v4831_v5  ;;  %v4838_v5 = vld [vmem:[%s6947_s1 + $0x88] sm:$0xff]   ;;  %625 = vst.msk [vmem:[#allocation4 + $0x210] sm:$0xff] %vm224_vm0, %v5589_v45  ;;  %1200 = vst.msk [vmem:[#allocation4 + $0x1d8] sm:$0xff] %vm224_vm0, %v5589_v45  ;;  %v658_v35 = vld [vmem:[#allocation2 + $0x180] sm:$0xff] }
  0x76   : > { %716 = vrot.lane.b32.xlu0 %v5454_v48, %s4956_s26  ;;  %4321 = vmatpush3.bf16.msra.mxu1 %v4838_v5  ;;  %v4840_v48 = vld [vmem:[%s6947_s1 + $0x90] sm:$0xff]   ;;  %v847_v54 = vld [vmem:[#allocation2 + $0x15a] sm:$0xff]  ;;  %v675_v43 = vpack.c.bf16 %v659_v41, %v658_v35 }
  0x77   : > { %4322 = vmatprep.subr.bf16.mxu1 %v4839_v32  ;;  %v846_v5 = vld [vmem:[#allocation2 + $0x152] sm:$0xff]  ;;  %v4844_v55 = vld [vmem:[%s6947_s1 + $0xa0] sm:$0xff]   ;;  %v760_v27 = vld [vmem:[#allocation2 + $0x49] sm:$0xff] }
  0x78   : > { %4221 = vmatpush3.bf16.msra.mxu0 %v4832_v36  ;;  %523 = vrot.lane.b32.xlu1 %v5576_v37, %s4956_s26  ;;  %v5596_v36 = vpack.c.bf16 %v462_v42, %v461_v22  ;;  %v4841_v22 = vld [vmem:[%s6947_s1 + $0xd8] sm:$0xff]   ;;  %v465_v42 = vld [vmem:[#allocation2 + $0x169] sm:$0xff]  ;;  %v5617_v29 = vpack.c.bf16 %v847_v54, %v846_v5  ;;  %v1041_v5 = vld [vmem:[#allocation2 + $0x181] sm:$0xff] }
  0x79   : > { %4694 = vmatprep.subr.bf16.mxu0 %v5554_v1  ;;  %v4842_v32 = vld [vmem:[%s6947_s1 + $0x98] sm:$0xff]   ;;  %v1042_v54 = vld [vmem:[#allocation2 + $0x189] sm:$0xff]  ;;  %v757_v41 = vld [vmem:[#allocation2 + $0x21] sm:$0xff] }
  0x7a   : > { %718 = vrot.lane.b32.xlu0 %v5458_v58, %s4956_s26  ;;  %4323 = vmatpush3.bf16.msra.mxu1 %v4840_v48  ;;  %v4843_v58 = vld [vmem:[%s6947_s1 + $0xe0] sm:$0xff]   ;;  %626 = vst.msk [vmem:[#allocation4 + $0x238] sm:$0xff] %vm224_vm0, %v5617_v29  ;;  %1201 = vst.msk [vmem:[#allocation4 + $0x200] sm:$0xff] %vm224_vm0, %v5617_v29  ;;  %v5631_v48 = vpack.c.bf16 %v595_v28, %v594_v34  ;;  %v5640_v25 = vpack.c.bf16 %v1042_v54, %v1041_v5  ;;  %v950_v28 = vld [vmem:[#allocation2 + $0x38] sm:$0xff] }
  0x7b   : > { %4324 = vmatprep.subr.bf16.mxu1 %v4841_v22  ;;  %v5635_v22 = vpack.c.bf16 %v466_v31, %v465_v42  ;;  %v756_v34 = vld [vmem:[#allocation2 + $0x19] sm:$0xff]  ;;  %v4846_v31 = vld [vmem:[%s6947_s1 + $0xa8] sm:$0xff]  }
  0x7c   : > { %525 = vrot.lane.b32.xlu1 %v5596_v36, %s4956_s26  ;;  %627 = vst.msk [vmem:[#allocation4 + $0x260] sm:$0xff] %vm224_vm0, %v5631_v48  ;;  %1202 = vst.msk [vmem:[#allocation4 + $0x228] sm:$0xff] %vm224_vm0, %v5631_v48  ;;  %v788_v42 = vpack.c.bf16 %v757_v41, %v756_v34  ;;  %v951_v5 = vld [vmem:[#allocation2 + $0x48] sm:$0xff]  ;;  %v953_v41 = vld [vmem:[#allocation2 + $0x60] sm:$0xff] }
  0x7d   : > { %819 = vst.msk [vmem:[#allocation4 + $0x268] sm:$0xff] %vm224_vm0, %v5640_v25 }
  0x7e   : > { %720 = vrot.lane.b32.xlu0 %v5462_v2, %s4956_s26  ;;  %4325 = vmatpush3.bf16.msra.mxu1 %v4842_v32  ;;  %v949_v2 = vld [vmem:[#allocation2 + $0x30] sm:$0xff]  ;;  %804 = vst.msk [vmem:[#allocation4 + $0x10] sm:$0xff] %vm224_vm0, %v788_v42  ;;  %v954_v42 = vld [vmem:[#allocation2 + $0x68] sm:$0xff] }
  0x7f   : > { %4326 = vmatprep.subr.bf16.mxu1 %v4843_v58  ;;  %v981_v35 = vpack.c.bf16 %v950_v28, %v949_v2  ;;  %v4847_v32 = vld [vmem:[%s6947_s1 + $0xf0] sm:$0xff]   ;;  %v759_v28 = vld [vmem:[#allocation2 + $0x39] sm:$0xff] }
  0x80   : > { %527 = vrot.lane.b32.xlu1 %v5612_v53, %s4956_s26  ;;  %v4848_v58 = vld [vmem:[%s6947_s1 + $0xb0] sm:$0xff]  }
  0x81   : > { %997 = vst.msk [vmem:[#allocation4 + $0x18] sm:$0xff] %vm224_vm0, %v981_v35  ;;  %v758_v2 = vld [vmem:[#allocation2 + $0x31] sm:$0xff] }
  0x82   : > { %722 = vrot.lane.b32.xlu0 %v675_v43, %s4956_s26  ;;  %4327 = vmatpush3.bf16.msra.mxu1 %v4844_v55  ;;  %v850_v43 = vld [vmem:[#allocation2 + $0x182] sm:$0xff]  ;;  %v851_v55 = vld [vmem:[#allocation2 + $0x18a] sm:$0xff]  ;;  %v789_v35 = vpack.c.bf16 %v759_v28, %v758_v2 }
  0x83   : > { %4328 = vmatprep.subr.bf16.mxu1 %v4845_v33  ;;  %v5666_v54 = vpack.c.bf16 %v851_v55, %v850_v43  ;;  %v952_v33 = vld [vmem:[#allocation2 + $0x50] sm:$0xff]  ;;  %v956_v55 = vld [vmem:[#allocation2 + $0x80] sm:$0xff] }
  0x84   : > { %529 = vrot.lane.b32.xlu1 %v5635_v22, %s4956_s26  ;;  %v982_v34 = vpack.c.bf16 %v952_v33, %v951_v5  ;;  %805 = vst.msk [vmem:[#allocation4 + $0x38] sm:$0xff] %vm224_vm0, %v789_v35  ;;  %v761_v43 = vld [vmem:[#allocation2 + $0x51] sm:$0xff]  ;;  %v762_v5 = vld [vmem:[#allocation2 + $0x61] sm:$0xff]  ;;  %v763_v2 = vld [vmem:[#allocation2 + $0x69] sm:$0xff] }
  0x85   : > { %1203 = vst.msk [vmem:[#allocation4 + $0x250] sm:$0xff] %vm224_vm0, %v5666_v54  ;;  %v791_v28 = vpack.c.bf16 %v763_v2, %v762_v5  ;;  %v767_v35 = vld [vmem:[#allocation2 + $0x99] sm:$0xff]  ;;  %v1143_v5 = vld [vmem:[#allocation2 + $0x4a] sm:$0xff]  ;;  %v1044_v2 = vld [vmem:[#allocation2 + $0x1a1] sm:$0xff] }
  0x86   : > { %1077 = vrot.lane.b32.xlu0 %v5336_v56, %s4956_s26  ;;  %4329 = vmatpush3.bf16.msra.mxu1 %v4846_v31  ;;  %v4849_v56 = vld [vmem:[%s6947_s1 + $0xf8] sm:$0xff]   ;;  %998 = vst.msk [vmem:[#allocation4 + $0x40] sm:$0xff] %vm224_vm0, %v982_v34  ;;  %v983_v31 = vpack.c.bf16 %v954_v42, %v953_v41  ;;  %v768_v41 = vld [vmem:[#allocation2 + $0xa9] sm:$0xff] }
  0x87   : > { %4330 = vmatprep.subr.bf16.mxu1 %v4847_v32  ;;  %v790_v32 = vpack.c.bf16 %v761_v43, %v760_v27  ;;  %807 = vst.msk [vmem:[#allocation4 + $0x88] sm:$0xff] %vm224_vm0, %v791_v28  ;;  %v957_v27 = vld [vmem:[#allocation2 + $0x90] sm:$0xff]  ;;  %v772_v43 = vld [vmem:[#allocation2 + $0xd9] sm:$0xff] }
  0x88   : > { %884 = vrot.lane.b32.xlu1 %v5424_v52, %s4956_s26  ;;  %v4850_v52 = vld [vmem:[%s6947_s1 + $0xb8] sm:$0xff]   ;;  %999 = vst.msk [vmem:[#allocation4 + $0x68] sm:$0xff] %vm224_vm0, %v983_v31  ;;  %v771_v31 = vld [vmem:[#allocation2 + $0xc9] sm:$0xff] }
  0x89   : > { %806 = vst.msk [vmem:[#allocation4 + $0x60] sm:$0xff] %vm224_vm0, %v790_v32  ;;  %v766_v34 = vld [vmem:[#allocation2 + $0x91] sm:$0xff] }
  0x8a   : > { %1079 = vrot.lane.b32.xlu0 %v5353_v4, %s4956_s26  ;;  %4331 = vmatpush3.bf16.msra.mxu1 %v4848_v58  ;;  %v955_v4 = vld [vmem:[#allocation2 + $0x78] sm:$0xff] }
  0x8b   : > { %4332 = vmatprep.subr.bf16.mxu1 %v4849_v56  ;;  %v984_v33 = vpack.c.bf16 %v956_v55, %v955_v4  ;;  %v769_v42 = vld [vmem:[#allocation2 + $0xb1] sm:$0xff]  ;;  %v1142_v55 = vld [vmem:[#allocation2 + $0x3a] sm:$0xff] }
  0x8c   : > { %886 = vrot.lane.b32.xlu1 %v5430_v60, %s4956_s26  ;;  %v958_v60 = vld [vmem:[#allocation2 + $0x98] sm:$0xff] }
  0x8d   : > { %1000 = vst.msk [vmem:[#allocation4 + $0x90] sm:$0xff] %vm224_vm0, %v984_v33  ;;  %v985_v58 = vpack.c.bf16 %v958_v60, %v957_v27  ;;  %v1144_v33 = vld [vmem:[#allocation2 + $0x52] sm:$0xff] }
  0x8e   : > { %1081 = vrot.lane.b32.xlu0 %v5384_v39, %s4956_s26  ;;  %4333 = vmatpush3.bf16.msra.mxu1 %v4850_v52  ;;  %v764_v39 = vld [vmem:[#allocation2 + $0x79] sm:$0xff]  ;;  %v770_v52 = vld [vmem:[#allocation2 + $0xc1] sm:$0xff]  ;;  %v1174_v28 = vpack.c.bf16 %v1144_v33, %v1143_v5 }
  0x8f   : > { %1001 = vst.msk [vmem:[#allocation4 + $0xb8] sm:$0xff] %vm224_vm0, %v985_v58  ;;  %v968_v58 = vld [vmem:[#allocation2 + $0x110] sm:$0xff] }
  0x90   : > { %888 = vrot.lane.b32.xlu1 %v5432_v61, %s4956_s26  ;;  %v765_v61 = vld [vmem:[#allocation2 + $0x81] sm:$0xff]  ;;  %1190 = vst.msk [vmem:[#allocation4 + $0x48] sm:$0xff] %vm224_vm0, %v1174_v28 }
  0x91   : > { %v792_v56 = vpack.c.bf16 %v765_v61, %v764_v39  ;;  %v967_v39 = vld [vmem:[#allocation2 + $0x108] sm:$0xff]  ;;  %v774_v61 = vld [vmem:[#allocation2 + $0xf1] sm:$0xff] }
  0x92   : > { %1083 = vrot.lane.b32.xlu0 %v5428_v59, %s4956_s26  ;;  %v959_v59 = vld [vmem:[#allocation2 + $0xa8] sm:$0xff] }
  0x93   : > { %808 = vst.msk [vmem:[#allocation4 + $0xb0] sm:$0xff] %vm224_vm0, %v792_v56  ;;  %v775_v56 = vld [vmem:[#allocation2 + $0xf9] sm:$0xff] }
  0x94   : > { %890 = vrot.lane.b32.xlu1 %v5434_v50, %s4956_s26  ;;  %v960_v50 = vld [vmem:[#allocation2 + $0xb0] sm:$0xff] }
  0x96   : > { %1085 = vrot.lane.b32.xlu0 %v5452_v46, %s4956_s26  ;;  %v986_v46 = vpack.c.bf16 %v960_v50, %v959_v59  ;;  %v797_v59 = vpack.c.bf16 %v775_v56, %v774_v61 }
  0x98   : > { %892 = vrot.lane.b32.xlu1 %v5438_v30, %s4956_s26  ;;  %v793_v30 = vpack.c.bf16 %v767_v35, %v766_v34  ;;  %1002 = vst.msk [vmem:[#allocation4 + $0xe0] sm:$0xff] %vm224_vm0, %v986_v46  ;;  %813 = vst.msk [vmem:[#allocation4 + $0x178] sm:$0xff] %vm224_vm0, %v797_v59  ;;  %v1145_v35 = vld [vmem:[#allocation2 + $0x62] sm:$0xff] }
  0x9a   : > { %1087 = vrot.lane.b32.xlu0 %v5472_v3, %s4956_s26  ;;  %809 = vst.msk [vmem:[#allocation4 + $0xd8] sm:$0xff] %vm224_vm0, %v793_v30  ;;  %v961_v3 = vld [vmem:[#allocation2 + $0xc0] sm:$0xff]  ;;  %v1146_v30 = vld [vmem:[#allocation2 + $0x6a] sm:$0xff] }
  0x9c   : > { %894 = vrot.lane.b32.xlu1 %v5479_v57, %s4956_s26  ;;  %v962_v57 = vld [vmem:[#allocation2 + $0xc8] sm:$0xff] }
  0x9e   : > { %1089 = vrot.lane.b32.xlu0 %v5496_v63, %s4956_s26  ;;  %v987_v63 = vpack.c.bf16 %v962_v57, %v961_v3  ;;  %v1147_v3 = vld [vmem:[#allocation2 + $0x7a] sm:$0xff] }
  0xa0   : > { %896 = vrot.lane.b32.xlu1 %v5501_v23, %s4956_s26  ;;  %v794_v23 = vpack.c.bf16 %v769_v42, %v768_v41  ;;  %1003 = vst.msk [vmem:[#allocation4 + $0x108] sm:$0xff] %vm224_vm0, %v987_v63  ;;  %v4836_v41 = vld [vmem:[%s6947_s1 + $0x108] sm:$0xff]  }
  0xa2   : > { %1091 = vrot.lane.b32.xlu0 %v5510_v51, %s4956_s26  ;;  %810 = vst.msk [vmem:[#allocation4 + $0x100] sm:$0xff] %vm224_vm0, %v794_v23  ;;  %v963_v51 = vld [vmem:[#allocation2 + $0xd8] sm:$0xff] }
  0xa4   : > { %898 = vrot.lane.b32.xlu1 %v5528_v47, %s4956_s26  ;;  %v964_v47 = vld [vmem:[#allocation2 + $0xe0] sm:$0xff] }
  0xa6   : > { %1093 = vrot.lane.b32.xlu0 %v5525_v49, %s4956_s26  ;;  %v988_v49 = vpack.c.bf16 %v964_v47, %v963_v51  ;;  %v969_v47 = vld [vmem:[#allocation2 + $0x120] sm:$0xff] }
  0xa8   : > { %900 = vrot.lane.b32.xlu1 %v5547_v44, %s4956_s26  ;;  %v795_v44 = vpack.c.bf16 %v771_v31, %v770_v52  ;;  %1004 = vst.msk [vmem:[#allocation4 + $0x130] sm:$0xff] %vm224_vm0, %v988_v49  ;;  %v970_v52 = vld [vmem:[#allocation2 + $0x128] sm:$0xff]  ;;  %v777_v31 = vld [vmem:[#allocation2 + $0x111] sm:$0xff] }
  0xa9   : > { %v991_v49 = vpack.c.bf16 %v970_v52, %v969_v47  ;;  %v1157_v47 = vld [vmem:[#allocation2 + $0xf2] sm:$0xff]  ;;  %v1158_v52 = vld [vmem:[#allocation2 + $0xfa] sm:$0xff] }
  0xaa   : > { %1095 = vrot.lane.b32.xlu0 %v5542_v62, %s4956_s26  ;;  %811 = vst.msk [vmem:[#allocation4 + $0x128] sm:$0xff] %vm224_vm0, %v795_v44  ;;  %v966_v62 = vld [vmem:[#allocation2 + $0xf8] sm:$0xff]  ;;  %v4851_v44 = vld [vmem:[%s6947_s1 + $0x110] sm:$0xff]  }
  0xab   : > { %1007 = vst.msk [vmem:[#allocation4 + $0x1a8] sm:$0xff] %vm224_vm0, %v991_v49 }
  0xac   : > { %902 = vrot.lane.b32.xlu1 %v5549_v38, %s4956_s26  ;;  %v965_v38 = vld [vmem:[#allocation2 + $0xf0] sm:$0xff] }
  0xae   : > { %1097 = vrot.lane.b32.xlu0 %v5576_v37, %s4956_s26  ;;  %v989_v37 = vpack.c.bf16 %v966_v62, %v965_v38 }
  0xb0   : > { %904 = vrot.lane.b32.xlu1 %v5556_v40, %s4956_s26  ;;  %v773_v40 = vld [vmem:[#allocation2 + $0xe1] sm:$0xff]  ;;  %1005 = vst.msk [vmem:[#allocation4 + $0x158] sm:$0xff] %vm224_vm0, %v989_v37 }
  0xb1   : > { %v796_v32 = vpack.c.bf16 %v773_v40, %v772_v43  ;;  %v1150_v37 = vld [vmem:[#allocation2 + $0x9a] sm:$0xff] }
  0xb2   : > { %1099 = vrot.lane.b32.xlu0 %v5596_v36, %s4956_s26 }
  0xb3   : > { %812 = vst.msk [vmem:[#allocation4 + $0x150] sm:$0xff] %vm224_vm0, %v796_v32 }
  0xb4   : > { %906 = vrot.lane.b32.xlu1 %v5560_v0, %s4956_s26  ;;  %v1141_v0 = vld [vmem:[#allocation2 + $0x32] sm:$0xff] }
  0xb6   : > { %1101 = vrot.lane.b32.xlu0 %v5612_v53, %s4956_s26  ;;  %v1173_v53 = vpack.c.bf16 %v1142_v55, %v1141_v0  ;;  %v4852_v55 = vld [vmem:[%s6947_s1 + $0x118] sm:$0xff]  }
  0xb8   : > { %908 = vrot.lane.b32.xlu1 %v5589_v45, %s4956_s26  ;;  %v693_v4 = vpop.permute.xlu0 %692  ;;  %v1043_v45 = vld [vmem:[#allocation2 + $0x199] sm:$0xff]  ;;  %1189 = vst.msk [vmem:[#allocation4 + $0x20] sm:$0xff] %vm224_vm0, %v1173_v53 }
  0xb9   : > { %740 = vst.msk [vmem:[#allocation4 + $0x8] sm:$0xff] %vm547_vm3, %v693_v4  ;;  %v695_v36 = vpop.permute.xlu1 %694  ;;  %v1151_v4 = vld [vmem:[#allocation2 + $0xaa] sm:$0xff] }
  0xba   : > { %741 = vst.msk [vmem:[#allocation4 + $0x30] sm:$0xff] %vm547_vm3, %v695_v36  ;;  %1103 = vrot.lane.b32.xlu0 %v5635_v22, %s4956_s26  ;;  %v990_v22 = vpack.c.bf16 %v968_v58, %v967_v39  ;;  %v1152_v36 = vld [vmem:[#allocation2 + $0xb2] sm:$0xff] }
  0xbb   : > { %v1178_v53 = vpack.c.bf16 %v1152_v36, %v1151_v4  ;;  %v782_v4 = vld [vmem:[#allocation2 + $0x151] sm:$0xff]  ;;  %v783_v36 = vld [vmem:[#allocation2 + $0x159] sm:$0xff] }
  0xbc   : > { %910 = vrot.lane.b32.xlu1 %v5617_v29, %s4956_s26  ;;  %v500_v27 = vpop.permute.xlu0 %499  ;;  %v1060_v29 = vpack.c.bf16 %v1044_v2, %v1043_v45  ;;  %1006 = vst.msk [vmem:[#allocation4 + $0x180] sm:$0xff] %vm224_vm0, %v990_v22  ;;  %v971_v45 = vld [vmem:[#allocation2 + $0x138] sm:$0xff]  ;;  %v972_v2 = vld [vmem:[#allocation2 + $0x140] sm:$0xff]  ;;  %v1154_v22 = vld [vmem:[#allocation2 + $0xca] sm:$0xff] }
  0xbd   : > { %548 = vst.msk [vmem:[#allocation4] sm:$0xff] %vm547_vm3, %v500_v27  ;;  %v502_v60 = vpop.permute.xlu1 %501  ;;  %v992_v28 = vpack.c.bf16 %v972_v2, %v971_v45  ;;  %v778_v27 = vld [vmem:[#allocation2 + $0x121] sm:$0xff] }
  0xbe   : > { %549 = vst.msk [vmem:[#allocation4 + $0x28] sm:$0xff] %vm547_vm3, %v502_v60  ;;  %1105 = vrot.lane.b32.xlu0 %v5640_v25, %s4956_s26  ;;  %v1175_v25 = vpack.c.bf16 %v1146_v30, %v1145_v35  ;;  %v779_v60 = vld [vmem:[#allocation2 + $0x129] sm:$0xff] }
  0xbf   : > { %1194 = vst.msk [vmem:[#allocation4 + $0xe8] sm:$0xff] %vm224_vm0, %v1178_v53  ;;  %v799_v39 = vpack.c.bf16 %v779_v60, %v778_v27  ;;  %1008 = vst.msk [vmem:[#allocation4 + $0x1d0] sm:$0xff] %vm224_vm0, %v992_v28 }
  0xc0   : > { %912 = vrot.lane.b32.xlu1 %v5631_v48, %s4956_s26  ;;  %v697_v50 = vpop.permute.xlu0 %696  ;;  %v1206_v34 = vld [vmem:[#allocation4 + $0x8] sm:$0xff]  ;;  %1191 = vst.msk [vmem:[#allocation4 + $0x70] sm:$0xff] %vm224_vm0, %v1175_v25 }
  0xc1   : > { %742 = vst.msk [vmem:[#allocation4 + $0x58] sm:$0xff] %vm547_vm3, %v697_v50  ;;  %1660 = vmatprep.mubr.bf16.mxu0 %v1206_v34  ;;  %v504_v46 = vpop.permute.xlu1 %503  ;;  %v1148_v48 = vld [vmem:[#allocation2 + $0x82] sm:$0xff]  ;;  %v1211_v57 = vld [vmem:[#allocation4 + $0x30] sm:$0xff]  ;;  %v1155_v50 = vld [vmem:[#allocation2 + $0xda] sm:$0xff] }
  0xc2   : > { %550 = vst.msk [vmem:[#allocation4 + $0x50] sm:$0xff] %vm547_vm3, %v504_v46  ;;  %1107 = vrot.lane.b32.xlu0 %v1060_v29, %s4956_s26  ;;  %v1176_v63 = vpack.c.bf16 %v1148_v48, %v1147_v3  ;;  %v1153_v29 = vld [vmem:[#allocation2 + $0xc2] sm:$0xff]  ;;  %v973_v3 = vld [vmem:[#allocation2 + $0x150] sm:$0xff]  ;;  %v974_v48 = vld [vmem:[#allocation2 + $0x158] sm:$0xff] }
  0xc3   : > { %815 = vst.msk [vmem:[#allocation4 + $0x1c8] sm:$0xff] %vm224_vm0, %v799_v39  ;;  %v1179_v59 = vpack.c.bf16 %v1154_v22, %v1153_v29  ;;  %v1156_v34 = vld [vmem:[#allocation2 + $0xe2] sm:$0xff]  ;;  %v785_v22 = vld [vmem:[#allocation2 + $0x171] sm:$0xff] }
  0xc4   : > { %914 = vrot.lane.b32.xlu1 %v5666_v54, %s4956_s26  ;;  %v699_v42 = vpop.permute.xlu0 %698  ;;  %v1205_v23 = vld [vmem:[#allocation4] sm:$0xff]  ;;  %1192 = vst.msk [vmem:[#allocation4 + $0x98] sm:$0xff] %vm224_vm0, %v1176_v63  ;;  %v776_v54 = vld [vmem:[#allocation2 + $0x109] sm:$0xff]  ;;  %v1180_v35 = vpack.c.bf16 %v1156_v34, %v1155_v50 }
  0xc5   : > { %743 = vst.msk [vmem:[#allocation4 + $0x80] sm:$0xff] %vm547_vm3, %v699_v42  ;;  %1661 = vmatmul.mubr.bf16.vlgmr.msra.gmra.mrb[0].mxu0 %v1205_v23  ;;  %v506_v51 = vpop.permute.xlu1 %505  ;;  %v798_v38 = vpack.c.bf16 %v777_v31, %v776_v54  ;;  %v1210_v40 = vld [vmem:[#allocation4 + $0x28] sm:$0xff]  ;;  %v1181_v54 = vpack.c.bf16 %v1158_v52, %v1157_v47  ;;  %v977_v39 = vld [vmem:[#allocation2 + $0x180] sm:$0xff] }
  0xc6   : > { %4695 = vmatpush3.bf16.msra.mxu0 %v5554_v1  ;;  %551 = vst.msk [vmem:[#allocation4 + $0x78] sm:$0xff] %vm547_vm3, %v506_v51  ;;  %1668 = vmatprep.mubr.bf16.mxu0 %v1211_v57  ;;  %v1149_v1 = vld [vmem:[#allocation2 + $0x92] sm:$0xff]  ;;  %v993_v57 = vpack.c.bf16 %v974_v48, %v973_v3  ;;  %v781_v63 = vld [vmem:[#allocation2 + $0x141] sm:$0xff]  ;;  %v1159_v31 = vld [vmem:[#allocation2 + $0x10a] sm:$0xff] }
  0xc7   : > { %4696 = vmatprep.subr.bf16.mxu0 %v4836_v41  ;;  %814 = vst.msk [vmem:[#allocation4 + $0x1a0] sm:$0xff] %vm224_vm0, %v798_v38  ;;  %v1177_v32 = vpack.c.bf16 %v1150_v37, %v1149_v1  ;;  %1195 = vst.msk [vmem:[#allocation4 + $0x110] sm:$0xff] %vm224_vm0, %v1179_v59  ;;  %v975_v37 = vld [vmem:[#allocation2 + $0x168] sm:$0xff]  ;;  %v980_v3 = vld [vmem:[#allocation2 + $0x1a0] sm:$0xff] }
  0xc8   : > { %v701_v62 = vpop.permute.xlu0 %700  ;;  %v1216_v0 = vld [vmem:[#allocation4 + $0x58] sm:$0xff]  ;;  %1196 = vst.msk [vmem:[#allocation4 + $0x138] sm:$0xff] %vm224_vm0, %v1180_v35  ;;  %1009 = vst.msk [vmem:[#allocation4 + $0x1f8] sm:$0xff] %vm224_vm0, %v993_v57  ;;  %v784_v29 = vld [vmem:[#allocation2 + $0x169] sm:$0xff] }
  0xc9   : > { %744 = vst.msk [vmem:[#allocation4 + $0xa8] sm:$0xff] %vm547_vm3, %v701_v62  ;;  %v508_v43 = vpop.permute.xlu1 %507  ;;  %v1215_v56 = vld [vmem:[#allocation4 + $0x50] sm:$0xff] }
  0xca   : > { %552 = vst.msk [vmem:[#allocation4 + $0xa0] sm:$0xff] %vm547_vm3, %v508_v43  ;;  %4697 = vmatpush3.bf16.msra.mxu0 %v4836_v41  ;;  %v780_v41 = vld [vmem:[#allocation2 + $0x139] sm:$0xff] }
  0xcb   : > { %4698 = vmatprep.subr.bf16.mxu0 %v4851_v44  ;;  %1193 = vst.msk [vmem:[#allocation4 + $0xc0] sm:$0xff] %vm224_vm0, %v1177_v32  ;;  %v800_v42 = vpack.c.bf16 %v781_v63, %v780_v41  ;;  %1197 = vst.msk [vmem:[#allocation4 + $0x160] sm:$0xff] %vm224_vm0, %v1181_v54 }
  0xcc   : > { %v703_v5 = vpop.permute.xlu0 %702  ;;  %v1221_v46 = vld [vmem:[#allocation4 + $0x80] sm:$0xff] }
  0xcd   : > { %745 = vst.msk [vmem:[#allocation4 + $0xd0] sm:$0xff] %vm547_vm3, %v703_v5  ;;  %v510_v33 = vpop.permute.xlu1 %509  ;;  %1669 = vmatmul.mubr.bf16.gmra.mrb[4].mxu0 %v1210_v40  ;;  %v1220_v49 = vld [vmem:[#allocation4 + $0x78] sm:$0xff]  ;;  %v976_v40 = vld [vmem:[#allocation2 + $0x170] sm:$0xff]  ;;  %v1161_v5 = vld [vmem:[#allocation2 + $0x122] sm:$0xff] }
  0xce   : > { %553 = vst.msk [vmem:[#allocation4 + $0xc8] sm:$0xff] %vm547_vm3, %v510_v33  ;;  %1676 = vmatprep.mubr.bf16.mxu0 %v1216_v0  ;;  %4699 = vmatpush3.bf16.msra.mxu0 %v4851_v44  ;;  %v1160_v44 = vld [vmem:[#allocation2 + $0x112] sm:$0xff]  ;;  %v994_v32 = vpack.c.bf16 %v976_v40, %v975_v37  ;;  %v801_v0 = vpack.c.bf16 %v783_v36, %v782_v4  ;;  %v1162_v33 = vld [vmem:[#allocation2 + $0x12a] sm:$0xff] }
  0xcf   : > { %4700 = vmatprep.subr.bf16.mxu0 %v4852_v55  ;;  %816 = vst.msk [vmem:[#allocation4 + $0x1f0] sm:$0xff] %vm224_vm0, %v800_v42  ;;  %v1182_v62 = vpack.c.bf16 %v1160_v44, %v1159_v31  ;;  %v1183_v2 = vpack.c.bf16 %v1162_v33, %v1161_v5  ;;  %v1171_v42 = vld [vmem:[#allocation2 + $0x19a] sm:$0xff]  ;;  %v2975_v37 = vld [vmem:[#allocation3 + $0x1a2] sm:$0xff] }
  0xd0   : > { %v705_v58 = vpop.permute.xlu0 %704  ;;  %v1226_v38 = vld [vmem:[#allocation4 + $0xa8] sm:$0xff]  ;;  %1010 = vst.msk [vmem:[#allocation4 + $0x220] sm:$0xff] %vm224_vm0, %v994_v32  ;;  %817 = vst.msk [vmem:[#allocation4 + $0x218] sm:$0xff] %vm224_vm0, %v801_v0 }
  0xd1   : > { %746 = vst.msk [vmem:[#allocation4 + $0xf8] sm:$0xff] %vm547_vm3, %v705_v58  ;;  %v512_v61 = vpop.permute.xlu1 %511  ;;  %v1225_v45 = vld [vmem:[#allocation4 + $0xa0] sm:$0xff]  ;;  %v978_v58 = vld [vmem:[#allocation2 + $0x188] sm:$0xff] }
  0xd2   : > { %554 = vst.msk [vmem:[#allocation4 + $0xf0] sm:$0xff] %vm547_vm3, %v512_v61  ;;  %4701 = vmatpush3.bf16.msra.mxu0 %v4852_v55  ;;  %v995_v61 = vpack.c.bf16 %v978_v58, %v977_v39 }
  0xd3   : > { %1198 = vst.msk [vmem:[#allocation4 + $0x188] sm:$0xff] %vm224_vm0, %v1182_v62  ;;  %1199 = vst.msk [vmem:[#allocation4 + $0x1b0] sm:$0xff] %vm224_vm0, %v1183_v2 }
  0xd4   : > { %v707_v30 = vpop.permute.xlu0 %706  ;;  %v1231_v28 = vld [vmem:[#allocation4 + $0xd0] sm:$0xff]  ;;  %1011 = vst.msk [vmem:[#allocation4 + $0x248] sm:$0xff] %vm224_vm0, %v995_v61 }
  0xd5   : > { %747 = vst.msk [vmem:[#allocation4 + $0x120] sm:$0xff] %vm547_vm3, %v707_v30  ;;  %1677 = vmatmul.mubr.bf16.gmra.mrb[8].mxu0 %v1215_v56  ;;  %v802_v56 = vpack.c.bf16 %v785_v22, %v784_v29  ;;  %v1230_v34 = vld [vmem:[#allocation4 + $0xc8] sm:$0xff] }
  0xd6   : > { %v514_v25 = vpop.permute.xlu1 %513  ;;  %1684 = vmatprep.mubr.bf16.mxu0 %v1221_v46 }
  0xd7   : > { %555 = vst.msk [vmem:[#allocation4 + $0x118] sm:$0xff] %vm547_vm3, %v514_v25  ;;  %v979_v25 = vld [vmem:[#allocation2 + $0x198] sm:$0xff] }
  0xd8   : > { %v709_v23 = vpop.permute.xlu0 %708  ;;  %818 = vst.msk [vmem:[#allocation4 + $0x240] sm:$0xff] %vm224_vm0, %v802_v56  ;;  %v1236_v46 = vld [vmem:[#allocation4 + $0xf8] sm:$0xff]  ;;  %v996_v48 = vpack.c.bf16 %v980_v3, %v979_v25 }
  0xd9   : > { %748 = vst.msk [vmem:[#allocation4 + $0x148] sm:$0xff] %vm547_vm3, %v709_v23  ;;  %v1235_v63 = vld [vmem:[#allocation4 + $0xf0] sm:$0xff] }
  0xda   : > { %v516_v51 = vpop.permute.xlu1 %515  ;;  %1012 = vst.msk [vmem:[#allocation4 + $0x270] sm:$0xff] %vm224_vm0, %v996_v48 }
  0xdb   : > { %556 = vst.msk [vmem:[#allocation4 + $0x140] sm:$0xff] %vm547_vm3, %v516_v51  ;;  %v1172_v51 = vld [vmem:[#allocation2 + $0x1a2] sm:$0xff] }
  0xdc   : > { %v711_v43 = vpop.permute.xlu0 %710  ;;  %v1241_v23 = vld [vmem:[#allocation4 + $0x120] sm:$0xff]  ;;  %v1188_v52 = vpack.c.bf16 %v1172_v51, %v1171_v42 }
  0xdd   : > { %749 = vst.msk [vmem:[#allocation4 + $0x170] sm:$0xff] %vm547_vm3, %v711_v43  ;;  %1685 = vmatmul.mubr.bf16.gmra.mrb[12].mxu0 %v1220_v49 }
  0xde   : > { %v518_v1 = vpop.permute.xlu1 %517  ;;  %1692 = vmatprep.mubr.bf16.mxu0 %v1226_v38  ;;  %1204 = vst.msk [vmem:[#allocation4 + $0x278] sm:$0xff] %vm224_vm0, %v1188_v52  ;;  %v1240_v44 = vld [vmem:[#allocation4 + $0x118] sm:$0xff] }
  0xdf   : > { %557 = vst.msk [vmem:[#allocation4 + $0x168] sm:$0xff] %vm547_vm3, %v518_v1  ;;  %v2974_v1 = vld [vmem:[#allocation3 + $0x19a] sm:$0xff] }
  0xe0   : > { %v713_v55 = vpop.permute.xlu0 %712  ;;  %v1246_v38 = vld [vmem:[#allocation4 + $0x148] sm:$0xff]  ;;  %v2991_v40 = vpack.c.bf16 %v2975_v37, %v2974_v1 }
  0xe1   : > { %750 = vst.msk [vmem:[#allocation4 + $0x198] sm:$0xff] %vm547_vm3, %v713_v55 }
  0xe2   : > { %v520_v53 = vpop.permute.xlu1 %519 }
  0xe3   : > { %558 = vst.msk [vmem:[#allocation4 + $0x190] sm:$0xff] %vm547_vm3, %v520_v53  ;;  %v1245_v53 = vld [vmem:[#allocation4 + $0x140] sm:$0xff] }
  0xe4   : > { %v715_v27 = vpop.permute.xlu0 %714  ;;  %v1251_v5 = vld [vmem:[#allocation4 + $0x170] sm:$0xff] }
  0xe5   : > { %751 = vst.msk [vmem:[#allocation4 + $0x1c0] sm:$0xff] %vm547_vm3, %v715_v27  ;;  %1693 = vmatmul.mubr.bf16.gmra.mrb[16].mxu0 %v1225_v45  ;;  %v5822_v36 = vld [vmem:[#allocation4 + $0x278] sm:$0xff] }
  0xe6   : > { %v522_v60 = vpop.permute.xlu1 %521  ;;  %1700 = vmatprep.mubr.bf16.mxu0 %v1231_v28  ;;  %3007 = vst.msk [vmem:[#allocation4 + $0x278] sm:$0xff] %vm224_vm0, %v2991_v40  ;;  %v1250_v58 = vld [vmem:[#allocation4 + $0x168] sm:$0xff] }
  0xe7   : > { %559 = vst.msk [vmem:[#allocation4 + $0x1b8] sm:$0xff] %vm547_vm3, %v522_v60 }
  0xe8   : > { %v717_v59 = vpop.permute.xlu0 %716  ;;  %v1256_v61 = vld [vmem:[#allocation4 + $0x198] sm:$0xff] }
  0xe9   : > { %752 = vst.msk [vmem:[#allocation4 + $0x1e8] sm:$0xff] %vm547_vm3, %v717_v59 }
  0xea   : > { %v524_v50 = vpop.permute.xlu1 %523 }
  0xeb   : > { %560 = vst.msk [vmem:[#allocation4 + $0x1e0] sm:$0xff] %vm547_vm3, %v524_v50 }
  0xec   : > { %v719_v35 = vpop.permute.xlu0 %718 }
  0xed   : > { %753 = vst.msk [vmem:[#allocation4 + $0x210] sm:$0xff] %vm547_vm3, %v719_v35  ;;  %1701 = vmatmul.mubr.bf16.gmra.mrb[20].mxu0 %v1230_v34  ;;  %v1261_v35 = vld [vmem:[#allocation4 + $0x1c0] sm:$0xff] }
  0xee   : > { %v526_v30 = vpop.permute.xlu1 %525  ;;  %1708 = vmatprep.mubr.bf16.mxu0 %v1236_v46  ;;  %v1255_v46 = vld [vmem:[#allocation4 + $0x190] sm:$0xff] }
  0xef   : > { %561 = vst.msk [vmem:[#allocation4 + $0x208] sm:$0xff] %vm547_vm3, %v526_v30 }
  0xf0   : > { %v721_v57 = vpop.permute.xlu0 %720  ;;  %v1266_v42 = vld [vmem:[#allocation4 + $0x1e8] sm:$0xff] }
  0xf1   : > { %754 = vst.msk [vmem:[#allocation4 + $0x238] sm:$0xff] %vm547_vm3, %v721_v57 }
  0xf2   : > { %v528_v41 = vpop.permute.xlu1 %527 }
  0xf3   : > { %562 = vst.msk [vmem:[#allocation4 + $0x230] sm:$0xff] %vm547_vm3, %v528_v41 }
  0xf4   : > { %v723_v47 = vpop.permute.xlu0 %722 }
  0xf5   : > { %755 = vst.msk [vmem:[#allocation4 + $0x260] sm:$0xff] %vm547_vm3, %v723_v47  ;;  %1709 = vmatmul.mubr.bf16.gmra.mrb[24].mxu0 %v1235_v63  ;;  %v1260_v63 = vld [vmem:[#allocation4 + $0x1b8] sm:$0xff] }
  0xf6   : > { %v530_v49 = vpop.permute.xlu1 %529  ;;  %1716 = vmatprep.mubr.bf16.mxu0 %v1241_v23 }
  0xf7   : > { %563 = vst.msk [vmem:[#allocation4 + $0x258] sm:$0xff] %vm547_vm3, %v530_v49 }
  0xf8   : > { %v1078_v54 = vpop.permute.xlu0 %1077 }
  0xf9   : > { %1125 = vst.msk [vmem:[#allocation4 + $0x18] sm:$0xff] %vm547_vm3, %v1078_v54 }
  0xfa   : > { %v885_v31 = vpop.permute.xlu1 %884 }
  0xfb   : > { %932 = vst.msk [vmem:[#allocation4 + $0x10] sm:$0xff] %vm547_vm3, %v885_v31  ;;  %v1265_v31 = vld [vmem:[#allocation4 + $0x1e0] sm:$0xff] }
  0xfc   : > { %v1080_v62 = vpop.permute.xlu0 %1079 }
  0xfd   : > { %1717 = vmatmul.mubr.bf16.gmra.mrb[28].mxu0 %v1240_v44  ;;  %1126 = vst.msk [vmem:[#allocation4 + $0x40] sm:$0xff] %vm547_vm3, %v1080_v62  ;;  %v1271_v44 = vld [vmem:[#allocation4 + $0x210] sm:$0xff] }
  0xfe   : > { %v887_v43 = vpop.permute.xlu1 %886  ;;  %1724 = vmatprep.mubr.bf16.mxu0 %v1246_v38 }
  0xff   : > { %933 = vst.msk [vmem:[#allocation4 + $0x38] sm:$0xff] %vm547_vm3, %v887_v43 }
 0x100   : > { %v1208_v32 = vld [vmem:[#allocation4 + $0x18] sm:$0xff]  ;;  %v1082_v4 = vpop.permute.xlu0 %1081 }
 0x101   : > { %1821 = vmatprep.mubr.bf16.mxu1 %v1208_v32  ;;  %1127 = vst.msk [vmem:[#allocation4 + $0x68] sm:$0xff] %vm547_vm3, %v1082_v4  ;;  %v1270_v32 = vld [vmem:[#allocation4 + $0x208] sm:$0xff]  ;;  %v1276_v4 = vld [vmem:[#allocation4 + $0x238] sm:$0xff] }
 0x102   : > { %v1207_v0 = vld [vmem:[#allocation4 + $0x10] sm:$0xff]  ;;  %v889_v55 = vpop.permute.xlu1 %888 }
 0x103   : > { %1822 = vmatmul.mubr.bf16.vlgmr.msra.gmra.mrb[0].mxu1 %v1207_v0  ;;  %934 = vst.msk [vmem:[#allocation4 + $0x60] sm:$0xff] %vm547_vm3, %v889_v55 }
 0x104   : > { %v1213_v33 = vld [vmem:[#allocation4 + $0x40] sm:$0xff]  ;;  %v1084_v45 = vpop.permute.xlu0 %1083 }
 0x105   : > { %1725 = vmatmul.mubr.bf16.gmra.mrb[32].mxu0 %v1245_v53  ;;  %1829 = vmatprep.mubr.bf16.mxu1 %v1213_v33  ;;  %1128 = vst.msk [vmem:[#allocation4 + $0x90] sm:$0xff] %vm547_vm3, %v1084_v45 }
 0x106   : > { %v891_v2 = vpop.permute.xlu1 %890  ;;  %1732 = vmatprep.mubr.bf16.mxu0 %v1251_v5  ;;  %v1212_v28 = vld [vmem:[#allocation4 + $0x38] sm:$0xff] }
 0x107   : > { %935 = vst.msk [vmem:[#allocation4 + $0x88] sm:$0xff] %vm547_vm3, %v891_v2  ;;  %v1275_v2 = vld [vmem:[#allocation4 + $0x230] sm:$0xff] }
 0x108   : > { %v1218_v27 = vld [vmem:[#allocation4 + $0x68] sm:$0xff]  ;;  %v1086_v60 = vpop.permute.xlu0 %1085 }
 0x109   : > { %1129 = vst.msk [vmem:[#allocation4 + $0xb8] sm:$0xff] %vm547_vm3, %v1086_v60 }
 0x10a   : > { %v893_v39 = vpop.permute.xlu1 %892  ;;  %v1217_v56 = vld [vmem:[#allocation4 + $0x60] sm:$0xff] }
 0x10b   : > { %1830 = vmatmul.mubr.bf16.gmra.mrb[4].mxu1 %v1212_v28  ;;  %936 = vst.msk [vmem:[#allocation4 + $0xb0] sm:$0xff] %vm547_vm3, %v893_v39  ;;  %v1281_v28 = vld [vmem:[#allocation4 + $0x260] sm:$0xff] }
 0x10c   : > { %1837 = vmatprep.mubr.bf16.mxu1 %v1218_v27  ;;  %v1088_v29 = vpop.permute.xlu0 %1087  ;;  %v1223_v59 = vld [vmem:[#allocation4 + $0x90] sm:$0xff] }
 0x10d   : > { %1733 = vmatmul.mubr.bf16.gmra.mrb[36].mxu0 %v1250_v58  ;;  %1130 = vst.msk [vmem:[#allocation4 + $0xe0] sm:$0xff] %vm547_vm3, %v1088_v29  ;;  %v1209_v29 = vld [vmem:[#allocation4 + $0x20] sm:$0xff] }
 0x10e   : > { %v895_v22 = vpop.permute.xlu1 %894  ;;  %1740 = vmatprep.mubr.bf16.mxu0 %v1256_v61  ;;  %v1222_v3 = vld [vmem:[#allocation4 + $0x88] sm:$0xff]  ;;  %v1280_v61 = vld [vmem:[#allocation4 + $0x258] sm:$0xff] }
 0x10f   : > { %937 = vst.msk [vmem:[#allocation4 + $0xd8] sm:$0xff] %vm547_vm3, %v895_v22 }
 0x110   : > { %v1090_v50 = vpop.permute.xlu0 %1089  ;;  %v1228_v48 = vld [vmem:[#allocation4 + $0xb8] sm:$0xff] }
 0x111   : > { %1131 = vst.msk [vmem:[#allocation4 + $0x108] sm:$0xff] %vm547_vm3, %v1090_v50  ;;  %v1219_v50 = vld [vmem:[#allocation4 + $0x70] sm:$0xff] }
 0x112   : > { %v897_v34 = vpop.permute.xlu1 %896  ;;  %v1227_v47 = vld [vmem:[#allocation4 + $0xb0] sm:$0xff] }
 0x113   : > { %1838 = vmatmul.mubr.bf16.gmra.mrb[8].mxu1 %v1217_v56  ;;  %938 = vst.msk [vmem:[#allocation4 + $0x100] sm:$0xff] %vm547_vm3, %v897_v34 }
 0x114   : > { %1845 = vmatprep.mubr.bf16.mxu1 %v1223_v59  ;;  %v1092_v30 = vpop.permute.xlu0 %1091  ;;  %v1233_v52 = vld [vmem:[#allocation4 + $0xe0] sm:$0xff]  ;;  %v1214_v59 = vld [vmem:[#allocation4 + $0x48] sm:$0xff] }
 0x115   : > { %1741 = vmatmul.mubr.bf16.gmra.mrb[40].mxu0 %v1255_v46  ;;  %1132 = vst.msk [vmem:[#allocation4 + $0x130] sm:$0xff] %vm547_vm3, %v1092_v30  ;;  %v1229_v30 = vld [vmem:[#allocation4 + $0xc0] sm:$0xff] }
 0x116   : > { %v899_v25 = vpop.permute.xlu1 %898  ;;  %1748 = vmatprep.mubr.bf16.mxu0 %v1261_v35  ;;  %v1232_v43 = vld [vmem:[#allocation4 + $0xd8] sm:$0xff] }
 0x117   : > { %939 = vst.msk [vmem:[#allocation4 + $0x128] sm:$0xff] %vm547_vm3, %v899_v25  ;;  %v1224_v35 = vld [vmem:[#allocation4 + $0x98] sm:$0xff] }
 0x118   : > { %v1094_v57 = vpop.permute.xlu0 %1093  ;;  %v1238_v1 = vld [vmem:[#allocation4 + $0x108] sm:$0xff] }
 0x119   : > { %1133 = vst.msk [vmem:[#allocation4 + $0x158] sm:$0xff] %vm547_vm3, %v1094_v57  ;;  %v1239_v57 = vld [vmem:[#allocation4 + $0x110] sm:$0xff] }
 0x11a   : > { %v901_v41 = vpop.permute.xlu1 %900  ;;  %v1237_v53 = vld [vmem:[#allocation4 + $0x100] sm:$0xff] }
 0x11b   : > { %1846 = vmatmul.mubr.bf16.gmra.mrb[12].mxu1 %v1222_v3  ;;  %940 = vst.msk [vmem:[#allocation4 + $0x150] sm:$0xff] %vm547_vm3, %v901_v41 }
 0x11c   : > { %1853 = vmatprep.mubr.bf16.mxu1 %v1228_v48  ;;  %v1096_v23 = vpop.permute.xlu0 %1095  ;;  %v1243_v5 = vld [vmem:[#allocation4 + $0x130] sm:$0xff]  ;;  %v1234_v48 = vld [vmem:[#allocation4 + $0xe8] sm:$0xff] }
 0x11d   : > { %1749 = vmatmul.mubr.bf16.gmra.mrb[44].mxu0 %v1260_v63  ;;  %1134 = vst.msk [vmem:[#allocation4 + $0x180] sm:$0xff] %vm547_vm3, %v1096_v23  ;;  %v1249_v23 = vld [vmem:[#allocation4 + $0x160] sm:$0xff] }
 0x11e   : > { %v903_v51 = vpop.permute.xlu1 %902  ;;  %1756 = vmatprep.mubr.bf16.mxu0 %v1266_v42  ;;  %v1242_v39 = vld [vmem:[#allocation4 + $0x128] sm:$0xff]  ;;  %v1244_v42 = vld [vmem:[#allocation4 + $0x138] sm:$0xff] }
 0x11f   : > { %941 = vst.msk [vmem:[#allocation4 + $0x178] sm:$0xff] %vm547_vm3, %v903_v51 }
 0x120   : > { %v1098_v49 = vpop.permute.xlu0 %1097  ;;  %v1248_v58 = vld [vmem:[#allocation4 + $0x158] sm:$0xff] }
 0x121   : > { %1135 = vst.msk [vmem:[#allocation4 + $0x1a8] sm:$0xff] %vm547_vm3, %v1098_v49  ;;  %v1259_v49 = vld [vmem:[#allocation4 + $0x1b0] sm:$0xff] }
 0x122   : > { %v905_v54 = vpop.permute.xlu1 %904  ;;  %v1247_v22 = vld [vmem:[#allocation4 + $0x150] sm:$0xff] }
 0x123   : > { %1854 = vmatmul.mubr.bf16.gmra.mrb[16].mxu1 %v1227_v47  ;;  %942 = vst.msk [vmem:[#allocation4 + $0x1a0] sm:$0xff] %vm547_vm3, %v905_v54 }
 0x124   : > { %1861 = vmatprep.mubr.bf16.mxu1 %v1233_v52  ;;  %v1100_v38 = vpop.permute.xlu0 %1099  ;;  %v1253_v56 = vld [vmem:[#allocation4 + $0x180] sm:$0xff]  ;;  %v1254_v52 = vld [vmem:[#allocation4 + $0x188] sm:$0xff] }
 0x125   : > { %1757 = vmatmul.mubr.bf16.gmra.mrb[48].mxu0 %v1265_v31  ;;  %1136 = vst.msk [vmem:[#allocation4 + $0x1d0] sm:$0xff] %vm547_vm3, %v1100_v38  ;;  %v1269_v38 = vld [vmem:[#allocation4 + $0x200] sm:$0xff] }
 0x126   : > { %v907_v62 = vpop.permute.xlu1 %906  ;;  %1764 = vmatprep.mubr.bf16.mxu0 %v1271_v44  ;;  %v1252_v34 = vld [vmem:[#allocation4 + $0x178] sm:$0xff] }
 0x127   : > { %943 = vst.msk [vmem:[#allocation4 + $0x1c8] sm:$0xff] %vm547_vm3, %v907_v62  ;;  %v1264_v44 = vld [vmem:[#allocation4 + $0x1d8] sm:$0xff] }
 0x128   : > { %v1102_v37 = vpop.permute.xlu0 %1101  ;;  %v1258_v46 = vld [vmem:[#allocation4 + $0x1a8] sm:$0xff] }
 0x129   : > { %1137 = vst.msk [vmem:[#allocation4 + $0x1f8] sm:$0xff] %vm547_vm3, %v1102_v37  ;;  %v1279_v37 = vld [vmem:[#allocation4 + $0x250] sm:$0xff] }
 0x12a   : > { %v909_v40 = vpop.permute.xlu1 %908  ;;  %v1257_v25 = vld [vmem:[#allocation4 + $0x1a0] sm:$0xff] }
 0x12b   : > { %1862 = vmatmul.mubr.bf16.gmra.mrb[20].mxu1 %v1232_v43  ;;  %944 = vst.msk [vmem:[#allocation4 + $0x1f0] sm:$0xff] %vm547_vm3, %v909_v40 }
 0x12c   : > { %1869 = vmatprep.mubr.bf16.mxu1 %v1238_v1  ;;  %v1104_v0 = vpop.permute.xlu0 %1103  ;;  %v1263_v3 = vld [vmem:[#allocation4 + $0x1d0] sm:$0xff]  ;;  %v1274_v1 = vld [vmem:[#allocation4 + $0x228] sm:$0xff] }
 0x12d   : > { %1765 = vmatmul.mubr.bf16.gmra.mrb[52].mxu0 %v1270_v32  ;;  %1138 = vst.msk [vmem:[#allocation4 + $0x220] sm:$0xff] %vm547_vm3, %v1104_v0 }
 0x12e   : > { %v911_v55 = vpop.permute.xlu1 %910  ;;  %1772 = vmatprep.mubr.bf16.mxu0 %v1276_v4  ;;  %v1262_v41 = vld [vmem:[#allocation4 + $0x1c8] sm:$0xff] }
 0x12f   : > { %945 = vst.msk [vmem:[#allocation4 + $0x218] sm:$0xff] %vm547_vm3, %v911_v55 }
 0x130   : > { %v1106_v33 = vpop.permute.xlu0 %1105  ;;  %v1268_v63 = vld [vmem:[#allocation4 + $0x1f8] sm:$0xff] }
 0x131   : > { %1139 = vst.msk [vmem:[#allocation4 + $0x248] sm:$0xff] %vm547_vm3, %v1106_v33 }
 0x132   : > { %v913_v45 = vpop.permute.xlu1 %912  ;;  %v1267_v51 = vld [vmem:[#allocation4 + $0x1f0] sm:$0xff] }
 0x133   : > { %1870 = vmatmul.mubr.bf16.gmra.mrb[24].mxu1 %v1237_v53  ;;  %946 = vst.msk [vmem:[#allocation4 + $0x240] sm:$0xff] %vm547_vm3, %v913_v45 }
 0x134   : > { %1877 = vmatprep.mubr.bf16.mxu1 %v1243_v5  ;;  %v1108_v27 = vpop.permute.xlu0 %1107  ;;  %v1273_v47 = vld [vmem:[#allocation4 + $0x220] sm:$0xff] }
 0x135   : > { %1773 = vmatmul.mubr.bf16.gmra.mrb[56].mxu0 %v1275_v2  ;;  %1140 = vst.msk [vmem:[#allocation4 + $0x270] sm:$0xff] %vm547_vm3, %v1108_v27 }
 0x136   : > { %v915_v60 = vpop.permute.xlu1 %914  ;;  %1780 = vmatprep.mubr.bf16.mxu0 %v1281_v28  ;;  %v1272_v54 = vld [vmem:[#allocation4 + $0x218] sm:$0xff] }
 0x137   : > { %947 = vst.msk [vmem:[#allocation4 + $0x268] sm:$0xff] %vm547_vm3, %v915_v60  ;;  %v2239_v60 = vld [vmem:[#allocation3 + $0x1] sm:$0xff] }
 0x138   : > { %v1278_v31 = vld [vmem:[#allocation4 + $0x248] sm:$0xff] }
 0x13a   : > { %v1277_v62 = vld [vmem:[#allocation4 + $0x240] sm:$0xff] }
 0x13b   : > { %1878 = vmatmul.mubr.bf16.gmra.mrb[28].mxu1 %v1242_v39  ;;  %v2240_v39 = vld [vmem:[#allocation3 + $0x9] sm:$0xff] }
 0x13c   : > { %1885 = vmatprep.mubr.bf16.mxu1 %v1248_v58  ;;  %v1283_v43 = vld [vmem:[#allocation4 + $0x270] sm:$0xff] }
 0x13d   : > { %1781 = vmatmul.mubr.bf16.gmra.mrb[60].mxu0 %v1280_v61  ;;  %v2271_v61 = vpack.c.bf16 %v2240_v39, %v2239_v60  ;;  %v4858_v60 = vld [vmem:[%s6949_s3 + $0x10] sm:$0xff]  }
 0x13e   : > { %4702 = vmatprep.mubr.msk.bf16.mxu0 %vm224_vm0, %v1209_v29  ;;  %v1282_v40 = vld [vmem:[#allocation4 + $0x268] sm:$0xff] }
 0x13f   : > { %2303 = vrot.lane.b32.xlu1 %v2271_v61, %s4956_s26  ;;  %v5922_v61 = vld [vmem:[%s6948_s2] ss:$0 sm:$0xff] }
 0x143   : > { %1886 = vmatmul.mubr.bf16.gmra.mrb[32].mxu1 %v1247_v22 }
 0x144   : > { %1893 = vmatprep.mubr.bf16.mxu1 %v1253_v56 }
 0x145   : > { %4703 = vmatmul.mubr.msk.bf16.vlgmr.msra.gmra.mrb[64].mxu0 %vm224_vm0, %v1214_v59 }
 0x146   : > { %4706 = vmatprep.mubr.msk.bf16.mxu0 %vm224_vm0, %v1219_v50 }
 0x14b   : > { %1894 = vmatmul.mubr.bf16.gmra.mrb[36].mxu1 %v1252_v34 }
 0x14c   : > { %1901 = vmatprep.mubr.bf16.mxu1 %v1258_v46 }
 0x14d   : > { %4707 = vmatmul.mubr.msk.bf16.gmra.mrb[68].mxu0 %vm224_vm0, %v1224_v35 }
 0x14e   : > { %4710 = vmatprep.mubr.msk.bf16.mxu0 %vm224_vm0, %v1229_v30 }
 0x153   : > { %1902 = vmatmul.mubr.bf16.gmra.mrb[40].mxu1 %v1257_v25  ;;  %v4853_v25 = vld [vmem:[%s6949_s3 + $0x40] sm:$0xff]  }
 0x154   : > { %1909 = vmatprep.mubr.bf16.mxu1 %v1263_v3  ;;  %v4854_v3 = vld [vmem:[%s6949_s3] sm:$0xff]   ;;  %4450 = vmatprep.subr.bf16.mxu1 %v4853_v25 }
 0x155   : > { %4711 = vmatmul.mubr.msk.bf16.gmra.mrb[72].mxu0 %vm224_vm0, %v1234_v48  ;;  %4451 = vmatpush3.bf16.msra.mxu1 %v4854_v3 }
 0x156   : > { %4714 = vmatprep.mubr.msk.bf16.mxu0 %vm224_vm0, %v1239_v57 }
 0x15b   : > { %1910 = vmatmul.mubr.bf16.gmra.mrb[44].mxu1 %v1262_v41 }
 0x15c   : > { %1917 = vmatprep.mubr.bf16.mxu1 %v1268_v63 }
 0x15d   : > { %4715 = vmatmul.mubr.msk.bf16.gmra.mrb[76].mxu0 %vm224_vm0, %v1244_v42 }
 0x15e   : > { %4718 = vmatprep.mubr.msk.bf16.mxu0 %vm224_vm0, %v1249_v23 }
 0x163   : > { %1918 = vmatmul.mubr.bf16.gmra.mrb[48].mxu1 %v1267_v51 }
 0x164   : > { %1925 = vmatprep.mubr.bf16.mxu1 %v1273_v47 }
 0x165   : > { %4719 = vmatmul.mubr.msk.bf16.gmra.mrb[80].mxu0 %vm224_vm0, %v1254_v52 }
 0x166   : > { %4722 = vmatprep.mubr.msk.bf16.mxu0 %vm224_vm0, %v1259_v49 }
 0x16b   : > { %1926 = vmatmul.mubr.bf16.gmra.mrb[52].mxu1 %v1272_v54 }
 0x16c   : > { %1933 = vmatprep.mubr.bf16.mxu1 %v1278_v31 }
 0x16d   : > { %4723 = vmatmul.mubr.msk.bf16.gmra.mrb[84].mxu0 %vm224_vm0, %v1264_v44  ;;  %v4855_v44 = vld [vmem:[%s6949_s3 + $0x48] sm:$0xff]  }
 0x16e   : > { %4726 = vmatprep.mubr.msk.bf16.mxu0 %vm224_vm0, %v1269_v38  ;;  %v4856_v38 = vld [vmem:[%s6949_s3 + $0x8] sm:$0xff]   ;;  %4452 = vmatprep.subr.bf16.mxu1 %v4855_v44 }
 0x16f   : > { %4453 = vmatpush3.bf16.msra.mxu1 %v4856_v38 }
 0x173   : > { %1934 = vmatmul.mubr.bf16.gmra.mrb[56].mxu1 %v1277_v62 }
 0x174   : > { %1941 = vmatprep.mubr.bf16.mxu1 %v1283_v43 }
 0x175   : > { %4727 = vmatmul.mubr.msk.bf16.gmra.mrb[88].mxu0 %vm224_vm0, %v1274_v1 }
 0x176   : > { %4730 = vmatprep.mubr.msk.bf16.mxu0 %vm224_vm0, %v1279_v37 }
 0x17b   : > { %1942 = vmatmul.mubr.bf16.gmra.mrb[60].mxu1 %v1282_v40 }
 0x17d   : > { %4731 = vmatmul.mubr.msk.bf16.gmra.mrb[92].mxu0 %vm224_vm0, %v5822_v36 }
 0x198   : > { %v4222_v32 = vpop.f32.mrb[0].mxu0 }
 0x199   : > { %v4223_v4 = vpop.f32.mrb[1].mxu0 }
 0x19a   : > { %v5870_v0 = vadd.f32 %v4223_v4, %v4222_v32  ;;  %v4225_v55 = vpop.f32.mrb[2].mxu0 }
 0x19b   : > { %v4226_v53 = vpop.f32.mrb[3].mxu0 }
 0x19c   : > { %v5872_v5 = vadd.f32 %v4226_v53, %v4225_v55 }
 0x19e   : > { %v1666_v3 = vadd.f32 %v5872_v5, %v5922_v61 }
 0x1a0   : > { %v4228_v33 = vpop.f32.mrb[4].mxu0 }
 0x1a1   : > { %v4229_v45 = vpop.f32.mrb[5].mxu0 }
 0x1a2   : > { %v5874_v2 = vadd.f32 %v4229_v45, %v4228_v33  ;;  %v4231_v28 = vpop.f32.mrb[6].mxu0 }
 0x1a3   : > { %v4232_v27 = vpop.f32.mrb[7].mxu0 }
 0x1a4   : > { %v5876_v58 = vadd.f32 %v4232_v27, %v4231_v28  ;;  %v4857_v27 = vld [vmem:[%s6949_s3 + $0x50] sm:$0xff]   ;;  %v1671_v38 = vadd.f32 %v5874_v2, %v5922_v61  ;;  %v4859_v2 = vld [vmem:[%s6949_s3 + $0x58] sm:$0xff]  }
 0x1a5   : > { %4454 = vmatprep.subr.bf16.mxu1 %v4857_v27 }
 0x1a6   : > { %4455 = vmatpush3.bf16.msra.mxu1 %v4858_v60 }
 0x1a7   : > { %4456 = vmatprep.subr.bf16.mxu1 %v4859_v2 }
 0x1a8   : > { %v4234_v36 = vpop.f32.mrb[8].mxu0 }
 0x1a9   : > { %v4235_v29 = vpop.f32.mrb[9].mxu0 }
 0x1aa   : > { %v5879_v22 = vadd.f32 %v4235_v29, %v4234_v36  ;;  %v4237_v56 = vpop.f32.mrb[10].mxu0 }
 0x1ab   : > { %v4238_v59 = vpop.f32.mrb[11].mxu0 }
 0x1ac   : > { %v5881_v50 = vadd.f32 %v4238_v59, %v4237_v56  ;;  %v1663_v59 = vadd.f32 %v5870_v0, %v5922_v61 }
 0x1b0   : > { %v4240_v34 = vpop.f32.mrb[12].mxu0 }
 0x1b1   : > { %v4241_v46 = vpop.f32.mrb[13].mxu0 }
 0x1b2   : > { %v5883_v35 = vadd.f32 %v4241_v46, %v4240_v34  ;;  %v4243_v30 = vpop.f32.mrb[14].mxu0 }
 0x1b3   : > { %v4244_v48 = vpop.f32.mrb[15].mxu0 }
 0x1b4   : > { %v5891_v57 = vadd.f32 %v4244_v48, %v4243_v30 }
 0x1b6   : > { %v1690_v2 = vadd.f32 %v5891_v57, %v5922_v61 }
 0x1b8   : > { %v4246_v41 = vpop.f32.mrb[16].mxu0 }
 0x1b9   : > { %v4247_v63 = vpop.f32.mrb[17].mxu0 }
 0x1ba   : > { %v5893_v42 = vadd.f32 %v4247_v63, %v4246_v41  ;;  %v4249_v23 = vpop.f32.mrb[18].mxu0 }
 0x1bb   : > { %v4250_v51 = vpop.f32.mrb[19].mxu0 }
 0x1bc   : > { %v5895_v47 = vadd.f32 %v4250_v51, %v4249_v23 }
 0x1c0   : > { %v4252_v52 = vpop.f32.mrb[20].mxu0 }
 0x1c1   : > { %v4253_v49 = vpop.f32.mrb[21].mxu0 }
 0x1c2   : > { %v5897_v54 = vadd.f32 %v4253_v49, %v4252_v52  ;;  %v4255_v31 = vpop.f32.mrb[22].mxu0 }
 0x1c3   : > { %v4256_v62 = vpop.f32.mrb[23].mxu0 }
 0x1c4   : > { %v5905_v43 = vadd.f32 %v4256_v62, %v4255_v31 }
 0x1c8   : > { %v4258_v1 = vpop.f32.mrb[24].mxu0 }
 0x1c9   : > { %v4259_v37 = vpop.f32.mrb[25].mxu0 }
 0x1ca   : > { %v5907_v40 = vadd.f32 %v4259_v37, %v4258_v1  ;;  %v4261_v32 = vpop.f32.mrb[26].mxu0 }
 0x1cb   : > { %v4262_v4 = vpop.f32.mrb[27].mxu0 }
 0x1cc   : > { %v5909_v55 = vadd.f32 %v4262_v4, %v4261_v32  ;;  %v1674_v32 = vadd.f32 %v5876_v58, %v5922_v61  ;;  %v4861_v58 = vld [vmem:[%s6949_s3 + $0x60] sm:$0xff]  }
 0x1d0   : > { %v4264_v53 = vpop.f32.mrb[28].mxu0 }
 0x1d1   : > { %v4265_v33 = vpop.f32.mrb[29].mxu0 }
 0x1d2   : > { %v5911_v45 = vadd.f32 %v4265_v33, %v4264_v53  ;;  %v4267_v28 = vpop.f32.mrb[30].mxu0 }
 0x1d3   : > { %v4268_v39 = vpop.f32.mrb[31].mxu0 }
 0x1d4   : > { %v5924_v36 = vadd.f32 %v4268_v39, %v4267_v28 }
 0x1d6   : > { %v4334_v29 = vpop.f32.mrb[0].mxu1 }
 0x1d7   : > { %v4335_v56 = vpop.f32.mrb[1].mxu1 }
 0x1d8   : > { %v4336_v34 = vadd.f32 %v4335_v56, %v4334_v29  ;;  %v4337_v46 = vpop.f32.mrb[2].mxu1  ;;  %v4270_v30 = vpop.f32.mrb[32].mxu0  ;;  %v4860_v29 = vld [vmem:[%s6949_s3 + $0x18] sm:$0xff]  }
 0x1d9   : > { %v4338_v25 = vpop.f32.mrb[3].mxu1  ;;  %v4271_v41 = vpop.f32.mrb[33].mxu0  ;;  %4457 = vmatpush3.bf16.msra.mxu1 %v4860_v29 }
 0x1da   : > { %v4339_v48 = vadd.f32 %v4338_v25, %v4337_v46  ;;  %v5930_v63 = vadd.f32 %v4336_v34, %v1663_v59  ;;  %v5932_v23 = vadd.f32 %v4271_v41, %v4270_v30  ;;  %v4273_v51 = vpop.f32.mrb[34].mxu0  ;;  %v4862_v46 = vld [vmem:[%s6949_s3 + $0x20] sm:$0xff]   ;;  %v1679_v30 = vadd.f32 %v5879_v22, %v5922_v61  ;;  %4458 = vmatprep.subr.bf16.mxu1 %v4861_v58 }
 0x1db   : > { %v4274_v52 = vpop.f32.mrb[35].mxu0 }
 0x1dc   : > { %v5934_v49 = vadd.f32 %v4339_v48, %v1666_v3  ;;  %v5936_v31 = vadd.f32 %v4274_v52, %v4273_v51  ;;  %v1682_v51 = vadd.f32 %v5881_v50, %v5922_v61 }
 0x1dd   : > { %4459 = vmatpush3.bf16.msra.mxu1 %v4862_v46 }
 0x1de   : > { %v4340_v0 = vpop.f32.mrb[4].mxu1  ;;  %v1730_v26 = vadd.f32 %v5936_v31, %v5922_v61  ;;  %v2367_v31 = vld [vmem:[#allocation3 + $0x2] sm:$0xff] }
 0x1df   : > { %v4341_v44 = vpop.f32.mrb[5].mxu1 }
 0x1e0   : > { %v4342_v62 = vadd.f32 %v4341_v44, %v4340_v0  ;;  %v4343_v1 = vpop.f32.mrb[6].mxu1  ;;  %v4276_v5 = vpop.f32.mrb[36].mxu0 }
 0x1e1   : > { %v4344_v37 = vpop.f32.mrb[7].mxu1  ;;  %v4277_v53 = vpop.f32.mrb[37].mxu0 }
 0x1e2   : > { %v4345_v4 = vadd.f32 %v4344_v37, %v4343_v1  ;;  %v5942_v33 = vadd.f32 %v4342_v62, %v1671_v38  ;;  %v5944_v28 = vadd.f32 %v4277_v53, %v4276_v5  ;;  %v4279_v27 = vpop.f32.mrb[38].mxu0 }
 0x1e3   : > { %v4280_v60 = vpop.f32.mrb[39].mxu0 }
 0x1e4   : > { %v5946_v39 = vadd.f32 %v4345_v4, %v1674_v32  ;;  %v5957_v56 = vadd.f32 %v4280_v60, %v4279_v27  ;;  %v1687_v4 = vadd.f32 %v5883_v35, %v5922_v61  ;;  %v4863_v35 = vld [vmem:[%s6949_s3 + $0x68] sm:$0xff]  }
 0x1e5   : > { %4460 = vmatprep.subr.bf16.mxu1 %v4863_v35 }
 0x1e6   : > { %v4346_v59 = vpop.f32.mrb[8].mxu1 }
 0x1e7   : > { %v4347_v34 = vpop.f32.mrb[9].mxu1 }
 0x1e8   : > { %v4348_v25 = vadd.f32 %v4347_v34, %v4346_v59  ;;  %v4349_v3 = vpop.f32.mrb[10].mxu1  ;;  %v4282_v48 = vpop.f32.mrb[40].mxu0 }
 0x1e9   : > { %v4350_v41 = vpop.f32.mrb[11].mxu1  ;;  %v4283_v0 = vpop.f32.mrb[41].mxu0 }
 0x1ea   : > { %v4351_v52 = vadd.f32 %v4350_v41, %v4349_v3  ;;  %v5966_v44 = vadd.f32 %v4348_v25, %v1679_v30  ;;  %v5968_v38 = vadd.f32 %v4283_v0, %v4282_v48  ;;  %v4285_v62 = vpop.f32.mrb[42].mxu0  ;;  %v4864_v3 = vld [vmem:[%s6949_s3 + $0x28] sm:$0xff]  }
 0x1eb   : > { %v4286_v1 = vpop.f32.mrb[43].mxu0  ;;  %4461 = vmatpush3.bf16.msra.mxu1 %v4864_v3 }
 0x1ec   : > { %v5970_v5 = vadd.f32 %v4351_v52, %v1682_v51  ;;  %v5972_v22 = vadd.f32 %v4286_v1, %v4285_v62  ;;  %v1695_v51 = vadd.f32 %v5893_v42, %v5922_v61 }
 0x1ee   : > { %v4352_v37 = vpop.f32.mrb[12].mxu1 }
 0x1ef   : > { %v4353_v32 = vpop.f32.mrb[13].mxu1 }
 0x1f0   : > { %v4354_v53 = vadd.f32 %v4353_v32, %v4352_v37  ;;  %v4355_v50 = vpop.f32.mrb[14].mxu1  ;;  %v4288_v27 = vpop.f32.mrb[44].mxu0  ;;  %v1698_v37 = vadd.f32 %v5895_v47, %v5922_v61 }
 0x1f1   : > { %v4356_v60 = vpop.f32.mrb[15].mxu1  ;;  %v4289_v58 = vpop.f32.mrb[45].mxu0 }
 0x1f2   : > { %v4357_v29 = vadd.f32 %v4356_v60, %v4355_v50  ;;  %v5978_v59 = vadd.f32 %v4354_v53, %v1687_v4  ;;  %v5980_v34 = vadd.f32 %v4289_v58, %v4288_v27  ;;  %v4291_v46 = vpop.f32.mrb[46].mxu0 }
 0x1f3   : > { %v4292_v30 = vpop.f32.mrb[47].mxu0 }
 0x1f4   : > { %v5982_v25 = vadd.f32 %v4357_v29, %v1690_v2  ;;  %v5990_v48 = vadd.f32 %v4292_v30, %v4291_v46  ;;  %v1703_v46 = vadd.f32 %v5897_v54, %v5922_v61  ;;  %v4865_v54 = vld [vmem:[%s6949_s3 + $0x70] sm:$0xff]  }
 0x1f5   : > { %4462 = vmatprep.subr.bf16.mxu1 %v4865_v54 }
 0x1f6   : > { %v4358_v57 = vpop.f32.mrb[16].mxu1 }
 0x1f7   : > { %v4359_v41 = vpop.f32.mrb[17].mxu1 }
 0x1f8   : > { %v4360_v52 = vadd.f32 %v4359_v41, %v4358_v57  ;;  %v4361_v0 = vpop.f32.mrb[18].mxu1  ;;  %v4294_v62 = vpop.f32.mrb[48].mxu0  ;;  %v1706_v57 = vadd.f32 %v5905_v43, %v5922_v61 }
 0x1f9   : > { %v4362_v1 = vpop.f32.mrb[19].mxu1  ;;  %v4295_v4 = vpop.f32.mrb[49].mxu0 }
 0x1fa   : > { %v4363_v32 = vadd.f32 %v4362_v1, %v4361_v0  ;;  %v5996_v53 = vadd.f32 %v4360_v52, %v1695_v51  ;;  %v5998_v50 = vadd.f32 %v4295_v4, %v4294_v62  ;;  %v4297_v27 = vpop.f32.mrb[50].mxu0 }
 0x1fb   : > { %v4298_v60 = vpop.f32.mrb[51].mxu0 }
 0x1fc   : > { %v6000_v2 = vadd.f32 %v4363_v32, %v1698_v37  ;;  %v6002_v29 = vadd.f32 %v4298_v60, %v4297_v27  ;;  %v4866_v32 = vld [vmem:[%s6949_s3 + $0x30] sm:$0xff]   ;;  %v1711_v60 = vadd.f32 %v5907_v40, %v5922_v61 }
 0x1fd   : > { %4463 = vmatpush3.bf16.msra.mxu1 %v4866_v32 }
 0x1fe   : > { %v4364_v42 = vpop.f32.mrb[20].mxu1 }
 0x1ff   : > { %v4365_v58 = vpop.f32.mrb[21].mxu1 }
 0x200   : > { %v4366_v30 = vadd.f32 %v4365_v58, %v4364_v42  ;;  %v4367_v35 = vpop.f32.mrb[22].mxu1  ;;  %v4300_v47 = vpop.f32.mrb[52].mxu0 }
 0x201   : > { %v4368_v3 = vpop.f32.mrb[23].mxu1  ;;  %v4301_v51 = vpop.f32.mrb[53].mxu0 }
 0x202   : > { %v4369_v41 = vadd.f32 %v4368_v3, %v4367_v35  ;;  %v6008_v52 = vadd.f32 %v4366_v30, %v1703_v46  ;;  %v6010_v0 = vadd.f32 %v4301_v51, %v4300_v47  ;;  %v4303_v62 = vpop.f32.mrb[54].mxu0  ;;  %v1714_v35 = vadd.f32 %v5909_v55, %v5922_v61 }
 0x203   : > { %v4304_v1 = vpop.f32.mrb[55].mxu0 }
 0x204   : > { %v6012_v37 = vadd.f32 %v4369_v41, %v1706_v57  ;;  %v6020_v4 = vadd.f32 %v4304_v1, %v4303_v62 }
 0x206   : > { %v4370_v43 = vpop.f32.mrb[24].mxu1 }
 0x207   : > { %v4371_v27 = vpop.f32.mrb[25].mxu1 }
 0x208   : > { %v4372_v42 = vadd.f32 %v4371_v27, %v4370_v43  ;;  %v4373_v58 = vpop.f32.mrb[26].mxu1  ;;  %v4306_v46 = vpop.f32.mrb[56].mxu0  ;;  %v1719_v43 = vadd.f32 %v5911_v45, %v5922_v61  ;;  %v4867_v45 = vld [vmem:[%s6949_s3 + $0x78] sm:$0xff]  }
 0x209   : > { %v4374_v30 = vpop.f32.mrb[27].mxu1  ;;  %v4307_v3 = vpop.f32.mrb[57].mxu0  ;;  %4464 = vmatprep.subr.bf16.mxu1 %v4867_v45 }
 0x20a   : > { %v4375_v47 = vadd.f32 %v4374_v30, %v4373_v58  ;;  %v6026_v57 = vadd.f32 %v4372_v42, %v1711_v60  ;;  %v6028_v41 = vadd.f32 %v4307_v3, %v4306_v46  ;;  %v4309_v51 = vpop.f32.mrb[58].mxu0  ;;  %v1722_v60 = vadd.f32 %v5924_v36, %v5922_v61 }
 0x20b   : > { %v4310_v62 = vpop.f32.mrb[59].mxu0 }
 0x20c   : > { %v6030_v1 = vadd.f32 %v4375_v47, %v1714_v35  ;;  %v6032_v54 = vadd.f32 %v4310_v62, %v4309_v51  ;;  %v4868_v62 = vld [vmem:[%s6949_s3 + $0x38] sm:$0xff]  }
 0x20d   : > { %4465 = vmatpush3.bf16.msra.mxu1 %v4868_v62 }
 0x20e   : > { %v4376_v40 = vpop.f32.mrb[28].mxu1 }
 0x20f   : > { %v4377_v32 = vpop.f32.mrb[29].mxu1 }
 0x210   : > { %v4378_v27 = vadd.f32 %v4377_v32, %v4376_v40  ;;  %v4379_v24 = vpop.f32.mrb[30].mxu1  ;;  %v4312_v55 = vpop.f32.mrb[60].mxu0  ;;  %v1727_v32 = vadd.f32 %v5932_v23, %v5922_v61 }
 0x211   : > { %v4380_v58 = vpop.f32.mrb[31].mxu1  ;;  %v4313_v46 = vpop.f32.mrb[61].mxu0 }
 0x212   : > { %v4381_v42 = vadd.f32 %v4380_v58, %v4379_v24  ;;  %v6038_v30 = vadd.f32 %v4378_v27, %v1719_v43  ;;  %v6040_v35 = vadd.f32 %v4313_v46, %v4312_v55  ;;  %v4315_v47 = vpop.f32.mrb[62].mxu0  ;;  %v2175_v55 = vld [vmem:[#allocation3] sm:$0xff]  ;;  %v2176_v58 = vld [vmem:[#allocation3 + $0x8] sm:$0xff]  ;;  %v2304_v23 = vpop.permute.xlu1 %2303 }
 0x213   : > { %v4316_v3 = vpop.f32.mrb[63].mxu0  ;;  %v2207_v46 = vpack.c.bf16 %v2176_v58, %v2175_v55 }
 0x214   : > { %v6042_v51 = vadd.f32 %v4381_v42, %v1722_v60  ;;  %v6050_v40 = vadd.f32 %v4316_v3, %v4315_v47 }
 0x215   : > { %2223 = vst.msk [vmem:[#allocation4] sm:$0xff] %vm224_vm0, %v2207_v46 }
 0x216   : > { %v4382_v24 = vpop.f32.mrb[32].mxu1  ;;  %2351 = vst.msk [vmem:[#allocation4] sm:$0xff] %vm547_vm3, %v2304_v23  ;;  %v4870_v23 = vld [vmem:[%s6949_s3 + $0x80] sm:$0xff]  }
 0x217   : > { %v4383_v36 = vpop.f32.mrb[33].mxu1 }
 0x218   : > { %v4384_v43 = vadd.f32 %v4383_v36, %v4382_v24  ;;  %v4385_v27 = vpop.f32.mrb[34].mxu1  ;;  %v4704_v42 = vpop.f32.mrb[64].mxu0 }
 0x219   : > { %v4386_v60 = vpop.f32.mrb[35].mxu1  ;;  %v1993_v47 = vadd.f32 %v4704_v42, %v5942_v33  ;;  %v1984_v3 = vpop.f32.mrb[65].mxu0 }
 0x21a   : > { %v4387_v19 = vadd.f32 %v4386_v60, %v4385_v27  ;;  %v6057_v45 = vadd.f32 %v4384_v43, %v1727_v32  ;;  %v1985_v62 = vadd.f32 %v1984_v3, %v5930_v63  ;;  %v4705_v21 = vpop.f32.mrb[66].mxu0  ;;  %v2368_v27 = vld [vmem:[#allocation3 + $0xa] sm:$0xff] }
 0x21b   : > { %v2113_v24 = vmax.f32 %v1993_v47, 0.0  ;;  %v1996_v36 = vadd.f32 %v4705_v21, %v5946_v39  ;;  %v1987_v18 = vpop.f32.mrb[67].mxu0  ;;  %v2399_v43 = vpack.c.bf16 %v2368_v27, %v2367_v31  ;;  %v1738_v39 = vadd.f32 %v5957_v56, %v5922_v61 }
 0x21c   : > { %v6062_v55 = vadd.f32 %v4387_v19, %v1730_v26  ;;  %v2111_v33 = vmax.f32 %v1985_v62, 0.0  ;;  %v1988_v32 = vadd.f32 %v1987_v18, %v5934_v49  ;;  %v1735_v19 = vadd.f32 %v5944_v28, %v5922_v61  ;;  %v4869_v28 = vld [vmem:[%s6949_s3 + $0xc0] sm:$0xff]  }
 0x21d   : > { %2145 = vst.msk [vmem:[#allocation3 + $0x31] sm:$0xff] %vm224_vm0, %v2113_v24  ;;  %v2114_v63 = vmax.f32 %v1996_v36, 0.0  ;;  %2415 = vst.msk [vmem:[#allocation4 + $0x8] sm:$0xff] %vm224_vm0, %v2399_v43  ;;  %4562 = vmatprep.subr.bf16.mxu0 %v4869_v28 }
 0x21e   : > { %v4388_v58 = vpop.f32.mrb[36].mxu1  ;;  %2143 = vst.msk [vmem:[#allocation3 + $0x19] sm:$0xff] %vm224_vm0, %v2111_v33  ;;  %v2112_v60 = vmax.f32 %v1988_v32, 0.0  ;;  %4563 = vmatpush3.bf16.msra.mxu0 %v4870_v23 }
 0x21f   : > { %v4389_v42 = vpop.f32.mrb[37].mxu1  ;;  %2146 = vst.msk [vmem:[#allocation3 + $0x39] sm:$0xff] %vm224_vm0, %v2114_v63 }
 0x220   : > { %v4390_v21 = vadd.f32 %v4389_v42, %v4388_v58  ;;  %v4391_v26 = vpop.f32.mrb[38].mxu1  ;;  %2144 = vst.msk [vmem:[#allocation3 + $0x21] sm:$0xff] %vm224_vm0, %v2112_v60  ;;  %v4708_v49 = vpop.f32.mrb[68].mxu0 }
 0x221   : > { %v4392_v18 = vpop.f32.mrb[39].mxu1  ;;  %v2009_v47 = vadd.f32 %v4708_v49, %v5978_v59  ;;  %v2000_v3 = vpop.f32.mrb[69].mxu0 }
 0x222   : > { %v4393_v46 = vadd.f32 %v4392_v18, %v4391_v26  ;;  %v6076_v62 = vadd.f32 %v4390_v21, %v1735_v19  ;;  %v2001_v24 = vadd.f32 %v2000_v3, %v5966_v44  ;;  %v4709_v36 = vpop.f32.mrb[70].mxu0  ;;  %v1743_v18 = vadd.f32 %v5968_v38, %v5922_v61 }
 0x223   : > { %v2117_v31 = vmax.f32 %v2009_v47, 0.0  ;;  %v2012_v56 = vadd.f32 %v4709_v36, %v5982_v25  ;;  %v2003_v27 = vpop.f32.mrb[71].mxu0 }
 0x224   : > { %v6086_v33 = vadd.f32 %v4393_v46, %v1738_v39  ;;  %v2115_v59 = vmax.f32 %v2001_v24, 0.0  ;;  %v2004_v32 = vadd.f32 %v2003_v27, %v5970_v5  ;;  %v2433_v42 = vld [vmem:[#allocation3 + $0x30] sm:$0xff]  ;;  %v1746_v24 = vadd.f32 %v5972_v22, %v5922_v61 }
 0x225   : > { %2149 = vst.msk [vmem:[#allocation3 + $0x61] sm:$0xff] %vm224_vm0, %v2117_v31  ;;  %v2118_v43 = vmax.f32 %v2012_v56, 0.0  ;;  %v2431_v58 = vld [vmem:[#allocation3 + $0x18] sm:$0xff] }
 0x226   : > { %v4394_v63 = vpop.f32.mrb[40].mxu1  ;;  %v2241_v60 = vld [vmem:[#allocation3 + $0x19] sm:$0xff]  ;;  %2147 = vst.msk [vmem:[#allocation3 + $0x49] sm:$0xff] %vm224_vm0, %v2115_v59  ;;  %v2116_v25 = vmax.f32 %v2004_v32, 0.0  ;;  %v2243_v28 = vld [vmem:[#allocation3 + $0x31] sm:$0xff] }
 0x227   : > { %v2944_v44 = vld [vmem:[#allocation3 + $0x32] sm:$0xff]  ;;  %v2945_v19 = vld [vmem:[#allocation3 + $0x3a] sm:$0xff]  ;;  %v4395_v21 = vpop.f32.mrb[41].mxu1  ;;  %2150 = vst.msk [vmem:[#allocation3 + $0x69] sm:$0xff] %vm224_vm0, %v2118_v43  ;;  %v2624_v59 = vld [vmem:[#allocation3 + $0x22] sm:$0xff] }
 0x228   : > { %v2434_v26 = vld [vmem:[#allocation3 + $0x38] sm:$0xff]  ;;  %v6093_v49 = vpack.c.bf16 %v2945_v19, %v2944_v44  ;;  %v4396_v5 = vadd.f32 %v4395_v21, %v4394_v63  ;;  %v4397_v39 = vpop.f32.mrb[42].mxu1  ;;  %v2432_v46 = vld [vmem:[#allocation3 + $0x20] sm:$0xff]  ;;  %2148 = vst.msk [vmem:[#allocation3 + $0x51] sm:$0xff] %vm224_vm0, %v2116_v25  ;;  %v4712_v31 = vpop.f32.mrb[72].mxu0  ;;  %v2752_v25 = vld [vmem:[#allocation3 + $0x30] sm:$0xff] }
 0x229   : > { %v2242_v47 = vld [vmem:[#allocation3 + $0x21] sm:$0xff]  ;;  %v2464_v3 = vpack.c.bf16 %v2434_v26, %v2433_v42  ;;  %v2244_v23 = vld [vmem:[#allocation3 + $0x39] sm:$0xff]  ;;  %v4398_v36 = vpop.f32.mrb[43].mxu1  ;;  %v2463_v56 = vpack.c.bf16 %v2432_v46, %v2431_v58  ;;  %v2025_v63 = vadd.f32 %v4712_v31, %v6008_v52  ;;  %v2016_v42 = vpop.f32.mrb[73].mxu0  ;;  %v4871_v58 = vld [vmem:[%s6949_s3 + $0x100] sm:$0xff]  }
 0x22a   : > { %v2272_v38 = vpack.c.bf16 %v2242_v47, %v2241_v60  ;;  %v2623_v27 = vld [vmem:[#allocation3 + $0x1a] sm:$0xff]  ;;  %2992 = vst.msk [vmem:[#allocation4 + $0x20] sm:$0xff] %vm224_vm0, %v6093_v49  ;;  %v4399_v43 = vadd.f32 %v4398_v36, %v4397_v39  ;;  %v6102_v44 = vadd.f32 %v4396_v5, %v1743_v18  ;;  %v2371_v22 = vld [vmem:[#allocation3 + $0x32] sm:$0xff]  ;;  %v2017_v21 = vadd.f32 %v2016_v42, %v5996_v53  ;;  %v4713_v26 = vpop.f32.mrb[74].mxu0 }
 0x22b   : > { %v2372_v32 = vld [vmem:[#allocation3 + $0x3a] sm:$0xff]  ;;  %v6104_v19 = vpack.c.bf16 %v2624_v59, %v2623_v27  ;;  %2225 = vst.msk [vmem:[#allocation4 + $0x50] sm:$0xff] %vm224_vm0, %v2464_v3  ;;  %2495 = vrot.lane.b32.xlu0 %v2463_v56, %s4956_s26  ;;  %v6113_v52 = vpack.c.bf16 %v2244_v23, %v2243_v28  ;;  %2224 = vst.msk [vmem:[#allocation4 + $0x28] sm:$0xff] %vm224_vm0, %v2463_v56  ;;  %v2121_v53 = vmax.f32 %v2025_v63, 0.0  ;;  %v2019_v36 = vpop.f32.mrb[75].mxu0  ;;  %4734 = vmatprep.subr.bf16.mxu1 %v4871_v58  ;;  %v2561_v56 = vld [vmem:[#allocation3 + $0x31] sm:$0xff] }
 0x22c   : > { %v2559_v60 = vld [vmem:[#allocation3 + $0x19] sm:$0xff]  ;;  %2305 = vrot.lane.b32.xlu1 %v2272_v38, %s4956_s26  ;;  %v2401_v18 = vpack.c.bf16 %v2372_v32, %v2371_v22  ;;  %v2560_v46 = vld [vmem:[#allocation3 + $0x21] sm:$0xff]  ;;  %v2028_v47 = vadd.f32 %v4713_v26, %v6012_v37  ;;  %v6123_v31 = vadd.f32 %v4399_v43, %v1746_v24  ;;  %v2119_v27 = vmax.f32 %v2017_v21, 0.0 }
 0x22d   : > { %v4872_v5 = vld [vmem:[%s6949_s3 + $0xc8] sm:$0xff]   ;;  %2416 = vst.msk [vmem:[#allocation4 + $0x30] sm:$0xff] %vm224_vm0, %v6104_v19  ;;  %v2591_v28 = vpack.c.bf16 %v2560_v46, %v2559_v60  ;;  %v2020_v59 = vadd.f32 %v2019_v36, %v6000_v2  ;;  %2153 = vst.msk [vmem:[#allocation3 + $0x91] sm:$0xff] %vm224_vm0, %v2121_v53  ;;  %v2435_v43 = vld [vmem:[#allocation3 + $0x48] sm:$0xff] }
 0x22e   : > { %v4873_v39 = vld [vmem:[%s6949_s3 + $0x88] sm:$0xff]   ;;  %2417 = vst.msk [vmem:[#allocation4 + $0x58] sm:$0xff] %vm224_vm0, %v2401_v18  ;;  %4564 = vmatprep.subr.bf16.mxu0 %v4872_v5  ;;  %v2122_v37 = vmax.f32 %v2028_v47, 0.0  ;;  %v4400_v24 = vpop.f32.mrb[44].mxu1  ;;  %v2437_v42 = vld [vmem:[#allocation3 + $0x60] sm:$0xff]  ;;  %v2949_v58 = vld [vmem:[#allocation3 + $0x6a] sm:$0xff] }
 0x22f   : > { %v2753_v23 = vld [vmem:[#allocation3 + $0x38] sm:$0xff]  ;;  %4565 = vmatpush3.bf16.msra.mxu0 %v4873_v39  ;;  %2607 = vst.msk [vmem:[#allocation4 + $0x10] sm:$0xff] %vm224_vm0, %v2591_v28  ;;  %v2948_v22 = vld [vmem:[#allocation3 + $0x62] sm:$0xff]  ;;  %2151 = vst.msk [vmem:[#allocation3 + $0x79] sm:$0xff] %vm224_vm0, %v2119_v27  ;;  %v2120_v60 = vmax.f32 %v2020_v59, 0.0  ;;  %v4401_v2 = vpop.f32.mrb[45].mxu1  ;;  %2497 = vrot.lane.b32.xlu0 %v2464_v3, %s4956_s26  ;;  %v1751_v3 = vadd.f32 %v5980_v34, %v5922_v61 }
 0x230   : > { %v2562_v38 = vld [vmem:[#allocation3 + $0x39] sm:$0xff]  ;;  %v2784_v32 = vpack.c.bf16 %v2753_v23, %v2752_v25  ;;  %2307 = vrot.lane.b32.xlu1 %v6113_v52, %s4956_s26  ;;  %v2245_v25 = vld [vmem:[#allocation3 + $0x49] sm:$0xff]  ;;  %v6137_v26 = vpack.c.bf16 %v2949_v58, %v2948_v22  ;;  %2154 = vst.msk [vmem:[#allocation3 + $0x99] sm:$0xff] %vm224_vm0, %v2122_v37  ;;  %v4402_v39 = vadd.f32 %v4401_v2, %v4400_v24  ;;  %v4403_v46 = vpop.f32.mrb[46].mxu1  ;;  %v4716_v23 = vpop.f32.mrb[76].mxu0 }
 0x231   : > { %v2592_v63 = vpack.c.bf16 %v2562_v38, %v2561_v56  ;;  %v2438_v21 = vld [vmem:[#allocation3 + $0x68] sm:$0xff]  ;;  %v2947_v5 = vld [vmem:[#allocation3 + $0x52] sm:$0xff]  ;;  %2152 = vst.msk [vmem:[#allocation3 + $0x81] sm:$0xff] %vm224_vm0, %v2120_v60  ;;  %v4404_v28 = vpop.f32.mrb[47].mxu1  ;;  %v2041_v37 = vadd.f32 %v4716_v23, %v6038_v30  ;;  %v2032_v34 = vpop.f32.mrb[77].mxu0  ;;  %v2756_v23 = vld [vmem:[#allocation3 + $0x60] sm:$0xff] }
 0x232   : > { %2800 = vst.msk [vmem:[#allocation4 + $0x18] sm:$0xff] %vm224_vm0, %v2784_v32  ;;  %v2946_v18 = vld [vmem:[#allocation3 + $0x4a] sm:$0xff]  ;;  %v2466_v47 = vpack.c.bf16 %v2438_v21, %v2437_v42  ;;  %v1754_v32 = vadd.f32 %v5990_v48, %v5922_v61  ;;  %2994 = vst.msk [vmem:[#allocation4 + $0x70] sm:$0xff] %vm224_vm0, %v6137_v26  ;;  %v2374_v42 = vld [vmem:[#allocation3 + $0x52] sm:$0xff]  ;;  %v2033_v58 = vadd.f32 %v2032_v34, %v6026_v57  ;;  %v4717_v48 = vpop.f32.mrb[78].mxu0 }
 0x233   : > { %2608 = vst.msk [vmem:[#allocation4 + $0x38] sm:$0xff] %vm224_vm0, %v2592_v63  ;;  %v2436_v53 = vld [vmem:[#allocation3 + $0x50] sm:$0xff]  ;;  %v6142_v36 = vpack.c.bf16 %v2947_v5, %v2946_v18  ;;  %v4405_v63 = vadd.f32 %v4404_v28, %v4403_v46  ;;  %v2375_v22 = vld [vmem:[#allocation3 + $0x62] sm:$0xff]  ;;  %v6157_v2 = vadd.f32 %v4402_v39, %v1751_v3  ;;  %v2125_v5 = vmax.f32 %v2041_v37, 0.0  ;;  %v2035_v46 = vpop.f32.mrb[79].mxu0 }
 0x234   : > { %v2465_v56 = vpack.c.bf16 %v2436_v53, %v2435_v43  ;;  %v2246_v38 = vld [vmem:[#allocation3 + $0x51] sm:$0xff]  ;;  %v2248_v27 = vld [vmem:[#allocation3 + $0x69] sm:$0xff]  ;;  %2227 = vst.msk [vmem:[#allocation4 + $0xa0] sm:$0xff] %vm224_vm0, %v2466_v47  ;;  %v2247_v60 = vld [vmem:[#allocation3 + $0x61] sm:$0xff]  ;;  %v2044_v39 = vadd.f32 %v4717_v48, %v6042_v51 }
 0x235   : > { %v2373_v59 = vld [vmem:[#allocation3 + $0x4a] sm:$0xff]  ;;  %v6150_v24 = vpack.c.bf16 %v2246_v38, %v2245_v25  ;;  %2993 = vst.msk [vmem:[#allocation4 + $0x48] sm:$0xff] %vm224_vm0, %v6142_v36  ;;  %v4874_v21 = vld [vmem:[%s6949_s3 + $0xd0] sm:$0xff]   ;;  %v6172_v53 = vadd.f32 %v4405_v63, %v1754_v32  ;;  %v2036_v38 = vadd.f32 %v2035_v46, %v6030_v1  ;;  %2157 = vst.msk [vmem:[#allocation3 + $0xc1] sm:$0xff] %vm224_vm0, %v2125_v5 }
 0x236   : > { %v2376_v43 = vld [vmem:[#allocation3 + $0x6a] sm:$0xff]  ;;  %2499 = vrot.lane.b32.xlu0 %v2465_v56, %s4956_s26  ;;  %2226 = vst.msk [vmem:[#allocation4 + $0x78] sm:$0xff] %vm224_vm0, %v2465_v56  ;;  %v2402_v30 = vpack.c.bf16 %v2374_v42, %v2373_v59  ;;  %v4875_v18 = vld [vmem:[%s6949_s3 + $0x90] sm:$0xff]   ;;  %v2123_v56 = vmax.f32 %v2033_v58, 0.0  ;;  %4566 = vmatprep.subr.bf16.mxu0 %v4874_v21  ;;  %v2126_v32 = vmax.f32 %v2044_v39, 0.0  ;;  %v4406_v63 = vpop.f32.mrb[48].mxu1  ;;  %v6181_v42 = vpack.c.bf16 %v2248_v27, %v2247_v60 }
 0x237   : > { %v2403_v25 = vpack.c.bf16 %v2376_v43, %v2375_v22  ;;  %v4876_v57 = vld [vmem:[%s6949_s3 + $0xd8] sm:$0xff]   ;;  %2309 = vrot.lane.b32.xlu1 %v6150_v24, %s4956_s26  ;;  %v2755_v28 = vld [vmem:[#allocation3 + $0x50] sm:$0xff]  ;;  %v2439_v22 = vld [vmem:[#allocation3 + $0x78] sm:$0xff]  ;;  %4567 = vmatpush3.bf16.msra.mxu0 %v4875_v18  ;;  %v4407_v21 = vpop.f32.mrb[49].mxu1 }
 0x238   : > { %v2754_v3 = vld [vmem:[#allocation3 + $0x48] sm:$0xff]  ;;  %2418 = vst.msk [vmem:[#allocation4 + $0x80] sm:$0xff] %vm224_vm0, %v2402_v30  ;;  %v2564_v34 = vld [vmem:[#allocation3 + $0x51] sm:$0xff]  ;;  %v2953_v30 = vld [vmem:[#allocation3 + $0x9a] sm:$0xff]  ;;  %4568 = vmatprep.subr.bf16.mxu0 %v4876_v57  ;;  %v4408_v39 = vadd.f32 %v4407_v21, %v4406_v63 }
 0x239   : > { %2419 = vst.msk [vmem:[#allocation4 + $0xa8] sm:$0xff] %vm224_vm0, %v2403_v25  ;;  %v4877_v51 = vld [vmem:[%s6949_s3 + $0x98] sm:$0xff]   ;;  %v2785_v59 = vpack.c.bf16 %v2755_v28, %v2754_v3  ;;  %v2441_v1 = vld [vmem:[#allocation3 + $0x90] sm:$0xff]  ;;  %2155 = vst.msk [vmem:[#allocation3 + $0xa9] sm:$0xff] %vm224_vm0, %v2123_v56  ;;  %v2124_v25 = vmax.f32 %v2036_v38, 0.0  ;;  %v4409_v28 = vpop.f32.mrb[50].mxu1 }
 0x23a   : > { %v2563_v37 = vld [vmem:[#allocation3 + $0x49] sm:$0xff]  ;;  %v2952_v48 = vld [vmem:[#allocation3 + $0x92] sm:$0xff]  ;;  %2501 = vrot.lane.b32.xlu0 %v2466_v47, %s4956_s26  ;;  %v2950_v5 = vld [vmem:[#allocation3 + $0x7a] sm:$0xff]  ;;  %2158 = vst.msk [vmem:[#allocation3 + $0xc9] sm:$0xff] %vm224_vm0, %v2126_v32  ;;  %v1759_v47 = vadd.f32 %v5998_v50, %v5922_v61 }
 0x23b   : > { %v2593_v43 = vpack.c.bf16 %v2564_v34, %v2563_v37  ;;  %v2757_v58 = vld [vmem:[#allocation3 + $0x68] sm:$0xff]  ;;  %v2249_v46 = vld [vmem:[#allocation3 + $0x79] sm:$0xff]  ;;  %2801 = vst.msk [vmem:[#allocation4 + $0x40] sm:$0xff] %vm224_vm0, %v2785_v59  ;;  %v6186_v60 = vpack.c.bf16 %v2953_v30, %v2952_v48  ;;  %2311 = vrot.lane.b32.xlu1 %v6181_v42, %s4956_s26  ;;  %2156 = vst.msk [vmem:[#allocation3 + $0xb1] sm:$0xff] %vm224_vm0, %v2124_v25  ;;  %v4720_v59 = vpop.f32.mrb[80].mxu0  ;;  %4569 = vmatpush3.bf16.msra.mxu0 %v4877_v51 }
 0x23c   : > { %v2442_v3 = vld [vmem:[#allocation3 + $0x98] sm:$0xff]  ;;  %v2786_v27 = vpack.c.bf16 %v2757_v58, %v2756_v23  ;;  %v2951_v18 = vld [vmem:[#allocation3 + $0x82] sm:$0xff]  ;;  %v4410_v23 = vpop.f32.mrb[51].mxu1  ;;  %v2057_v50 = vadd.f32 %v4720_v59, %v6076_v62  ;;  %v2048_v58 = vpop.f32.mrb[81].mxu0  ;;  %v4878_v51 = vld [vmem:[%s6949_s3 + $0xe0] sm:$0xff]  }
 0x23d   : > { %v2440_v56 = vld [vmem:[#allocation3 + $0x80] sm:$0xff]  ;;  %v2468_v38 = vpack.c.bf16 %v2442_v3, %v2441_v1  ;;  %2609 = vst.msk [vmem:[#allocation4 + $0x60] sm:$0xff] %vm224_vm0, %v2593_v43  ;;  %v6194_v57 = vpack.c.bf16 %v2951_v18, %v2950_v5  ;;  %v1762_v1 = vadd.f32 %v6002_v29, %v5922_v61  ;;  %2996 = vst.msk [vmem:[#allocation4 + $0xc0] sm:$0xff] %vm224_vm0, %v6186_v60  ;;  %v4721_v21 = vpop.f32.mrb[82].mxu0  ;;  %4570 = vmatprep.subr.bf16.mxu0 %v4878_v51 }
 0x23e   : > { %v2467_v37 = vpack.c.bf16 %v2440_v56, %v2439_v22  ;;  %v2250_v34 = vld [vmem:[#allocation3 + $0x81] sm:$0xff]  ;;  %v2252_v32 = vld [vmem:[#allocation3 + $0x99] sm:$0xff]  ;;  %2802 = vst.msk [vmem:[#allocation4 + $0x68] sm:$0xff] %vm224_vm0, %v2786_v27  ;;  %v4411_v43 = vadd.f32 %v4410_v23, %v4409_v28  ;;  %v2049_v29 = vadd.f32 %v2048_v58, %v6057_v45  ;;  %v6210_v3 = vadd.f32 %v4408_v39, %v1759_v47  ;;  %v4879_v27 = vld [vmem:[%s6949_s3 + $0xa0] sm:$0xff]   ;;  %v2051_v39 = vpop.f32.mrb[83].mxu0 }
 0x23f   : > { %v2377_v63 = vld [vmem:[#allocation3 + $0x7a] sm:$0xff]  ;;  %v6203_v48 = vpack.c.bf16 %v2250_v34, %v2249_v46  ;;  %v2378_v30 = vld [vmem:[#allocation3 + $0x82] sm:$0xff]  ;;  %2229 = vst.msk [vmem:[#allocation4 + $0xf0] sm:$0xff] %vm224_vm0, %v2468_v38  ;;  %v2379_v22 = vld [vmem:[#allocation3 + $0x92] sm:$0xff]  ;;  %v2129_v5 = vmax.f32 %v2057_v50, 0.0  ;;  %v2060_v18 = vadd.f32 %v4721_v21, %v6086_v33  ;;  %v2052_v59 = vadd.f32 %v2051_v39, %v6062_v55  ;;  %4571 = vmatpush3.bf16.msra.mxu0 %v4879_v27 }
 0x240   : > { %v2380_v25 = vld [vmem:[#allocation3 + $0x9a] sm:$0xff]  ;;  %2995 = vst.msk [vmem:[#allocation4 + $0x98] sm:$0xff] %vm224_vm0, %v6194_v57  ;;  %2503 = vrot.lane.b32.xlu0 %v2467_v37, %s4956_s26  ;;  %2228 = vst.msk [vmem:[#allocation4 + $0xc8] sm:$0xff] %vm224_vm0, %v2467_v37  ;;  %v2404_v62 = vpack.c.bf16 %v2378_v30, %v2377_v63  ;;  %v6225_v28 = vadd.f32 %v4411_v43, %v1762_v1  ;;  %v2566_v47 = vld [vmem:[#allocation3 + $0x69] sm:$0xff]  ;;  %v2127_v23 = vmax.f32 %v2049_v29, 0.0  ;;  %v4412_v43 = vpop.f32.mrb[52].mxu1 }
 0x241   : > { %v2405_v46 = vpack.c.bf16 %v2380_v25, %v2379_v22  ;;  %v4880_v45 = vld [vmem:[%s6949_s3 + $0xe8] sm:$0xff]   ;;  %2313 = vrot.lane.b32.xlu1 %v6203_v48, %s4956_s26  ;;  %v2565_v56 = vld [vmem:[#allocation3 + $0x61] sm:$0xff]  ;;  %2161 = vst.msk [vmem:[#allocation3 + $0xf1] sm:$0xff] %vm224_vm0, %v2129_v5  ;;  %v2130_v1 = vmax.f32 %v2060_v18, 0.0  ;;  %v2957_v25 = vld [vmem:[#allocation3 + $0xca] sm:$0xff]  ;;  %v2128_v29 = vmax.f32 %v2052_v59, 0.0 }
 0x242   : > { %v2251_v37 = vld [vmem:[#allocation3 + $0x91] sm:$0xff]  ;;  %v2445_v34 = vld [vmem:[#allocation3 + $0xc0] sm:$0xff]  ;;  %2420 = vst.msk [vmem:[#allocation4 + $0xd0] sm:$0xff] %vm224_vm0, %v2404_v62  ;;  %v2594_v63 = vpack.c.bf16 %v2566_v47, %v2565_v56  ;;  %v2443_v58 = vld [vmem:[#allocation3 + $0xa8] sm:$0xff]  ;;  %v4413_v21 = vpop.f32.mrb[53].mxu1  ;;  %4572 = vmatprep.subr.bf16.mxu0 %v4880_v45  ;;  %v1770_v45 = vadd.f32 %v6020_v4, %v5922_v61 }
 0x243   : > { %2421 = vst.msk [vmem:[#allocation4 + $0xf8] sm:$0xff] %vm224_vm0, %v2405_v46  ;;  %v4881_v33 = vld [vmem:[%s6949_s3 + $0xa8] sm:$0xff]   ;;  %v6234_v50 = vpack.c.bf16 %v2252_v32, %v2251_v37  ;;  %v2759_v30 = vld [vmem:[#allocation3 + $0x80] sm:$0xff]  ;;  %2159 = vst.msk [vmem:[#allocation3 + $0xd9] sm:$0xff] %vm224_vm0, %v2127_v23  ;;  %v1767_v32 = vadd.f32 %v6010_v0, %v5922_v61  ;;  %v4414_v18 = vadd.f32 %v4413_v21, %v4412_v43  ;;  %v4415_v39 = vpop.f32.mrb[54].mxu1  ;;  %v4724_v23 = vpop.f32.mrb[84].mxu0 }
 0x244   : > { %v2758_v55 = vld [vmem:[#allocation3 + $0x78] sm:$0xff]  ;;  %v2956_v22 = vld [vmem:[#allocation3 + $0xc2] sm:$0xff]  ;;  %2505 = vrot.lane.b32.xlu0 %v2468_v38, %s4956_s26  ;;  %2610 = vst.msk [vmem:[#allocation4 + $0x88] sm:$0xff] %vm224_vm0, %v2594_v63  ;;  %v2954_v27 = vld [vmem:[#allocation3 + $0xaa] sm:$0xff]  ;;  %v4416_v0 = vpop.f32.mrb[55].mxu1  ;;  %4573 = vmatpush3.bf16.msra.mxu0 %v4881_v33 }
 0x245   : > { %v2446_v62 = vld [vmem:[#allocation3 + $0xc8] sm:$0xff]  ;;  %v2787_v46 = vpack.c.bf16 %v2759_v30, %v2758_v55  ;;  %v6241_v51 = vpack.c.bf16 %v2957_v25, %v2956_v22  ;;  %v2955_v5 = vld [vmem:[#allocation3 + $0xb2] sm:$0xff]  ;;  %2162 = vst.msk [vmem:[#allocation3 + $0xf9] sm:$0xff] %vm224_vm0, %v2130_v1  ;;  %2315 = vrot.lane.b32.xlu1 %v6234_v50, %s4956_s26  ;;  %2160 = vst.msk [vmem:[#allocation3 + $0xe1] sm:$0xff] %vm224_vm0, %v2128_v29  ;;  %v4417_v43 = vadd.f32 %v4416_v0, %v4415_v39  ;;  %v2064_v55 = vpop.f32.mrb[85].mxu0 }
 0x246   : > { %v2444_v38 = vld [vmem:[#allocation3 + $0xb0] sm:$0xff]  ;;  %v2470_v56 = vpack.c.bf16 %v2446_v62, %v2445_v34  ;;  %v6248_v47 = vpack.c.bf16 %v2955_v5, %v2954_v27  ;;  %v2073_v34 = vadd.f32 %v4724_v23, %v6157_v2  ;;  %v6257_v4 = vadd.f32 %v4414_v18, %v1767_v32  ;;  %v4883_v22 = vld [vmem:[%s6949_s3 + $0xb0] sm:$0xff]   ;;  %v4725_v25 = vpop.f32.mrb[86].mxu0  ;;  %v4884_v62 = vld [vmem:[%s6949_s3 + $0xf8] sm:$0xff]  }
 0x247   : > { %v2469_v59 = vpack.c.bf16 %v2444_v38, %v2443_v58  ;;  %v2253_v37 = vld [vmem:[#allocation3 + $0xa9] sm:$0xff]  ;;  %v2254_v63 = vld [vmem:[#allocation3 + $0xb1] sm:$0xff]  ;;  %2803 = vst.msk [vmem:[#allocation4 + $0x90] sm:$0xff] %vm224_vm0, %v2787_v46  ;;  %2998 = vst.msk [vmem:[#allocation4 + $0x110] sm:$0xff] %vm224_vm0, %v6241_v51  ;;  %v2065_v2 = vadd.f32 %v2064_v55, %v6102_v44  ;;  %v2076_v32 = vadd.f32 %v4725_v25, %v6172_v53  ;;  %v2067_v27 = vpop.f32.mrb[87].mxu0 }
 0x248   : > { %v2381_v1 = vld [vmem:[#allocation3 + $0xaa] sm:$0xff]  ;;  %v6255_v61 = vpack.c.bf16 %v2254_v63, %v2253_v37  ;;  %v2382_v30 = vld [vmem:[#allocation3 + $0xb2] sm:$0xff]  ;;  %2231 = vst.msk [vmem:[#allocation4 + $0x140] sm:$0xff] %vm224_vm0, %v2470_v56  ;;  %v4882_v58 = vld [vmem:[%s6949_s3 + $0xf0] sm:$0xff]   ;;  %v2133_v46 = vmax.f32 %v2073_v34, 0.0  ;;  %v6277_v44 = vadd.f32 %v4417_v43, %v1770_v45  ;;  %v2068_v39 = vadd.f32 %v2067_v27, %v6123_v31  ;;  %v4728_v27 = vpop.f32.mrb[88].mxu0 }
 0x249   : > { %2997 = vst.msk [vmem:[#allocation4 + $0xe8] sm:$0xff] %vm224_vm0, %v6248_v47  ;;  %2507 = vrot.lane.b32.xlu0 %v2469_v59, %s4956_s26  ;;  %2230 = vst.msk [vmem:[#allocation4 + $0x118] sm:$0xff] %vm224_vm0, %v2469_v59  ;;  %v2406_v33 = vpack.c.bf16 %v2382_v30, %v2381_v1  ;;  %v2383_v29 = vld [vmem:[#allocation3 + $0xc2] sm:$0xff]  ;;  %v2384_v21 = vld [vmem:[#allocation3 + $0xca] sm:$0xff]  ;;  %4574 = vmatprep.subr.bf16.mxu0 %v4882_v58  ;;  %v2131_v18 = vmax.f32 %v2065_v2, 0.0  ;;  %v2134_v53 = vmax.f32 %v2076_v32, 0.0 }
 0x24a   : > { %2317 = vrot.lane.b32.xlu1 %v6255_v61, %s4956_s26  ;;  %v2407_v5 = vpack.c.bf16 %v2384_v21, %v2383_v29  ;;  %v2256_v38 = vld [vmem:[#allocation3 + $0xc9] sm:$0xff]  ;;  %2165 = vst.msk [vmem:[#allocation3 + $0x121] sm:$0xff] %vm224_vm0, %v2133_v46  ;;  %v4418_v59 = vpop.f32.mrb[56].mxu1  ;;  %v2447_v37 = vld [vmem:[#allocation3 + $0xd8] sm:$0xff]  ;;  %4575 = vmatpush3.bf16.msra.mxu0 %v4883_v22  ;;  %v2568_v63 = vld [vmem:[#allocation3 + $0x81] sm:$0xff]  ;;  %v2132_v43 = vmax.f32 %v2068_v39, 0.0  ;;  %v2089_v39 = vadd.f32 %v4728_v27, %v6257_v4 }
 0x24b   : > { %v2449_v0 = vld [vmem:[#allocation3 + $0xf0] sm:$0xff]  ;;  %2422 = vst.msk [vmem:[#allocation4 + $0x120] sm:$0xff] %vm224_vm0, %v2406_v33  ;;  %v4885_v23 = vld [vmem:[%s6949_s3 + $0xb8] sm:$0xff]   ;;  %v2567_v45 = vld [vmem:[#allocation3 + $0x79] sm:$0xff]  ;;  %v4419_v34 = vpop.f32.mrb[57].mxu1  ;;  %4576 = vmatprep.subr.bf16.mxu0 %v4884_v62 }
 0x24c   : > { %2423 = vst.msk [vmem:[#allocation4 + $0x148] sm:$0xff] %vm224_vm0, %v2407_v5  ;;  %v2960_v1 = vld [vmem:[#allocation3 + $0xf2] sm:$0xff]  ;;  %v2961_v31 = vld [vmem:[#allocation3 + $0xfa] sm:$0xff]  ;;  %2163 = vst.msk [vmem:[#allocation3 + $0x109] sm:$0xff] %vm224_vm0, %v2131_v18  ;;  %v2595_v30 = vpack.c.bf16 %v2568_v63, %v2567_v45  ;;  %v4420_v29 = vadd.f32 %v4419_v34, %v4418_v59 }
 0x24d   : > { %2509 = vrot.lane.b32.xlu0 %v2470_v56, %s4956_s26  ;;  %v2450_v55 = vld [vmem:[#allocation3 + $0xf8] sm:$0xff]  ;;  %v6291_v58 = vld [vmem:[%s6948_s2] ss:$0 sm:$0xff]  ;;  %v6295_v2 = vpack.c.bf16 %v2961_v31, %v2960_v1  ;;  %v2959_v33 = vld [vmem:[#allocation3 + $0xe2] sm:$0xff]  ;;  %2166 = vst.msk [vmem:[#allocation3 + $0x129] sm:$0xff] %vm224_vm0, %v2134_v53  ;;  %v4421_v56 = vpop.f32.mrb[58].mxu1 }
 0x24e   : > { %v1775_v22 = vadd.f32 %v6291_v58, %v6028_v41  ;;  %v2958_v25 = vld [vmem:[#allocation3 + $0xda] sm:$0xff]  ;;  %2687 = vrot.lane.b32.xlu1 %v6104_v19, %s4956_s26  ;;  %v6300_v62 = vpack.c.bf16 %v2450_v55, %v2449_v0  ;;  %v1778_v46 = vadd.f32 %v6291_v58, %v6032_v54  ;;  %2164 = vst.msk [vmem:[#allocation3 + $0x111] sm:$0xff] %vm224_vm0, %v2132_v43  ;;  %v4422_v41 = vpop.f32.mrb[59].mxu1  ;;  %2611 = vst.msk [vmem:[#allocation4 + $0xb0] sm:$0xff] %vm224_vm0, %v2595_v30  ;;  %v2080_v0 = vpop.f32.mrb[89].mxu0  ;;  %v2386_v45 = vld [vmem:[#allocation3 + $0xe2] sm:$0xff] }
 0x24f   : > { %v2448_v21 = vld [vmem:[#allocation3 + $0xe0] sm:$0xff]  ;;  %v6304_v32 = vpack.c.bf16 %v2959_v33, %v2958_v25  ;;  %3000 = vst.msk [vmem:[#allocation4 + $0x160] sm:$0xff] %vm224_vm0, %v6295_v2  ;;  %v4423_v19 = vadd.f32 %v4422_v41, %v4421_v56  ;;  %4577 = vmatpush3.bf16.msra.mxu0 %v4885_v23  ;;  %v2081_v63 = vadd.f32 %v2080_v0, %v6210_v3  ;;  %v4729_v1 = vpop.f32.mrb[90].mxu0  ;;  %v2761_v23 = vld [vmem:[#allocation3 + $0x98] sm:$0xff]  ;;  %v2137_v31 = vmax.f32 %v2089_v39, 0.0  ;;  %v2760_v3 = vld [vmem:[#allocation3 + $0x90] sm:$0xff] }
 0x250   : > { %v2255_v5 = vld [vmem:[#allocation3 + $0xc1] sm:$0xff]  ;;  %v2471_v18 = vpack.c.bf16 %v2448_v21, %v2447_v37  ;;  %v6313_v54 = vadd.f32 %v4420_v29, %v1775_v22  ;;  %2233 = vst.msk [vmem:[#allocation4 + $0x190] sm:$0xff] %vm224_vm0, %v6300_v62  ;;  %v2387_v37 = vld [vmem:[#allocation3 + $0xf2] sm:$0xff]  ;;  %v2092_v43 = vadd.f32 %v4729_v1, %v6277_v44  ;;  %v2083_v34 = vpop.f32.mrb[91].mxu0  ;;  %v2788_v29 = vpack.c.bf16 %v2761_v23, %v2760_v3  ;;  %v4424_v27 = vpop.f32.mrb[60].mxu1 }
 0x251   : > { %v6311_v53 = vpack.c.bf16 %v2256_v38, %v2255_v5  ;;  %v2385_v59 = vld [vmem:[#allocation3 + $0xda] sm:$0xff]  ;;  %2999 = vst.msk [vmem:[#allocation4 + $0x138] sm:$0xff] %vm224_vm0, %v6304_v32  ;;  %2880 = vrot.lane.b32.xlu0 %v6113_v52, %s4956_s26  ;;  %v6326_v55 = vadd.f32 %v4423_v19, %v1778_v46  ;;  %v2569_v22 = vld [vmem:[#allocation3 + $0x91] sm:$0xff]  ;;  %v2135_v33 = vmax.f32 %v2081_v63, 0.0  ;;  %v2084_v52 = vadd.f32 %v2083_v34, %v6225_v28  ;;  %v2762_v21 = vld [vmem:[#allocation3 + $0xa8] sm:$0xff] }
 0x252   : > { %2232 = vst.msk [vmem:[#allocation4 + $0x168] sm:$0xff] %vm224_vm0, %v2471_v18  ;;  %v2408_v4 = vpack.c.bf16 %v2386_v45, %v2385_v59  ;;  %v2388_v38 = vld [vmem:[#allocation3 + $0xfa] sm:$0xff]  ;;  %v2763_v41 = vld [vmem:[#allocation3 + $0xb0] sm:$0xff]  ;;  %2169 = vst.msk [vmem:[#allocation3 + $0x151] sm:$0xff] %vm224_vm0, %v2137_v31  ;;  %v2138_v44 = vmax.f32 %v2092_v43, 0.0  ;;  %v4425_v45 = vpop.f32.mrb[61].mxu1  ;;  %v1783_v63 = vadd.f32 %v6291_v58, %v6040_v35 }
 0x253   : > { %2319 = vrot.lane.b32.xlu1 %v6311_v53, %s4956_s26  ;;  %v2409_v30 = vpack.c.bf16 %v2388_v38, %v2387_v37  ;;  %v2570_v25 = vld [vmem:[#allocation3 + $0x99] sm:$0xff]  ;;  %v2258_v5 = vld [vmem:[#allocation3 + $0xe1] sm:$0xff]  ;;  %v2789_v39 = vpack.c.bf16 %v2763_v41, %v2762_v21  ;;  %2167 = vst.msk [vmem:[#allocation3 + $0x139] sm:$0xff] %vm224_vm0, %v2135_v33  ;;  %v2136_v28 = vmax.f32 %v2084_v52, 0.0  ;;  %2804 = vst.msk [vmem:[#allocation4 + $0xb8] sm:$0xff] %vm224_vm0, %v2788_v29  ;;  %v4427_v31 = vpop.f32.mrb[62].mxu1 }
 0x254   : > { %2424 = vst.msk [vmem:[#allocation4 + $0x170] sm:$0xff] %vm224_vm0, %v2408_v4  ;;  %v2596_v56 = vpack.c.bf16 %v2570_v25, %v2569_v22  ;;  %v2451_v46 = vld [vmem:[#allocation3 + $0x108] sm:$0xff]  ;;  %v2453_v19 = vld [vmem:[#allocation3 + $0x120] sm:$0xff]  ;;  %2170 = vst.msk [vmem:[#allocation3 + $0x159] sm:$0xff] %vm224_vm0, %v2138_v44  ;;  %v4426_v23 = vadd.f32 %v4425_v45, %v4424_v27  ;;  %v4428_v35 = vpop.f32.mrb[63].mxu1 }
 0x255   : > { %2425 = vst.msk [vmem:[#allocation4 + $0x198] sm:$0xff] %vm224_vm0, %v2409_v30  ;;  %v2964_v0 = vld [vmem:[#allocation3 + $0x122] sm:$0xff]  ;;  %v2965_v59 = vld [vmem:[#allocation3 + $0x12a] sm:$0xff]  ;;  %2511 = vrot.lane.b32.xlu0 %v2471_v18, %s4956_s26  ;;  %v2963_v38 = vld [vmem:[#allocation3 + $0x112] sm:$0xff]  ;;  %v4732_v30 = vpop.f32.mrb[92].mxu0  ;;  %v4429_v52 = vadd.f32 %v4428_v35, %v4427_v31 }
 0x256   : > { %v2454_v37 = vld [vmem:[#allocation3 + $0x128] sm:$0xff]  ;;  %2612 = vst.msk [vmem:[#allocation4 + $0xd8] sm:$0xff] %vm224_vm0, %v2596_v56  ;;  %v6338_v1 = vpack.c.bf16 %v2965_v59, %v2964_v0  ;;  %v2452_v18 = vld [vmem:[#allocation3 + $0x110] sm:$0xff]  ;;  %2805 = vst.msk [vmem:[#allocation4 + $0xe0] sm:$0xff] %vm224_vm0, %v2789_v39  ;;  %v1944_v29 = vadd.f32 %v4426_v23, %v1783_v63  ;;  %v2096_v56 = vpop.f32.mrb[93].mxu0 }
 0x257   : > { %v2962_v4 = vld [vmem:[#allocation3 + $0x10a] sm:$0xff]  ;;  %2689 = vrot.lane.b32.xlu1 %v6093_v49, %s4956_s26  ;;  %v6343_v43 = vpack.c.bf16 %v2454_v37, %v2453_v19  ;;  %2168 = vst.msk [vmem:[#allocation3 + $0x141] sm:$0xff] %vm224_vm0, %v2136_v28  ;;  %v2257_v3 = vld [vmem:[#allocation3 + $0xd9] sm:$0xff]  ;;  %v6349_v22 = vpack.c.bf16 %v2452_v18, %v2451_v46  ;;  %v1786_v49 = vadd.f32 %v6291_v58, %v6050_v40  ;;  %v2391_v44 = vld [vmem:[#allocation3 + $0x122] sm:$0xff]  ;;  %v4733_v40 = vpop.f32.mrb[94].mxu0 }
 0x258   : > { %v6346_v34 = vpack.c.bf16 %v2963_v38, %v2962_v4  ;;  %v2389_v25 = vld [vmem:[#allocation3 + $0x10a] sm:$0xff]  ;;  %3002 = vst.msk [vmem:[#allocation4 + $0x1b0] sm:$0xff] %vm224_vm0, %v6338_v1  ;;  %v6355_v21 = vpack.c.bf16 %v2258_v5, %v2257_v3  ;;  %v2390_v41 = vld [vmem:[#allocation3 + $0x112] sm:$0xff]  ;;  %v2097_v46 = vadd.f32 %v2096_v56, %v6313_v54  ;;  %v2764_v39 = vld [vmem:[#allocation3 + $0xc0] sm:$0xff]  ;;  %v2105_v59 = vadd.f32 %v4732_v30, %v1944_v29  ;;  %v2099_v45 = vpop.f32.mrb[95].mxu0 }
 0x259   : > { %v2571_v33 = vld [vmem:[#allocation3 + $0xa9] sm:$0xff]  ;;  %2235 = vst.msk [vmem:[#allocation4 + $0x1e0] sm:$0xff] %vm224_vm0, %v6343_v43  ;;  %2882 = vrot.lane.b32.xlu0 %v6150_v24, %s4956_s26  ;;  %2234 = vst.msk [vmem:[#allocation4 + $0x1b8] sm:$0xff] %vm224_vm0, %v6349_v22  ;;  %v2410_v58 = vpack.c.bf16 %v2390_v41, %v2389_v25  ;;  %v2572_v19 = vld [vmem:[#allocation3 + $0xb1] sm:$0xff]  ;;  %v1947_v28 = vadd.f32 %v4429_v52, %v1786_v49  ;;  %v2100_v24 = vadd.f32 %v2099_v45, %v6326_v55 }
 0x25a   : > { %v2392_v27 = vld [vmem:[#allocation3 + $0x12a] sm:$0xff]  ;;  %3001 = vst.msk [vmem:[#allocation4 + $0x188] sm:$0xff] %vm224_vm0, %v6346_v34  ;;  %v2597_v37 = vpack.c.bf16 %v2572_v19, %v2571_v33  ;;  %v2573_v63 = vld [vmem:[#allocation3 + $0xc1] sm:$0xff]  ;;  %v2139_v38 = vmax.f32 %v2097_v46, 0.0  ;;  %v2766_v31 = vld [vmem:[#allocation3 + $0xd8] sm:$0xff]  ;;  %v2141_v35 = vmax.f32 %v2105_v59, 0.0 }
 0x25b   : > { %v2411_v5 = vpack.c.bf16 %v2392_v27, %v2391_v44  ;;  %v2765_v0 = vld [vmem:[#allocation3 + $0xc8] sm:$0xff]  ;;  %2321 = vrot.lane.b32.xlu1 %v6355_v21, %s4956_s26  ;;  %2426 = vst.msk [vmem:[#allocation4 + $0x1c0] sm:$0xff] %vm224_vm0, %v2410_v58  ;;  %v2767_v18 = vld [vmem:[#allocation3 + $0xe0] sm:$0xff]  ;;  %v2108_v30 = vadd.f32 %v4733_v40, %v1947_v28  ;;  %v2455_v25 = vld [vmem:[#allocation3 + $0x138] sm:$0xff]  ;;  %v2140_v55 = vmax.f32 %v2100_v24, 0.0 }
 0x25c   : > { %v2790_v54 = vpack.c.bf16 %v2765_v0, %v2764_v39  ;;  %v2574_v4 = vld [vmem:[#allocation3 + $0xc9] sm:$0xff]  ;;  %v2260_v3 = vld [vmem:[#allocation3 + $0xf9] sm:$0xff]  ;;  %2613 = vst.msk [vmem:[#allocation4 + $0x100] sm:$0xff] %vm224_vm0, %v2597_v37  ;;  %v2791_v33 = vpack.c.bf16 %v2767_v18, %v2766_v31  ;;  %2171 = vst.msk [vmem:[#allocation3 + $0x169] sm:$0xff] %vm224_vm0, %v2139_v38 }
 0x25d   : > { %2427 = vst.msk [vmem:[#allocation4 + $0x1e8] sm:$0xff] %vm224_vm0, %v2411_v5  ;;  %v2598_v23 = vpack.c.bf16 %v2574_v4, %v2573_v63  ;;  %v2457_v49 = vld [vmem:[#allocation3 + $0x150] sm:$0xff]  ;;  %v2969_v29 = vld [vmem:[#allocation3 + $0x15a] sm:$0xff]  ;;  %2513 = vrot.lane.b32.xlu0 %v6300_v62, %s4956_s26  ;;  %2173 = vst.msk [vmem:[#allocation3 + $0x181] sm:$0xff] %vm224_vm0, %v2141_v35  ;;  %v2142_v46 = vmax.f32 %v2108_v30, 0.0 }
 0x25e   : > { %2806 = vst.msk [vmem:[#allocation4 + $0x108] sm:$0xff] %vm224_vm0, %v2790_v54  ;;  %v2968_v52 = vld [vmem:[#allocation3 + $0x152] sm:$0xff]  ;;  %v2966_v44 = vld [vmem:[#allocation3 + $0x13a] sm:$0xff]  ;;  %v2967_v27 = vld [vmem:[#allocation3 + $0x142] sm:$0xff] }
 0x25f   : > { %v2458_v56 = vld [vmem:[#allocation3 + $0x158] sm:$0xff]  ;;  %2614 = vst.msk [vmem:[#allocation4 + $0x128] sm:$0xff] %vm224_vm0, %v2598_v23  ;;  %v6377_v41 = vpack.c.bf16 %v2969_v29, %v2968_v52  ;;  %2691 = vrot.lane.b32.xlu1 %v6142_v36, %s4956_s26  ;;  %v2456_v40 = vld [vmem:[#allocation3 + $0x140] sm:$0xff]  ;;  %2807 = vst.msk [vmem:[#allocation4 + $0x130] sm:$0xff] %vm224_vm0, %v2791_v33  ;;  %v6385_v5 = vpack.c.bf16 %v2967_v27, %v2966_v44 }
 0x260   : > { %v6382_v58 = vpack.c.bf16 %v2458_v56, %v2457_v49  ;;  %2172 = vst.msk [vmem:[#allocation3 + $0x171] sm:$0xff] %vm224_vm0, %v2140_v55  ;;  %v2259_v62 = vld [vmem:[#allocation3 + $0xf1] sm:$0xff]  ;;  %v6388_v19 = vpack.c.bf16 %v2456_v40, %v2455_v25  ;;  %v2393_v39 = vld [vmem:[#allocation3 + $0x13a] sm:$0xff]  ;;  %2174 = vst.msk [vmem:[#allocation3 + $0x189] sm:$0xff] %vm224_vm0, %v2142_v46 }
 0x261   : > { %v2575_v0 = vld [vmem:[#allocation3 + $0xd9] sm:$0xff]  ;;  %3004 = vst.msk [vmem:[#allocation4 + $0x200] sm:$0xff] %vm224_vm0, %v6377_v41  ;;  %v6393_v36 = vpack.c.bf16 %v2260_v3, %v2259_v62  ;;  %v2394_v59 = vld [vmem:[#allocation3 + $0x142] sm:$0xff]  ;;  %3003 = vst.msk [vmem:[#allocation4 + $0x1d8] sm:$0xff] %vm224_vm0, %v6385_v5  ;;  %2884 = vrot.lane.b32.xlu0 %v6181_v42, %s4956_s26 }
 0x262   : > { %2237 = vst.msk [vmem:[#allocation4 + $0x230] sm:$0xff] %vm224_vm0, %v6382_v58  ;;  %v2395_v28 = vld [vmem:[#allocation3 + $0x152] sm:$0xff]  ;;  %v2396_v45 = vld [vmem:[#allocation3 + $0x15a] sm:$0xff]  ;;  %2236 = vst.msk [vmem:[#allocation4 + $0x208] sm:$0xff] %vm224_vm0, %v6388_v19  ;;  %v2412_v37 = vpack.c.bf16 %v2394_v59, %v2393_v39 }
 0x263   : > { %v2413_v54 = vpack.c.bf16 %v2396_v45, %v2395_v28  ;;  %v2576_v63 = vld [vmem:[#allocation3 + $0xe1] sm:$0xff]  ;;  %v2768_v4 = vld [vmem:[#allocation3 + $0xf0] sm:$0xff]  ;;  %v2769_v38 = vld [vmem:[#allocation3 + $0xf8] sm:$0xff]  ;;  %2323 = vrot.lane.b32.xlu1 %v6393_v36, %s4956_s26 }
 0x264   : > { %v2599_v24 = vpack.c.bf16 %v2576_v63, %v2575_v0  ;;  %v2792_v23 = vpack.c.bf16 %v2769_v38, %v2768_v4  ;;  %v2577_v31 = vld [vmem:[#allocation3 + $0xf1] sm:$0xff]  ;;  %v2578_v18 = vld [vmem:[#allocation3 + $0xf9] sm:$0xff]  ;;  %v2770_v35 = vld [vmem:[#allocation3 + $0x108] sm:$0xff]  ;;  %2428 = vst.msk [vmem:[#allocation4 + $0x210] sm:$0xff] %vm224_vm0, %v2412_v37 }
 0x265   : > { %2429 = vst.msk [vmem:[#allocation4 + $0x238] sm:$0xff] %vm224_vm0, %v2413_v54  ;;  %v2600_v42 = vpack.c.bf16 %v2578_v18, %v2577_v31  ;;  %v2771_v30 = vld [vmem:[#allocation3 + $0x110] sm:$0xff]  ;;  %2515 = vrot.lane.b32.xlu0 %v6349_v22, %s4956_s26  ;;  %v2205_v62 = vld [vmem:[#allocation3 + $0x168] sm:$0xff]  ;;  %v2772_v0 = vld [vmem:[#allocation3 + $0x120] sm:$0xff] }
 0x266   : > { %v2579_v3 = vld [vmem:[#allocation3 + $0x109] sm:$0xff]  ;;  %v2580_v25 = vld [vmem:[#allocation3 + $0x111] sm:$0xff]  ;;  %2615 = vst.msk [vmem:[#allocation4 + $0x150] sm:$0xff] %vm224_vm0, %v2599_v24  ;;  %2808 = vst.msk [vmem:[#allocation4 + $0x158] sm:$0xff] %vm224_vm0, %v2792_v23  ;;  %v2793_v49 = vpack.c.bf16 %v2771_v30, %v2770_v35 }
 0x267   : > { %v2601_v33 = vpack.c.bf16 %v2580_v25, %v2579_v3  ;;  %v2262_v52 = vld [vmem:[#allocation3 + $0x111] sm:$0xff]  ;;  %2616 = vst.msk [vmem:[#allocation4 + $0x178] sm:$0xff] %vm224_vm0, %v2600_v42  ;;  %2693 = vrot.lane.b32.xlu1 %v6137_v26, %s4956_s26  ;;  %v2972_v56 = vld [vmem:[#allocation3 + $0x182] sm:$0xff] }
 0x268   : > { %v2970_v29 = vld [vmem:[#allocation3 + $0x16a] sm:$0xff]  ;;  %v2971_v55 = vld [vmem:[#allocation3 + $0x172] sm:$0xff]  ;;  %2809 = vst.msk [vmem:[#allocation4 + $0x180] sm:$0xff] %vm224_vm0, %v2793_v49  ;;  %v2581_v63 = vld [vmem:[#allocation3 + $0x121] sm:$0xff] }
 0x269   : > { %2617 = vst.msk [vmem:[#allocation4 + $0x1a0] sm:$0xff] %vm224_vm0, %v2601_v33  ;;  %v2973_v44 = vld [vmem:[#allocation3 + $0x18a] sm:$0xff]  ;;  %v6416_v27 = vpack.c.bf16 %v2971_v55, %v2970_v29  ;;  %2886 = vrot.lane.b32.xlu0 %v6203_v48, %s4956_s26  ;;  %v2398_v28 = vld [vmem:[#allocation3 + $0x172] sm:$0xff]  ;;  %v2775_v23 = vld [vmem:[#allocation3 + $0x140] sm:$0xff] }
 0x26a   : > { %v2261_v46 = vld [vmem:[#allocation3 + $0x109] sm:$0xff]  ;;  %v6418_v40 = vpack.c.bf16 %v2973_v44, %v2972_v56  ;;  %v2774_v38 = vld [vmem:[#allocation3 + $0x138] sm:$0xff]  ;;  %v2584_v31 = vld [vmem:[#allocation3 + $0x141] sm:$0xff] }
 0x26b   : > { %v6420_v22 = vpack.c.bf16 %v2262_v52, %v2261_v46  ;;  %v2206_v39 = vld [vmem:[#allocation3 + $0x170] sm:$0xff]  ;;  %3005 = vst.msk [vmem:[#allocation4 + $0x228] sm:$0xff] %vm224_vm0, %v6416_v27  ;;  %v2773_v45 = vld [vmem:[#allocation3 + $0x128] sm:$0xff]  ;;  %v2583_v48 = vld [vmem:[#allocation3 + $0x139] sm:$0xff]  ;;  %v2795_v35 = vpack.c.bf16 %v2775_v23, %v2774_v38 }
 0x26c   : > { %v2222_v26 = vpack.c.bf16 %v2206_v39, %v2205_v62  ;;  %v2397_v59 = vld [vmem:[#allocation3 + $0x16a] sm:$0xff]  ;;  %3006 = vst.msk [vmem:[#allocation4 + $0x250] sm:$0xff] %vm224_vm0, %v6418_v40  ;;  %v2794_v54 = vpack.c.bf16 %v2773_v45, %v2772_v0  ;;  %v2603_v42 = vpack.c.bf16 %v2584_v31, %v2583_v48  ;;  %v2777_v3 = vld [vmem:[#allocation3 + $0x158] sm:$0xff]  ;;  %v2780_v56 = vld [vmem:[#allocation3 + $0x180] sm:$0xff] }
 0x26d   : > { %2325 = vrot.lane.b32.xlu1 %v6420_v22, %s4956_s26  ;;  %v2414_v37 = vpack.c.bf16 %v2398_v28, %v2397_v59  ;;  %v2582_v4 = vld [vmem:[#allocation3 + $0x129] sm:$0xff]  ;;  %2517 = vrot.lane.b32.xlu0 %v6343_v43, %s4956_s26  ;;  %v2585_v49 = vld [vmem:[#allocation3 + $0x151] sm:$0xff]  ;;  %v2586_v33 = vld [vmem:[#allocation3 + $0x159] sm:$0xff]  ;;  %2811 = vst.msk [vmem:[#allocation4 + $0x1d0] sm:$0xff] %vm224_vm0, %v2795_v35 }
 0x26e   : > { %2238 = vst.msk [vmem:[#allocation4 + $0x258] sm:$0xff] %vm224_vm0, %v2222_v26  ;;  %v2602_v24 = vpack.c.bf16 %v2582_v4, %v2581_v63  ;;  %2813 = vst.msk [vmem:[#allocation4 + $0x220] sm:$0xff] %vm224_vm0, %v2222_v26  ;;  %v2264_v18 = vld [vmem:[#allocation3 + $0x129] sm:$0xff]  ;;  %v2604_v29 = vpack.c.bf16 %v2586_v33, %v2585_v49  ;;  %v2588_v55 = vld [vmem:[#allocation3 + $0x171] sm:$0xff] }
 0x26f   : > { %2430 = vst.msk [vmem:[#allocation4 + $0x260] sm:$0xff] %vm224_vm0, %v2414_v37  ;;  %2810 = vst.msk [vmem:[#allocation4 + $0x1a8] sm:$0xff] %vm224_vm0, %v2794_v54  ;;  %v2776_v30 = vld [vmem:[#allocation3 + $0x150] sm:$0xff]  ;;  %v2781_v44 = vld [vmem:[#allocation3 + $0x188] sm:$0xff] }
 0x270   : > { %2618 = vst.msk [vmem:[#allocation4 + $0x1c8] sm:$0xff] %vm224_vm0, %v2602_v24  ;;  %v2796_v25 = vpack.c.bf16 %v2777_v3, %v2776_v30  ;;  %v2587_v52 = vld [vmem:[#allocation3 + $0x169] sm:$0xff]  ;;  %2619 = vst.msk [vmem:[#allocation4 + $0x1f0] sm:$0xff] %vm224_vm0, %v2603_v42  ;;  %v2263_v46 = vld [vmem:[#allocation3 + $0x121] sm:$0xff]  ;;  %v2798_v62 = vpack.c.bf16 %v2781_v44, %v2780_v56 }
 0x271   : > { %2695 = vrot.lane.b32.xlu1 %v6194_v57, %s4956_s26  ;;  %v2605_v43 = vpack.c.bf16 %v2588_v55, %v2587_v52  ;;  %v2589_v39 = vld [vmem:[#allocation3 + $0x181] sm:$0xff]  ;;  %v2590_v0 = vld [vmem:[#allocation3 + $0x189] sm:$0xff]  ;;  %v2283_v26 = vpack.c.bf16 %v2264_v18, %v2263_v46  ;;  %2620 = vst.msk [vmem:[#allocation4 + $0x218] sm:$0xff] %vm224_vm0, %v2604_v29  ;;  %2888 = vrot.lane.b32.xlu0 %v6234_v50, %s4956_s26  ;;  %v2265_v28 = vld [vmem:[#allocation3 + $0x139] sm:$0xff] }
 0x272   : > { %2812 = vst.msk [vmem:[#allocation4 + $0x1f8] sm:$0xff] %vm224_vm0, %v2796_v25  ;;  %v2606_v59 = vpack.c.bf16 %v2590_v0, %v2589_v39  ;;  %2814 = vst.msk [vmem:[#allocation4 + $0x248] sm:$0xff] %vm224_vm0, %v2798_v62  ;;  %v2266_v57 = vld [vmem:[#allocation3 + $0x141] sm:$0xff]  ;;  %v2268_v50 = vld [vmem:[#allocation3 + $0x159] sm:$0xff] }
 0x273   : > { %2621 = vst.msk [vmem:[#allocation4 + $0x240] sm:$0xff] %vm224_vm0, %v2605_v43  ;;  %v2284_v45 = vpack.c.bf16 %v2266_v57, %v2265_v28  ;;  %v2267_v37 = vld [vmem:[#allocation3 + $0x151] sm:$0xff]  ;;  %v2462_v38 = vld [vmem:[#allocation3 + $0x188] sm:$0xff]  ;;  %v4887_v42 = vld [vmem:[%s6949_s3 + $0x110] sm:$0xff]  }
 0x274   : > { %2622 = vst.msk [vmem:[#allocation4 + $0x268] sm:$0xff] %vm224_vm0, %v2606_v59  ;;  %v2460_v54 = vld [vmem:[#allocation3 + $0x170] sm:$0xff]  ;;  %v4888_v25 = vld [vmem:[%s6949_s3 + $0x118] sm:$0xff]   ;;  %v2782_v29 = vld [vmem:[#allocation3 + $0x198] sm:$0xff] }
 0x275   : > { %2327 = vrot.lane.b32.xlu1 %v2283_v26, %s4956_s26  ;;  %2519 = vrot.lane.b32.xlu0 %v6388_v19, %s4956_s26  ;;  %v2285_v19 = vpack.c.bf16 %v2268_v50, %v2267_v37  ;;  %v3008_v24 = vld [vmem:[#allocation4] sm:$0xff]  ;;  %v2783_v55 = vld [vmem:[#allocation3 + $0x1a0] sm:$0xff] }
 0x276   : > { %v2799_v44 = vpack.c.bf16 %v2783_v55, %v2782_v29 }
 0x278   : > { %2815 = vst.msk [vmem:[#allocation4 + $0x270] sm:$0xff] %vm224_vm0, %v2799_v44 }
 0x279   : > { %2697 = vrot.lane.b32.xlu1 %v6186_v60, %s4956_s26  ;;  %2890 = vrot.lane.b32.xlu0 %v6255_v61, %s4956_s26  ;;  %v2459_v60 = vld [vmem:[#allocation3 + $0x168] sm:$0xff]  ;;  %v2270_v61 = vld [vmem:[#allocation3 + $0x171] sm:$0xff] }
 0x27a   : > { %v2477_v63 = vpack.c.bf16 %v2460_v54, %v2459_v60 }
 0x27d   : > { %2329 = vrot.lane.b32.xlu1 %v2284_v45, %s4956_s26  ;;  %2521 = vrot.lane.b32.xlu0 %v6382_v58, %s4956_s26  ;;  %v2269_v58 = vld [vmem:[#allocation3 + $0x169] sm:$0xff] }
 0x27e   : > { %v2286_v4 = vpack.c.bf16 %v2270_v61, %v2269_v58 }
 0x281   : > { %2699 = vrot.lane.b32.xlu1 %v6248_v47, %s4956_s26  ;;  %2892 = vrot.lane.b32.xlu0 %v6311_v53, %s4956_s26  ;;  %v2461_v47 = vld [vmem:[#allocation3 + $0x180] sm:$0xff] }
 0x282   : > { %v2478_v53 = vpack.c.bf16 %v2462_v38, %v2461_v47 }
 0x285   : > { %2331 = vrot.lane.b32.xlu1 %v2285_v19, %s4956_s26  ;;  %2523 = vrot.lane.b32.xlu0 %v2477_v63, %s4956_s26 }
 0x289   : > { %2701 = vrot.lane.b32.xlu1 %v6241_v51, %s4956_s26  ;;  %2894 = vrot.lane.b32.xlu0 %v6355_v21, %s4956_s26  ;;  %v2847_v21 = vld [vmem:[#allocation3 + $0x1a1] sm:$0xff] }
 0x28d   : > { %2333 = vrot.lane.b32.xlu1 %v2286_v4, %s4956_s26  ;;  %2525 = vrot.lane.b32.xlu0 %v2478_v53, %s4956_s26 }
 0x291   : > { %2703 = vrot.lane.b32.xlu1 %v6304_v32, %s4956_s26  ;;  %2896 = vrot.lane.b32.xlu0 %v6393_v36, %s4956_s26  ;;  %v2845_v32 = vld [vmem:[#allocation3 + $0x189] sm:$0xff] }
 0x295   : > { %2705 = vrot.lane.b32.xlu1 %v6295_v2, %s4956_s26  ;;  %2898 = vrot.lane.b32.xlu0 %v6420_v22, %s4956_s26 }
 0x299   : > { %2707 = vrot.lane.b32.xlu1 %v6346_v34, %s4956_s26  ;;  %2900 = vrot.lane.b32.xlu0 %v2283_v26, %s4956_s26  ;;  %v2846_v34 = vld [vmem:[#allocation3 + $0x199] sm:$0xff] }
 0x29d   : > { %2709 = vrot.lane.b32.xlu1 %v6338_v1, %s4956_s26  ;;  %2902 = vrot.lane.b32.xlu0 %v2284_v45, %s4956_s26  ;;  %v2496_v51 = vpop.permute.xlu0 %2495  ;;  %v2844_v1 = vld [vmem:[#allocation3 + $0x181] sm:$0xff] }
 0x29e   : > { %v2306_v2 = vpop.permute.xlu1 %2305  ;;  %2543 = vst.msk [vmem:[#allocation4 + $0x8] sm:$0xff] %vm547_vm3, %v2496_v51  ;;  %v2862_v22 = vpack.c.bf16 %v2845_v32, %v2844_v1 }
 0x29f   : > { %2352 = vst.msk [vmem:[#allocation4 + $0x28] sm:$0xff] %vm547_vm3, %v2306_v2 }
 0x2a1   : > { %2711 = vrot.lane.b32.xlu1 %v6385_v5, %s4956_s26  ;;  %2904 = vrot.lane.b32.xlu0 %v2285_v19, %s4956_s26  ;;  %v2498_v5 = vpop.permute.xlu0 %2497 }
 0x2a2   : > { %v2308_v36 = vpop.permute.xlu1 %2307  ;;  %2544 = vst.msk [vmem:[#allocation4 + $0x30] sm:$0xff] %vm547_vm3, %v2498_v5 }
 0x2a3   : > { %2353 = vst.msk [vmem:[#allocation4 + $0x50] sm:$0xff] %vm547_vm3, %v2308_v36 }
 0x2a5   : > { %2713 = vrot.lane.b32.xlu1 %v6377_v41, %s4956_s26  ;;  %2906 = vrot.lane.b32.xlu0 %v2286_v4, %s4956_s26  ;;  %v2863_v41 = vpack.c.bf16 %v2847_v21, %v2846_v34  ;;  %v3009_v48 = vld [vmem:[#allocation4 + $0x8] sm:$0xff] }
 0x2a6   : > { %3463 = vmatprep.mubr.bf16.mxu1 %v3009_v48  ;;  %v3013_v33 = vld [vmem:[#allocation4 + $0x28] sm:$0xff] }
 0x2a7   : > { %3464 = vmatmul.mubr.bf16.vlgmr.msra.gmra.mrb[64].mxu1 %v3008_v24 }
 0x2a8   : > { %v2500_v23 = vpop.permute.xlu0 %2499 }
 0x2a9   : > { %2715 = vrot.lane.b32.xlu1 %v6416_v27, %s4956_s26  ;;  %2908 = vrot.lane.b32.xlu0 %v2862_v22, %s4956_s26  ;;  %v4886_v27 = vld [vmem:[%s6949_s3 + $0x108] sm:$0xff]   ;;  %2545 = vst.msk [vmem:[#allocation4 + $0x58] sm:$0xff] %vm547_vm3, %v2500_v23  ;;  %v2310_v31 = vpop.permute.xlu1 %2309  ;;  %v3014_v35 = vld [vmem:[#allocation4 + $0x30] sm:$0xff] }
 0x2aa   : > { %2354 = vst.msk [vmem:[#allocation4 + $0x78] sm:$0xff] %vm547_vm3, %v2310_v31  ;;  %3471 = vmatprep.mubr.bf16.mxu1 %v3014_v35  ;;  %v3018_v39 = vld [vmem:[#allocation4 + $0x50] sm:$0xff] }
 0x2ac   : > { %v2502_v18 = vpop.permute.xlu0 %2501 }
 0x2ad   : > { %2717 = vrot.lane.b32.xlu1 %v6418_v40, %s4956_s26  ;;  %2910 = vrot.lane.b32.xlu0 %v2863_v41, %s4956_s26  ;;  %v4890_v40 = vld [vmem:[%s6949_s3 + $0x100] sm:$0xff]   ;;  %2546 = vst.msk [vmem:[#allocation4 + $0x80] sm:$0xff] %vm547_vm3, %v2502_v18  ;;  %v2312_v30 = vpop.permute.xlu1 %2311 }
 0x2ae   : > { %4735 = vmatpush3.bf16.msra.mxu1 %v4890_v40  ;;  %2355 = vst.msk [vmem:[#allocation4 + $0xa0] sm:$0xff] %vm547_vm3, %v2312_v30 }
 0x2af   : > { %4736 = vmatprep.subr.bf16.mxu1 %v4886_v27  ;;  %3472 = vmatmul.mubr.bf16.gmra.mrb[68].mxu1 %v3013_v33 }
 0x2b0   : > { %v3019_v52 = vld [vmem:[#allocation4 + $0x58] sm:$0xff] }
 0x2b1   : > { %3479 = vmatprep.mubr.bf16.mxu1 %v3019_v52  ;;  %v3023_v45 = vld [vmem:[#allocation4 + $0x78] sm:$0xff] }
 0x2b2   : > { %4737 = vmatpush3.bf16.msra.mxu1 %v4886_v27  ;;  %v2504_v3 = vpop.permute.xlu0 %2503 }
 0x2b3   : > { %4738 = vmatprep.subr.bf16.mxu1 %v4887_v42  ;;  %2547 = vst.msk [vmem:[#allocation4 + $0xa8] sm:$0xff] %vm547_vm3, %v2504_v3  ;;  %v2314_v49 = vpop.permute.xlu1 %2313 }
 0x2b4   : > { %2356 = vst.msk [vmem:[#allocation4 + $0xc8] sm:$0xff] %vm547_vm3, %v2314_v49  ;;  %v3024_v0 = vld [vmem:[#allocation4 + $0x80] sm:$0xff] }
 0x2b5   : > { %v3028_v61 = vld [vmem:[#allocation4 + $0xa0] sm:$0xff] }
 0x2b6   : > { %4739 = vmatpush3.bf16.msra.mxu1 %v4887_v42  ;;  %v2506_v56 = vpop.permute.xlu0 %2505 }
 0x2b7   : > { %4740 = vmatprep.subr.bf16.mxu1 %v4888_v25  ;;  %2548 = vst.msk [vmem:[#allocation4 + $0xd0] sm:$0xff] %vm547_vm3, %v2506_v56  ;;  %v2316_v46 = vpop.permute.xlu1 %2315  ;;  %3480 = vmatmul.mubr.bf16.gmra.mrb[72].mxu1 %v3018_v39 }
 0x2b8   : > { %2357 = vst.msk [vmem:[#allocation4 + $0xf0] sm:$0xff] %vm547_vm3, %v2316_v46  ;;  %3487 = vmatprep.mubr.bf16.mxu1 %v3024_v0 }
 0x2ba   : > { %4741 = vmatpush3.bf16.msra.mxu1 %v4888_v25  ;;  %v3029_v50 = vld [vmem:[#allocation4 + $0xa8] sm:$0xff] }
 0x2bb   : > { %v2508_v43 = vpop.permute.xlu0 %2507  ;;  %v3033_v32 = vld [vmem:[#allocation4 + $0xc8] sm:$0xff] }
 0x2bc   : > { %2549 = vst.msk [vmem:[#allocation4 + $0xf8] sm:$0xff] %vm547_vm3, %v2508_v43  ;;  %v2318_v62 = vpop.permute.xlu1 %2317 }
 0x2bd   : > { %2358 = vst.msk [vmem:[#allocation4 + $0x118] sm:$0xff] %vm547_vm3, %v2318_v62 }
 0x2be   : > { %v3034_v4 = vld [vmem:[#allocation4 + $0xd0] sm:$0xff] }
 0x2bf   : > { %v2510_v26 = vpop.permute.xlu0 %2509  ;;  %3488 = vmatmul.mubr.bf16.gmra.mrb[76].mxu1 %v3023_v45  ;;  %v3038_v24 = vld [vmem:[#allocation4 + $0xf0] sm:$0xff] }
 0x2c0   : > { %2550 = vst.msk [vmem:[#allocation4 + $0x120] sm:$0xff] %vm547_vm3, %v2510_v26  ;;  %v2688_v59 = vpop.permute.xlu1 %2687  ;;  %3495 = vmatprep.mubr.bf16.mxu1 %v3029_v50 }
 0x2c1   : > { %2735 = vst.msk [vmem:[#allocation4 + $0x10] sm:$0xff] %vm547_vm3, %v2688_v59 }
 0x2c3   : > { %v2881_v57 = vpop.permute.xlu0 %2880  ;;  %v3039_v34 = vld [vmem:[#allocation4 + $0xf8] sm:$0xff] }
 0x2c4   : > { %2928 = vst.msk [vmem:[#allocation4 + $0x18] sm:$0xff] %vm547_vm3, %v2881_v57  ;;  %v3043_v42 = vld [vmem:[#allocation4 + $0x118] sm:$0xff] }
 0x2c5   : > { %v2320_v28 = vpop.permute.xlu1 %2319 }
 0x2c6   : > { %2359 = vst.msk [vmem:[#allocation4 + $0x140] sm:$0xff] %vm547_vm3, %v2320_v28 }
 0x2c7   : > { %v2512_v37 = vpop.permute.xlu0 %2511  ;;  %3496 = vmatmul.mubr.bf16.gmra.mrb[80].mxu1 %v3028_v61  ;;  %v3044_v48 = vld [vmem:[#allocation4 + $0x120] sm:$0xff] }
 0x2c8   : > { %2551 = vst.msk [vmem:[#allocation4 + $0x148] sm:$0xff] %vm547_vm3, %v2512_v37  ;;  %v3010_v58 = vld [vmem:[#allocation4 + $0x10] sm:$0xff]  ;;  %3503 = vmatprep.mubr.bf16.mxu1 %v3034_v4 }
 0x2c9   : > { %v2690_v19 = vpop.permute.xlu1 %2689 }
 0x2ca   : > { %2736 = vst.msk [vmem:[#allocation4 + $0x38] sm:$0xff] %vm547_vm3, %v2690_v19 }
 0x2cb   : > { %v2883_v54 = vpop.permute.xlu0 %2882  ;;  %v3011_v60 = vld [vmem:[#allocation4 + $0x18] sm:$0xff] }
 0x2cc   : > { %2929 = vst.msk [vmem:[#allocation4 + $0x40] sm:$0xff] %vm547_vm3, %v2883_v54  ;;  %3624 = vmatprep.mubr.bf16.mxu0 %v3011_v60 }
 0x2cd   : > { %v2322_v63 = vpop.permute.xlu1 %2321  ;;  %3625 = vmatmul.mubr.bf16.vlgmr.msra.gmra.mrb[96].mxu0 %v3010_v58  ;;  %v3048_v55 = vld [vmem:[#allocation4 + $0x140] sm:$0xff] }
 0x2ce   : > { %2360 = vst.msk [vmem:[#allocation4 + $0x168] sm:$0xff] %vm547_vm3, %v2322_v63 }
 0x2cf   : > { %v2514_v38 = vpop.permute.xlu0 %2513  ;;  %3504 = vmatmul.mubr.bf16.gmra.mrb[84].mxu1 %v3033_v32  ;;  %v3049_v3 = vld [vmem:[#allocation4 + $0x148] sm:$0xff] }
 0x2d0   : > { %2552 = vst.msk [vmem:[#allocation4 + $0x170] sm:$0xff] %vm547_vm3, %v2514_v38  ;;  %3511 = vmatprep.mubr.bf16.mxu1 %v3039_v34 }
 0x2d1   : > { %v2692_v47 = vpop.permute.xlu1 %2691  ;;  %v3015_v1 = vld [vmem:[#allocation4 + $0x38] sm:$0xff] }
 0x2d2   : > { %2737 = vst.msk [vmem:[#allocation4 + $0x60] sm:$0xff] %vm547_vm3, %v2692_v47 }
 0x2d3   : > { %v2885_v53 = vpop.permute.xlu0 %2884  ;;  %v3016_v51 = vld [vmem:[#allocation4 + $0x40] sm:$0xff] }
 0x2d4   : > { %2930 = vst.msk [vmem:[#allocation4 + $0x68] sm:$0xff] %vm547_vm3, %v2885_v53  ;;  %3632 = vmatprep.mubr.bf16.mxu0 %v3016_v51 }
 0x2d5   : > { %v2324_v2 = vpop.permute.xlu1 %2323  ;;  %3633 = vmatmul.mubr.bf16.gmra.mrb[100].mxu0 %v3015_v1  ;;  %v3053_v26 = vld [vmem:[#allocation4 + $0x168] sm:$0xff] }
 0x2d6   : > { %2361 = vst.msk [vmem:[#allocation4 + $0x190] sm:$0xff] %vm547_vm3, %v2324_v2 }
 0x2d7   : > { %v2516_v21 = vpop.permute.xlu0 %2515  ;;  %3512 = vmatmul.mubr.bf16.gmra.mrb[88].mxu1 %v3038_v24  ;;  %v3054_v44 = vld [vmem:[#allocation4 + $0x170] sm:$0xff] }
 0x2d8   : > { %2553 = vst.msk [vmem:[#allocation4 + $0x198] sm:$0xff] %vm547_vm3, %v2516_v21  ;;  %3519 = vmatprep.mubr.bf16.mxu1 %v3044_v48 }
 0x2d9   : > { %v2694_v5 = vpop.permute.xlu1 %2693  ;;  %v3020_v23 = vld [vmem:[#allocation4 + $0x60] sm:$0xff] }
 0x2da   : > { %2738 = vst.msk [vmem:[#allocation4 + $0x88] sm:$0xff] %vm547_vm3, %v2694_v5 }
 0x2db   : > { %v2887_v36 = vpop.permute.xlu0 %2886  ;;  %v3021_v22 = vld [vmem:[#allocation4 + $0x68] sm:$0xff] }
 0x2dc   : > { %2931 = vst.msk [vmem:[#allocation4 + $0x90] sm:$0xff] %vm547_vm3, %v2887_v36  ;;  %3640 = vmatprep.mubr.bf16.mxu0 %v3021_v22 }
 0x2dd   : > { %3641 = vmatmul.mubr.bf16.gmra.mrb[104].mxu0 %v3020_v23  ;;  %v3058_v54 = vld [vmem:[#allocation4 + $0x190] sm:$0xff] }
 0x2df   : > { %v2326_v41 = vpop.permute.xlu1 %2325  ;;  %v2518_v27 = vpop.permute.xlu0 %2517  ;;  %3520 = vmatmul.mubr.bf16.gmra.mrb[92].mxu1 %v3043_v42  ;;  %v3059_v57 = vld [vmem:[#allocation4 + $0x198] sm:$0xff] }
 0x2e0   : > { %2362 = vst.msk [vmem:[#allocation4 + $0x1b8] sm:$0xff] %vm547_vm3, %v2326_v41  ;;  %2554 = vst.msk [vmem:[#allocation4 + $0x1c0] sm:$0xff] %vm547_vm3, %v2518_v27  ;;  %3527 = vmatprep.mubr.bf16.mxu1 %v3049_v3 }
 0x2e1   : > { %v3025_v30 = vld [vmem:[#allocation4 + $0x88] sm:$0xff] }
 0x2e3   : > { %v2696_v31 = vpop.permute.xlu1 %2695  ;;  %v2889_v40 = vpop.permute.xlu0 %2888  ;;  %v3026_v18 = vld [vmem:[#allocation4 + $0x90] sm:$0xff] }
 0x2e4   : > { %2739 = vst.msk [vmem:[#allocation4 + $0xb0] sm:$0xff] %vm547_vm3, %v2696_v31  ;;  %2932 = vst.msk [vmem:[#allocation4 + $0xb8] sm:$0xff] %vm547_vm3, %v2889_v40  ;;  %3648 = vmatprep.mubr.bf16.mxu0 %v3026_v18 }
 0x2e5   : > { %3649 = vmatmul.mubr.bf16.gmra.mrb[108].mxu0 %v3025_v30 }
 0x2e7   : > { %v2328_v35 = vpop.permute.xlu1 %2327  ;;  %v2520_v25 = vpop.permute.xlu0 %2519  ;;  %3528 = vmatmul.mubr.bf16.gmra.mrb[96].mxu1 %v3048_v55  ;;  %v3064_v63 = vld [vmem:[#allocation4 + $0x1c0] sm:$0xff]  ;;  %v3063_v53 = vld [vmem:[#allocation4 + $0x1b8] sm:$0xff] }
 0x2e8   : > { %2363 = vst.msk [vmem:[#allocation4 + $0x1e0] sm:$0xff] %vm547_vm3, %v2328_v35  ;;  %2555 = vst.msk [vmem:[#allocation4 + $0x1e8] sm:$0xff] %vm547_vm3, %v2520_v25  ;;  %3535 = vmatprep.mubr.bf16.mxu1 %v3054_v44 }
 0x2eb   : > { %v2698_v49 = vpop.permute.xlu1 %2697  ;;  %v2891_v33 = vpop.permute.xlu0 %2890  ;;  %v3031_v52 = vld [vmem:[#allocation4 + $0xb8] sm:$0xff]  ;;  %v3030_v56 = vld [vmem:[#allocation4 + $0xb0] sm:$0xff] }
 0x2ec   : > { %2740 = vst.msk [vmem:[#allocation4 + $0xd8] sm:$0xff] %vm547_vm3, %v2698_v49  ;;  %2933 = vst.msk [vmem:[#allocation4 + $0xe0] sm:$0xff] %vm547_vm3, %v2891_v33  ;;  %3656 = vmatprep.mubr.bf16.mxu0 %v3031_v52 }
 0x2ed   : > { %3657 = vmatmul.mubr.bf16.gmra.mrb[112].mxu0 %v3030_v56 }
 0x2ef   : > { %v2330_v29 = vpop.permute.xlu1 %2329  ;;  %v2522_v46 = vpop.permute.xlu0 %2521  ;;  %3536 = vmatmul.mubr.bf16.gmra.mrb[100].mxu1 %v3053_v26  ;;  %v3069_v2 = vld [vmem:[#allocation4 + $0x1e8] sm:$0xff]  ;;  %v3068_v36 = vld [vmem:[#allocation4 + $0x1e0] sm:$0xff] }
 0x2f0   : > { %2364 = vst.msk [vmem:[#allocation4 + $0x208] sm:$0xff] %vm547_vm3, %v2330_v29  ;;  %2556 = vst.msk [vmem:[#allocation4 + $0x210] sm:$0xff] %vm547_vm3, %v2522_v46  ;;  %3543 = vmatprep.mubr.bf16.mxu1 %v3059_v57 }
 0x2f3   : > { %v2700_v43 = vpop.permute.xlu1 %2699  ;;  %v2893_v62 = vpop.permute.xlu0 %2892  ;;  %v3036_v39 = vld [vmem:[#allocation4 + $0xe0] sm:$0xff]  ;;  %v3035_v59 = vld [vmem:[#allocation4 + $0xd8] sm:$0xff] }
 0x2f4   : > { %2741 = vst.msk [vmem:[#allocation4 + $0x100] sm:$0xff] %vm547_vm3, %v2700_v43  ;;  %2934 = vst.msk [vmem:[#allocation4 + $0x108] sm:$0xff] %vm547_vm3, %v2893_v62  ;;  %3664 = vmatprep.mubr.bf16.mxu0 %v3036_v39  ;;  %v3012_v62 = vld [vmem:[#allocation4 + $0x20] sm:$0xff] }
 0x2f5   : > { %3665 = vmatmul.mubr.bf16.gmra.mrb[116].mxu0 %v3035_v59  ;;  %v3022_v59 = vld [vmem:[#allocation4 + $0x70] sm:$0xff] }
 0x2f7   : > { %v2332_v0 = vpop.permute.xlu1 %2331  ;;  %v2524_v28 = vpop.permute.xlu0 %2523  ;;  %3544 = vmatmul.mubr.bf16.gmra.mrb[104].mxu1 %v3058_v54  ;;  %v3074_v41 = vld [vmem:[#allocation4 + $0x210] sm:$0xff]  ;;  %v3073_v40 = vld [vmem:[#allocation4 + $0x208] sm:$0xff] }
 0x2f8   : > { %2365 = vst.msk [vmem:[#allocation4 + $0x230] sm:$0xff] %vm547_vm3, %v2332_v0  ;;  %2557 = vst.msk [vmem:[#allocation4 + $0x238] sm:$0xff] %vm547_vm3, %v2524_v28  ;;  %3551 = vmatprep.mubr.bf16.mxu1 %v3064_v63  ;;  %v3017_v0 = vld [vmem:[#allocation4 + $0x48] sm:$0xff]  ;;  %v3027_v28 = vld [vmem:[#allocation4 + $0x98] sm:$0xff] }
 0x2f9   : > { %v3037_v54 = vld [vmem:[#allocation4 + $0xe8] sm:$0xff] }
 0x2fb   : > { %v2702_v45 = vpop.permute.xlu1 %2701  ;;  %v2895_v50 = vpop.permute.xlu0 %2894  ;;  %v3041_v37 = vld [vmem:[#allocation4 + $0x108] sm:$0xff]  ;;  %v3040_v60 = vld [vmem:[#allocation4 + $0x100] sm:$0xff] }
 0x2fc   : > { %2742 = vst.msk [vmem:[#allocation4 + $0x128] sm:$0xff] %vm547_vm3, %v2702_v45  ;;  %2935 = vst.msk [vmem:[#allocation4 + $0x130] sm:$0xff] %vm547_vm3, %v2895_v50  ;;  %3672 = vmatprep.mubr.bf16.mxu0 %v3041_v37  ;;  %v3032_v50 = vld [vmem:[#allocation4 + $0xc0] sm:$0xff] }
 0x2fd   : > { %3673 = vmatmul.mubr.bf16.gmra.mrb[120].mxu0 %v3040_v60  ;;  %v3042_v60 = vld [vmem:[#allocation4 + $0x110] sm:$0xff] }
 0x2ff   : > { %v2334_v19 = vpop.permute.xlu1 %2333  ;;  %v2526_v61 = vpop.permute.xlu0 %2525  ;;  %3552 = vmatmul.mubr.bf16.gmra.mrb[108].mxu1 %v3063_v53  ;;  %v3079_v35 = vld [vmem:[#allocation4 + $0x238] sm:$0xff]  ;;  %v3078_v33 = vld [vmem:[#allocation4 + $0x230] sm:$0xff]  ;;  %v3072_v53 = vld [vmem:[#allocation4 + $0x200] sm:$0xff] }
 0x300   : > { %2366 = vst.msk [vmem:[#allocation4 + $0x258] sm:$0xff] %vm547_vm3, %v2334_v19  ;;  %2558 = vst.msk [vmem:[#allocation4 + $0x260] sm:$0xff] %vm547_vm3, %v2526_v61  ;;  %3559 = vmatprep.mubr.bf16.mxu1 %v3069_v2  ;;  %v3047_v61 = vld [vmem:[#allocation4 + $0x138] sm:$0xff]  ;;  %v3082_v2 = vld [vmem:[#allocation4 + $0x250] sm:$0xff] }
 0x303   : > { %v2704_v58 = vpop.permute.xlu1 %2703  ;;  %v2897_v4 = vpop.permute.xlu0 %2896  ;;  %v3046_v38 = vld [vmem:[#allocation4 + $0x130] sm:$0xff]  ;;  %v3045_v51 = vld [vmem:[#allocation4 + $0x128] sm:$0xff] }
 0x304   : > { %2743 = vst.msk [vmem:[#allocation4 + $0x150] sm:$0xff] %vm547_vm3, %v2704_v58  ;;  %2936 = vst.msk [vmem:[#allocation4 + $0x158] sm:$0xff] %vm547_vm3, %v2897_v4  ;;  %3680 = vmatprep.mubr.bf16.mxu0 %v3046_v38  ;;  %v3052_v58 = vld [vmem:[#allocation4 + $0x160] sm:$0xff]  ;;  %v3057_v4 = vld [vmem:[#allocation4 + $0x188] sm:$0xff] }
 0x305   : > { %3681 = vmatmul.mubr.bf16.gmra.mrb[124].mxu0 %v3045_v51  ;;  %v3062_v38 = vld [vmem:[#allocation4 + $0x1b0] sm:$0xff]  ;;  %v3077_v51 = vld [vmem:[#allocation4 + $0x228] sm:$0xff] }
 0x307   : > { %v2706_v47 = vpop.permute.xlu1 %2705  ;;  %v2899_v32 = vpop.permute.xlu0 %2898  ;;  %3560 = vmatmul.mubr.bf16.gmra.mrb[112].mxu1 %v3068_v36  ;;  %v3084_v29 = vld [vmem:[#allocation4 + $0x260] sm:$0xff]  ;;  %v3083_v44 = vld [vmem:[#allocation4 + $0x258] sm:$0xff] }
 0x308   : > { %2744 = vst.msk [vmem:[#allocation4 + $0x178] sm:$0xff] %vm547_vm3, %v2706_v47  ;;  %2937 = vst.msk [vmem:[#allocation4 + $0x180] sm:$0xff] %vm547_vm3, %v2899_v32  ;;  %3567 = vmatprep.mubr.bf16.mxu1 %v3074_v41  ;;  %v3067_v47 = vld [vmem:[#allocation4 + $0x1d8] sm:$0xff] }
 0x309   : > { %v3087_v32 = vld [vmem:[#allocation4 + $0x278] sm:$0xff] }
 0x30b   : > { %v2708_v1 = vpop.permute.xlu1 %2707  ;;  %v2901_v34 = vpop.permute.xlu0 %2900  ;;  %v3051_v21 = vld [vmem:[#allocation4 + $0x158] sm:$0xff]  ;;  %v3050_v22 = vld [vmem:[#allocation4 + $0x150] sm:$0xff] }
 0x30c   : > { %2745 = vst.msk [vmem:[#allocation4 + $0x1a0] sm:$0xff] %vm547_vm3, %v2708_v1  ;;  %2938 = vst.msk [vmem:[#allocation4 + $0x1a8] sm:$0xff] %vm547_vm3, %v2901_v34  ;;  %3688 = vmatprep.mubr.bf16.mxu0 %v3051_v21 }
 0x30d   : > { %3689 = vmatmul.mubr.bf16.gmra.mrb[128].mxu0 %v3050_v22 }
 0x30f   : > { %v2710_v5 = vpop.permute.xlu1 %2709  ;;  %v2903_v24 = vpop.permute.xlu0 %2902  ;;  %v3056_v23 = vld [vmem:[#allocation4 + $0x180] sm:$0xff]  ;;  %v3055_v18 = vld [vmem:[#allocation4 + $0x178] sm:$0xff]  ;;  %3568 = vmatmul.mubr.bf16.gmra.mrb[116].mxu1 %v3073_v40 }
 0x310   : > { %2746 = vst.msk [vmem:[#allocation4 + $0x1c8] sm:$0xff] %vm547_vm3, %v2710_v5  ;;  %2939 = vst.msk [vmem:[#allocation4 + $0x1d0] sm:$0xff] %vm547_vm3, %v2903_v24  ;;  %3696 = vmatprep.mubr.bf16.mxu0 %v3056_v23  ;;  %3575 = vmatprep.mubr.bf16.mxu1 %v3079_v35 }
 0x313   : > { %v2712_v48 = vpop.permute.xlu1 %2711  ;;  %v2905_v27 = vpop.permute.xlu0 %2904  ;;  %v3061_v42 = vld [vmem:[#allocation4 + $0x1a8] sm:$0xff]  ;;  %v3060_v52 = vld [vmem:[#allocation4 + $0x1a0] sm:$0xff] }
 0x314   : > { %2747 = vst.msk [vmem:[#allocation4 + $0x1f0] sm:$0xff] %vm547_vm3, %v2712_v48  ;;  %2940 = vst.msk [vmem:[#allocation4 + $0x1f8] sm:$0xff] %vm547_vm3, %v2905_v27 }
 0x315   : > { %3697 = vmatmul.mubr.bf16.gmra.mrb[132].mxu0 %v3055_v18 }
 0x316   : > { %3704 = vmatprep.mubr.bf16.mxu0 %v3061_v42 }
 0x317   : > { %v2714_v31 = vpop.permute.xlu1 %2713  ;;  %v2907_v30 = vpop.permute.xlu0 %2906  ;;  %3576 = vmatmul.mubr.bf16.gmra.mrb[120].mxu1 %v3078_v33  ;;  %v3066_v55 = vld [vmem:[#allocation4 + $0x1d0] sm:$0xff]  ;;  %v3065_v46 = vld [vmem:[#allocation4 + $0x1c8] sm:$0xff] }
 0x318   : > { %2748 = vst.msk [vmem:[#allocation4 + $0x218] sm:$0xff] %vm547_vm3, %v2714_v31  ;;  %2941 = vst.msk [vmem:[#allocation4 + $0x220] sm:$0xff] %vm547_vm3, %v2907_v30  ;;  %3583 = vmatprep.mubr.bf16.mxu1 %v3084_v29 }
 0x31b   : > { %v2716_v3 = vpop.permute.xlu1 %2715  ;;  %v2909_v25 = vpop.permute.xlu0 %2908  ;;  %v3071_v43 = vld [vmem:[#allocation4 + $0x1f8] sm:$0xff]  ;;  %v3070_v39 = vld [vmem:[#allocation4 + $0x1f0] sm:$0xff] }
 0x31c   : > { %2749 = vst.msk [vmem:[#allocation4 + $0x240] sm:$0xff] %vm547_vm3, %v2716_v3  ;;  %2942 = vst.msk [vmem:[#allocation4 + $0x248] sm:$0xff] %vm547_vm3, %v2909_v25 }
 0x31d   : > { %3705 = vmatmul.mubr.bf16.gmra.mrb[136].mxu0 %v3060_v52 }
 0x31e   : > { %3712 = vmatprep.mubr.bf16.mxu0 %v3066_v55 }
 0x31f   : > { %v2718_v49 = vpop.permute.xlu1 %2717  ;;  %v2911_v56 = vpop.permute.xlu0 %2910  ;;  %3584 = vmatmul.mubr.bf16.gmra.mrb[124].mxu1 %v3083_v44  ;;  %v3076_v26 = vld [vmem:[#allocation4 + $0x220] sm:$0xff]  ;;  %v3075_v57 = vld [vmem:[#allocation4 + $0x218] sm:$0xff] }
 0x320   : > { %2750 = vst.msk [vmem:[#allocation4 + $0x268] sm:$0xff] %vm547_vm3, %v2718_v49  ;;  %2943 = vst.msk [vmem:[#allocation4 + $0x270] sm:$0xff] %vm547_vm3, %v2911_v56  ;;  %4742 = vmatprep.mubr.msk.bf16.mxu1 %vm224_vm0, %v3012_v62  ;;  %v6591_v56 = vld [vmem:[%s6950_s4] ss:$0 sm:$0xff] }
 0x323   : > { %v3081_v45 = vld [vmem:[#allocation4 + $0x248] sm:$0xff]  ;;  %v3080_v19 = vld [vmem:[#allocation4 + $0x240] sm:$0xff] }
 0x325   : > { %3713 = vmatmul.mubr.bf16.gmra.mrb[140].mxu0 %v3065_v46 }
 0x326   : > { %3720 = vmatprep.mubr.bf16.mxu0 %v3071_v43 }
 0x327   : > { %4743 = vmatmul.mubr.msk.bf16.vlgmr.msra.gmra.mrb[128].mxu1 %vm224_vm0, %v3017_v0  ;;  %v3086_v37 = vld [vmem:[#allocation4 + $0x270] sm:$0xff]  ;;  %v3085_v63 = vld [vmem:[#allocation4 + $0x268] sm:$0xff] }
 0x328   : > { %4746 = vmatprep.mubr.msk.bf16.mxu1 %vm224_vm0, %v3022_v59 }
 0x32d   : > { %3721 = vmatmul.mubr.bf16.gmra.mrb[144].mxu0 %v3070_v39 }
 0x32e   : > { %3728 = vmatprep.mubr.bf16.mxu0 %v3076_v26 }
 0x32f   : > { %4747 = vmatmul.mubr.msk.bf16.gmra.mrb[132].mxu1 %vm224_vm0, %v3027_v28 }
 0x330   : > { %4750 = vmatprep.mubr.msk.bf16.mxu1 %vm224_vm0, %v3032_v50 }
 0x335   : > { %3729 = vmatmul.mubr.bf16.gmra.mrb[148].mxu0 %v3075_v57 }
 0x336   : > { %3736 = vmatprep.mubr.bf16.mxu0 %v3081_v45 }
 0x337   : > { %4751 = vmatmul.mubr.msk.bf16.gmra.mrb[136].mxu1 %vm224_vm0, %v3037_v54 }
 0x338   : > { %4754 = vmatprep.mubr.msk.bf16.mxu1 %vm224_vm0, %v3042_v60 }
 0x33d   : > { %3737 = vmatmul.mubr.bf16.gmra.mrb[152].mxu0 %v3080_v19 }
 0x33e   : > { %3744 = vmatprep.mubr.bf16.mxu0 %v3086_v37 }
 0x33f   : > { %4755 = vmatmul.mubr.msk.bf16.gmra.mrb[140].mxu1 %vm224_vm0, %v3047_v61 }
 0x340   : > { %4758 = vmatprep.mubr.msk.bf16.mxu1 %vm224_vm0, %v3052_v58 }
 0x345   : > { %3745 = vmatmul.mubr.bf16.gmra.mrb[156].mxu0 %v3085_v63 }
 0x347   : > { %4759 = vmatmul.mubr.msk.bf16.gmra.mrb[144].mxu1 %vm224_vm0, %v3057_v4 }
 0x348   : > { %4762 = vmatprep.mubr.msk.bf16.mxu1 %vm224_vm0, %v3062_v38 }
 0x34f   : > { %4763 = vmatmul.mubr.msk.bf16.gmra.mrb[148].mxu1 %vm224_vm0, %v3067_v47 }
 0x350   : > { %4766 = vmatprep.mubr.msk.bf16.mxu1 %vm224_vm0, %v3072_v53 }
 0x357   : > { %4767 = vmatmul.mubr.msk.bf16.gmra.mrb[152].mxu1 %vm224_vm0, %v3077_v51 }
 0x358   : > { %4770 = vmatprep.mubr.msk.bf16.mxu1 %vm224_vm0, %v3082_v2 }
 0x35f   : > { %4771 = vmatmul.mubr.msk.bf16.gmra.mrb[156].mxu1 %vm224_vm0, %v3087_v32 }
 0x37a   : > { %v4466_v1 = vpop.f32.mrb[64].mxu1 }
 0x37b   : > { %v4467_v34 = vpop.f32.mrb[65].mxu1 }
 0x37c   : > { %v4468_v21 = vadd.f32 %v4467_v34, %v4466_v1  ;;  %v4469_v5 = vpop.f32.mrb[66].mxu1 }
 0x37d   : > { %v4470_v36 = vpop.f32.mrb[67].mxu1 }
 0x37e   : > { %v4471_v22 = vadd.f32 %v4470_v36, %v4469_v5  ;;  %v3466_v39 = vadd.f32 %v4468_v21, %v6591_v56 }
 0x380   : > { %v3469_v50 = vadd.f32 %v4471_v22, %v6591_v56 }
 0x382   : > { %v4472_v41 = vpop.f32.mrb[68].mxu1 }
 0x383   : > { %v4473_v24 = vpop.f32.mrb[69].mxu1 }
 0x384   : > { %v4474_v23 = vadd.f32 %v4473_v24, %v4472_v41  ;;  %v4475_v48 = vpop.f32.mrb[70].mxu1 }
 0x385   : > { %v4476_v27 = vpop.f32.mrb[71].mxu1 }
 0x386   : > { %v4477_v31 = vadd.f32 %v4476_v27, %v4475_v48  ;;  %v3474_v38 = vadd.f32 %v4474_v23, %v6591_v56 }
 0x388   : > { %v3477_v34 = vadd.f32 %v4477_v31, %v6591_v56 }
 0x38a   : > { %v4478_v40 = vpop.f32.mrb[72].mxu1 }
 0x38b   : > { %v4479_v18 = vpop.f32.mrb[73].mxu1 }
 0x38c   : > { %v4480_v35 = vadd.f32 %v4479_v18, %v4478_v40  ;;  %v4481_v42 = vpop.f32.mrb[74].mxu1 }
 0x38d   : > { %v4482_v30 = vpop.f32.mrb[75].mxu1 }
 0x38e   : > { %v4483_v3 = vadd.f32 %v4482_v30, %v4481_v42  ;;  %v3482_v27 = vadd.f32 %v4480_v35, %v6591_v56 }
 0x392   : > { %v4484_v25 = vpop.f32.mrb[76].mxu1 }
 0x393   : > { %v4485_v49 = vpop.f32.mrb[77].mxu1 }
 0x394   : > { %v4486_v33 = vadd.f32 %v4485_v49, %v4484_v25  ;;  %v4487_v52 = vpop.f32.mrb[78].mxu1  ;;  %v3485_v49 = vadd.f32 %v4483_v3, %v6591_v56 }
 0x395   : > { %v4488_v29 = vpop.f32.mrb[79].mxu1 }
 0x396   : > { %v4489_v55 = vadd.f32 %v4488_v29, %v4487_v52 }
 0x39a   : > { %v4490_v44 = vpop.f32.mrb[80].mxu1 }
 0x39b   : > { %v4491_v43 = vpop.f32.mrb[81].mxu1 }
 0x39c   : > { %v6594_v0 = vadd.f32 %v4491_v43, %v4490_v44  ;;  %v4493_v59 = vpop.f32.mrb[82].mxu1 }
 0x39d   : > { %v4494_v28 = vpop.f32.mrb[83].mxu1 }
 0x39e   : > { %v6597_v37 = vadd.f32 %v4494_v28, %v4493_v59 }
 0x3a0   : > { %v4578_v46 = vpop.f32.mrb[96].mxu0 }
 0x3a1   : > { %v4579_v62 = vpop.f32.mrb[97].mxu0 }
 0x3a2   : > { %v4580_v26 = vadd.f32 %v4579_v62, %v4578_v46  ;;  %v4581_v57 = vpop.f32.mrb[98].mxu0  ;;  %v4496_v63 = vpop.f32.mrb[84].mxu1 }
 0x3a3   : > { %v4582_v45 = vpop.f32.mrb[99].mxu0  ;;  %v4497_v58 = vpop.f32.mrb[85].mxu1 }
 0x3a4   : > { %v4583_v19 = vadd.f32 %v4582_v45, %v4581_v57  ;;  %v6599_v54 = vadd.f32 %v4580_v26, %v3466_v39  ;;  %v6604_v47 = vadd.f32 %v4497_v58, %v4496_v63  ;;  %v4499_v51 = vpop.f32.mrb[86].mxu1  ;;  %v3490_v26 = vadd.f32 %v4486_v33, %v6591_v56 }
 0x3a5   : > { %v4500_v32 = vpop.f32.mrb[87].mxu1 }
 0x3a6   : > { %v6601_v60 = vadd.f32 %v4583_v19, %v3469_v50  ;;  %v6607_v21 = vadd.f32 %v4500_v32, %v4499_v51  ;;  %v3493_v19 = vadd.f32 %v4489_v55, %v6591_v56 }
 0x3a8   : > { %v4584_v61 = vpop.f32.mrb[100].mxu0 }
 0x3a9   : > { %v4585_v4 = vpop.f32.mrb[101].mxu0 }
 0x3aa   : > { %v4586_v53 = vadd.f32 %v4585_v4, %v4584_v61  ;;  %v4587_v2 = vpop.f32.mrb[102].mxu0  ;;  %v4502_v41 = vpop.f32.mrb[88].mxu1 }
 0x3ab   : > { %v4588_v1 = vpop.f32.mrb[103].mxu0  ;;  %v4503_v48 = vpop.f32.mrb[89].mxu1 }
 0x3ac   : > { %v4589_v5 = vadd.f32 %v4588_v1, %v4587_v2  ;;  %v6609_v36 = vadd.f32 %v4586_v53, %v3474_v38  ;;  %v6614_v40 = vadd.f32 %v4503_v48, %v4502_v41  ;;  %v4505_v42 = vpop.f32.mrb[90].mxu1  ;;  %v3498_v2 = vadd.f32 %v6594_v0, %v6591_v56 }
 0x3ad   : > { %v4506_v25 = vpop.f32.mrb[91].mxu1 }
 0x3ae   : > { %v6611_v22 = vadd.f32 %v4589_v5, %v3477_v34  ;;  %v6617_v52 = vadd.f32 %v4506_v25, %v4505_v42 }
 0x3b0   : > { %v4590_v24 = vpop.f32.mrb[104].mxu0 }
 0x3b1   : > { %v4591_v23 = vpop.f32.mrb[105].mxu0 }
 0x3b2   : > { %v4592_v18 = vadd.f32 %v4591_v23, %v4590_v24  ;;  %v4593_v30 = vpop.f32.mrb[106].mxu0  ;;  %v4508_v43 = vpop.f32.mrb[92].mxu1  ;;  %v3501_v24 = vadd.f32 %v6597_v37, %v6591_v56 }
 0x3b3   : > { %v4594_v31 = vpop.f32.mrb[107].mxu0  ;;  %v4509_v39 = vpop.f32.mrb[93].mxu1 }
 0x3b4   : > { %v4595_v29 = vadd.f32 %v4594_v31, %v4593_v30  ;;  %v6619_v44 = vadd.f32 %v4592_v18, %v3482_v27  ;;  %v6624_v59 = vadd.f32 %v4509_v39, %v4508_v43  ;;  %v4511_v28 = vpop.f32.mrb[94].mxu1  ;;  %v3506_v31 = vadd.f32 %v6604_v47, %v6591_v56 }
 0x3b5   : > { %v4512_v50 = vpop.f32.mrb[95].mxu1 }
 0x3b6   : > { %v6621_v46 = vadd.f32 %v4595_v29, %v3485_v49  ;;  %v6627_v63 = vadd.f32 %v4512_v50, %v4511_v28 }
 0x3b8   : > { %v4596_v62 = vpop.f32.mrb[108].mxu0 }
 0x3b9   : > { %v4597_v35 = vpop.f32.mrb[109].mxu0 }
 0x3ba   : > { %v4598_v57 = vadd.f32 %v4597_v35, %v4596_v62  ;;  %v4599_v45 = vpop.f32.mrb[110].mxu0  ;;  %v4514_v38 = vpop.f32.mrb[96].mxu1  ;;  %v3509_v35 = vadd.f32 %v6607_v21, %v6591_v56 }
 0x3bb   : > { %v4600_v3 = vpop.f32.mrb[111].mxu0  ;;  %v4515_v51 = vpop.f32.mrb[97].mxu1 }
 0x3bc   : > { %v4601_v61 = vadd.f32 %v4600_v3, %v4599_v45  ;;  %v6629_v58 = vadd.f32 %v4598_v57, %v3490_v26  ;;  %v6635_v32 = vadd.f32 %v4515_v51, %v4514_v38  ;;  %v4517_v34 = vpop.f32.mrb[98].mxu1 }
 0x3bd   : > { %v4518_v55 = vpop.f32.mrb[99].mxu1 }
 0x3be   : > { %v6631_v4 = vadd.f32 %v4601_v61, %v3493_v19  ;;  %v6639_v48 = vadd.f32 %v4518_v55, %v4517_v34  ;;  %v3514_v61 = vadd.f32 %v6614_v40, %v6591_v56 }
 0x3c0   : > { %v4602_v53 = vpop.f32.mrb[112].mxu0 }
 0x3c1   : > { %v4603_v33 = vpop.f32.mrb[113].mxu0 }
 0x3c2   : > { %v4604_v1 = vadd.f32 %v4603_v33, %v4602_v53  ;;  %v4605_v5 = vpop.f32.mrb[114].mxu0  ;;  %v4520_v42 = vpop.f32.mrb[100].mxu1 }
 0x3c3   : > { %v4606_v41 = vpop.f32.mrb[115].mxu0  ;;  %v4521_v0 = vpop.f32.mrb[101].mxu1 }
 0x3c4   : > { %v4607_v23 = vadd.f32 %v4606_v41, %v4605_v5  ;;  %v6641_v27 = vadd.f32 %v4604_v1, %v3498_v2  ;;  %v6647_v49 = vadd.f32 %v4521_v0, %v4520_v42  ;;  %v4523_v43 = vpop.f32.mrb[102].mxu1  ;;  %v3517_v1 = vadd.f32 %v6617_v52, %v6591_v56 }
 0x3c5   : > { %v4524_v37 = vpop.f32.mrb[103].mxu1 }
 0x3c6   : > { %v6643_v18 = vadd.f32 %v4607_v23, %v3501_v24  ;;  %v6651_v26 = vadd.f32 %v4524_v37, %v4523_v43 }
 0x3c8   : > { %v4608_v30 = vpop.f32.mrb[116].mxu0 }
 0x3c9   : > { %v4609_v25 = vpop.f32.mrb[117].mxu0 }
 0x3ca   : > { %v4610_v29 = vadd.f32 %v4609_v25, %v4608_v30  ;;  %v4611_v62 = vpop.f32.mrb[118].mxu0  ;;  %v4526_v50 = vpop.f32.mrb[104].mxu1  ;;  %v3522_v30 = vadd.f32 %v6624_v59, %v6591_v56 }
 0x3cb   : > { %v4612_v39 = vpop.f32.mrb[119].mxu0  ;;  %v4527_v47 = vpop.f32.mrb[105].mxu1 }
 0x3cc   : > { %v4613_v57 = vadd.f32 %v4612_v39, %v4611_v62  ;;  %v6653_v28 = vadd.f32 %v4610_v29, %v3506_v31  ;;  %v6659_v38 = vadd.f32 %v4527_v47, %v4526_v50  ;;  %v4529_v51 = vpop.f32.mrb[106].mxu1  ;;  %v3525_v62 = vadd.f32 %v6627_v63, %v6591_v56 }
 0x3cd   : > { %v4530_v21 = vpop.f32.mrb[107].mxu1 }
 0x3ce   : > { %v6655_v45 = vadd.f32 %v4613_v57, %v3509_v35  ;;  %v6663_v34 = vadd.f32 %v4530_v21, %v4529_v51 }
 0x3d0   : > { %v4614_v3 = vpop.f32.mrb[120].mxu0 }
 0x3d1   : > { %v4615_v19 = vpop.f32.mrb[121].mxu0 }
 0x3d2   : > { %v4616_v53 = vadd.f32 %v4615_v19, %v4614_v3  ;;  %v4617_v33 = vpop.f32.mrb[122].mxu0  ;;  %v4532_v24 = vpop.f32.mrb[108].mxu1  ;;  %v3530_v19 = vadd.f32 %v6635_v32, %v6591_v56 }
 0x3d3   : > { %v4618_v2 = vpop.f32.mrb[123].mxu0  ;;  %v4533_v40 = vpop.f32.mrb[109].mxu1 }
 0x3d4   : > { %v4619_v5 = vadd.f32 %v4618_v2, %v4617_v33  ;;  %v6665_v55 = vadd.f32 %v4616_v53, %v3514_v61  ;;  %v6671_v0 = vadd.f32 %v4533_v40, %v4532_v24  ;;  %v4535_v31 = vpop.f32.mrb[110].mxu1  ;;  %v3533_v2 = vadd.f32 %v6639_v48, %v6591_v56 }
 0x3d5   : > { %v4536_v52 = vpop.f32.mrb[111].mxu1 }
 0x3d6   : > { %v6667_v41 = vadd.f32 %v4619_v5, %v3517_v1  ;;  %v6675_v37 = vadd.f32 %v4536_v52, %v4535_v31 }
 0x3d8   : > { %v4620_v23 = vpop.f32.mrb[124].mxu0 }
 0x3d9   : > { %v4621_v42 = vpop.f32.mrb[125].mxu0 }
 0x3da   : > { %v4622_v25 = vadd.f32 %v4621_v42, %v4620_v23  ;;  %v4623_v29 = vpop.f32.mrb[126].mxu0  ;;  %v4538_v50 = vpop.f32.mrb[112].mxu1 }
 0x3db   : > { %v4624_v43 = vpop.f32.mrb[127].mxu0  ;;  %v4539_v59 = vpop.f32.mrb[113].mxu1 }
 0x3dc   : > { %v4625_v39 = vadd.f32 %v4624_v43, %v4623_v29  ;;  %v6677_v35 = vadd.f32 %v4622_v25, %v3522_v30  ;;  %v6683_v61 = vadd.f32 %v4539_v59, %v4538_v50  ;;  %v4541_v51 = vpop.f32.mrb[114].mxu1  ;;  %v3538_v25 = vadd.f32 %v6647_v49, %v6591_v56 }
 0x3dd   : > { %v4542_v63 = vpop.f32.mrb[115].mxu1 }
 0x3de   : > { %v6679_v57 = vadd.f32 %v4625_v39, %v3525_v62  ;;  %v6687_v1 = vadd.f32 %v4542_v63, %v4541_v51  ;;  %v3541_v39 = vadd.f32 %v6651_v26, %v6591_v56 }
 0x3e0   : > { %v4626_v3 = vpop.f32.mrb[128].mxu0 }
 0x3e1   : > { %v4627_v47 = vpop.f32.mrb[129].mxu0 }
 0x3e2   : > { %v4628_v53 = vadd.f32 %v4627_v47, %v4626_v3  ;;  %v4629_v33 = vpop.f32.mrb[130].mxu0  ;;  %v4544_v40 = vpop.f32.mrb[116].mxu1 }
 0x3e3   : > { %v4630_v21 = vpop.f32.mrb[131].mxu0  ;;  %v4545_v32 = vpop.f32.mrb[117].mxu1 }
 0x3e4   : > { %v4631_v5 = vadd.f32 %v4630_v21, %v4629_v33  ;;  %v6689_v24 = vadd.f32 %v4628_v53, %v3530_v19  ;;  %v6695_v31 = vadd.f32 %v4545_v32, %v4544_v40  ;;  %v4547_v52 = vpop.f32.mrb[118].mxu1  ;;  %v3546_v33 = vadd.f32 %v6659_v38, %v6591_v56 }
 0x3e5   : > { %v4548_v48 = vpop.f32.mrb[119].mxu1 }
 0x3e6   : > { %v6691_v23 = vadd.f32 %v4631_v5, %v3533_v2  ;;  %v6699_v50 = vadd.f32 %v4548_v48, %v4547_v52 }
 0x3e8   : > { %v4632_v42 = vpop.f32.mrb[132].mxu0 }
 0x3e9   : > { %v4633_v30 = vpop.f32.mrb[133].mxu0 }
 0x3ea   : > { %v4634_v29 = vadd.f32 %v4633_v30, %v4632_v42  ;;  %v4635_v43 = vpop.f32.mrb[134].mxu0  ;;  %v4550_v19 = vpop.f32.mrb[120].mxu1  ;;  %v3549_v42 = vadd.f32 %v6663_v34, %v6591_v56 }
 0x3eb   : > { %v4636_v62 = vpop.f32.mrb[135].mxu0  ;;  %v4551_v49 = vpop.f32.mrb[121].mxu1 }
 0x3ec   : > { %v4637_v3 = vadd.f32 %v4636_v62, %v4635_v43  ;;  %v6701_v59 = vadd.f32 %v4634_v29, %v3538_v25  ;;  %v6707_v63 = vadd.f32 %v4551_v49, %v4550_v19  ;;  %v4553_v2 = vpop.f32.mrb[122].mxu1  ;;  %v3554_v62 = vadd.f32 %v6671_v0, %v6591_v56 }
 0x3ed   : > { %v4554_v26 = vpop.f32.mrb[123].mxu1 }
 0x3ee   : > { %v6703_v47 = vadd.f32 %v4637_v3, %v3541_v39  ;;  %v6711_v32 = vadd.f32 %v4554_v26, %v4553_v2 }
 0x3f0   : > { %v4638_v53 = vpop.f32.mrb[136].mxu0 }
 0x3f1   : > { %v4639_v51 = vpop.f32.mrb[137].mxu0 }
 0x3f2   : > { %v4640_v21 = vadd.f32 %v4639_v51, %v4638_v53  ;;  %v4641_v5 = vpop.f32.mrb[138].mxu0  ;;  %v4556_v52 = vpop.f32.mrb[124].mxu1  ;;  %v3557_v51 = vadd.f32 %v6675_v37, %v6591_v56 }
 0x3f3   : > { %v4642_v40 = vpop.f32.mrb[139].mxu0  ;;  %v4557_v43 = vpop.f32.mrb[125].mxu1 }
 0x3f4   : > { %v4643_v30 = vadd.f32 %v4642_v40, %v4641_v5  ;;  %v6713_v25 = vadd.f32 %v4640_v21, %v3546_v33  ;;  %v6719_v39 = vadd.f32 %v4557_v43, %v4556_v52  ;;  %v4559_v34 = vpop.f32.mrb[126].mxu1  ;;  %v3562_v52 = vadd.f32 %v6683_v61, %v6591_v56 }
 0x3f5   : > { %v4560_v53 = vpop.f32.mrb[127].mxu1 }
 0x3f6   : > { %v6715_v29 = vadd.f32 %v4643_v30, %v3549_v42  ;;  %v6723_v33 = vadd.f32 %v4560_v53, %v4559_v34 }
 0x3f8   : > { %v4644_v38 = vpop.f32.mrb[140].mxu0 }
 0x3f9   : > { %v4645_v48 = vpop.f32.mrb[141].mxu0 }
 0x3fa   : > { %v4646_v3 = vadd.f32 %v4645_v48, %v4644_v38  ;;  %v4647_v19 = vpop.f32.mrb[142].mxu0  ;;  %v4744_v0 = vpop.f32.mrb[128].mxu1 }
 0x3fb   : > { %v4648_v49 = vpop.f32.mrb[143].mxu0  ;;  %v3796_v40 = vadd.f32 %v4744_v0, %v6609_v36  ;;  %v3787_v30 = vpop.f32.mrb[129].mxu1 }
 0x3fc   : > { %v4649_v21 = vadd.f32 %v4648_v49, %v4647_v19  ;;  %v6725_v2 = vadd.f32 %v4646_v3, %v3554_v62  ;;  %v3788_v38 = vadd.f32 %v3787_v30, %v6599_v54  ;;  %v4745_v48 = vpop.f32.mrb[130].mxu1  ;;  %v3565_v62 = vadd.f32 %v6687_v1, %v6591_v56 }
 0x3fd   : > { %v3916_v3 = vadd.f32 %v3796_v40, %v5221_v8  ;;  %v3799_v34 = vadd.f32 %v4745_v48, %v6611_v22  ;;  %v3790_v53 = vpop.f32.mrb[131].mxu1 }
 0x3fe   : > { %v6728_v5 = vadd.f32 %v4649_v21, %v3557_v51  ;;  %v3914_v36 = vadd.f32 %v3788_v38, %v5215_v6  ;;  %v3791_v51 = vadd.f32 %v3790_v53, %v6601_v60 }
 0x3ff   : > { %v3948_v21 = vmax.f32 %v3916_v3, 0.0  ;;  %v3917_v54 = vadd.f32 %v3799_v34, %v5228_v9 }
 0x400   : > { %v4650_v26 = vpop.f32.mrb[144].mxu0  ;;  %v3915_v0 = vadd.f32 %v3791_v51, %v5218_v7 }
 0x401   : > { %v4651_v42 = vpop.f32.mrb[145].mxu0  ;;  %3980 = vst.msk [vmem:[%s6748_s13 + $0x10] sm:$0xff] %vm224_vm0, %v3948_v21  ;;  %v3949_v6 = vmax.f32 %v3917_v54, 0.0 }
 0x402   : > { %v4652_v37 = vadd.f32 %v4651_v42, %v4650_v26  ;;  %v4653_v43 = vpop.f32.mrb[146].mxu0  ;;  %v3946_v26 = vmax.f32 %v3914_v36, 0.0  ;;  %v3947_v8 = vmax.f32 %v3915_v0, 0.0  ;;  %v4748_v22 = vpop.f32.mrb[132].mxu1  ;;  %v3570_v42 = vadd.f32 %v6695_v31, %v6591_v56 }
 0x403   : > { %v4654_v19 = vpop.f32.mrb[147].mxu0  ;;  %3981 = vst.msk [vmem:[%s6748_s13 + $0x18] sm:$0xff] %vm224_vm0, %v3949_v6  ;;  %v3812_v7 = vadd.f32 %v4748_v22, %v6629_v58  ;;  %v3803_v40 = vpop.f32.mrb[133].mxu1 }
 0x404   : > { %v4655_v49 = vadd.f32 %v4654_v19, %v4653_v43  ;;  %v6742_v61 = vadd.f32 %v4652_v37, %v3562_v52  ;;  %3978 = vst.msk [vmem:[%s6748_s13] sm:$0xff] %vm224_vm0, %v3946_v26  ;;  %3979 = vst.msk [vmem:[%s6748_s13 + $0x8] sm:$0xff] %vm224_vm0, %v3947_v8  ;;  %v3804_v52 = vadd.f32 %v3803_v40, %v6619_v44  ;;  %v4749_v38 = vpop.f32.mrb[134].mxu1 }
 0x405   : > { %v3573_v43 = vadd.f32 %v6699_v50, %v6591_v56  ;;  %v3920_v48 = vadd.f32 %v3812_v7, %v5245_v12  ;;  %v3815_v58 = vadd.f32 %v4749_v38, %v6631_v4  ;;  %v3806_v3 = vpop.f32.mrb[135].mxu1 }
 0x406   : > { %v6746_v1 = vadd.f32 %v4655_v49, %v3565_v62  ;;  %v3918_v31 = vadd.f32 %v3804_v52, %v5233_v10  ;;  %v3807_v19 = vadd.f32 %v3806_v3, %v6621_v46 }
 0x407   : > { %v3952_v53 = vmax.f32 %v3920_v48, 0.0  ;;  %v3921_v36 = vadd.f32 %v3815_v58, %v5248_v13  ;;  %v3578_v13 = vadd.f32 %v6707_v63, %v6591_v56 }
 0x408   : > { %v4656_v60 = vpop.f32.mrb[148].mxu0  ;;  %v3950_v50 = vmax.f32 %v3918_v31, 0.0  ;;  %v3919_v49 = vadd.f32 %v3807_v19, %v5236_v11 }
 0x409   : > { %v4657_v9 = vpop.f32.mrb[149].mxu0  ;;  %3984 = vst.msk [vmem:[%s6748_s13 + $0x30] sm:$0xff] %vm224_vm0, %v3952_v53  ;;  %v3953_v4 = vmax.f32 %v3921_v36, 0.0 }
 0x40a   : > { %v4658_v30 = vadd.f32 %v4657_v9, %v4656_v60  ;;  %v4659_v37 = vpop.f32.mrb[150].mxu0  ;;  %3982 = vst.msk [vmem:[%s6748_s13 + $0x20] sm:$0xff] %vm224_vm0, %v3950_v50  ;;  %v3951_v10 = vmax.f32 %v3919_v49, 0.0  ;;  %v4752_v21 = vpop.f32.mrb[136].mxu1  ;;  %v3581_v60 = vadd.f32 %v6711_v32, %v6591_v56 }
 0x40b   : > { %v4660_v62 = vpop.f32.mrb[151].mxu0  ;;  %3985 = vst.msk [vmem:[%s6748_s13 + $0x38] sm:$0xff] %vm224_vm0, %v3953_v4  ;;  %v3828_v46 = vadd.f32 %v4752_v21, %v6653_v28  ;;  %v3819_v26 = vpop.f32.mrb[137].mxu1 }
 0x40c   : > { %v4661_v34 = vadd.f32 %v4660_v62, %v4659_v37  ;;  %v6768_v44 = vadd.f32 %v4658_v30, %v3570_v42  ;;  %3983 = vst.msk [vmem:[%s6748_s13 + $0x28] sm:$0xff] %vm224_vm0, %v3951_v10  ;;  %v3820_v0 = vadd.f32 %v3819_v26, %v6641_v27  ;;  %v4753_v8 = vpop.f32.mrb[138].mxu1 }
 0x40d   : > { %v3924_v22 = vadd.f32 %v3828_v46, %v5265_v16  ;;  %v3831_v28 = vadd.f32 %v4753_v8, %v6655_v45  ;;  %v3822_v9 = vpop.f32.mrb[139].mxu1 }
 0x40e   : > { %v6772_v12 = vadd.f32 %v4661_v34, %v3573_v43  ;;  %v3922_v63 = vadd.f32 %v3820_v0, %v5253_v14  ;;  %v3823_v42 = vadd.f32 %v3822_v9, %v6643_v18  ;;  %v3589_v34 = vadd.f32 %v6723_v33, %v6591_v56  ;;  %v6994_v33 = vld [vmem:[#allocation9_spill] sm:$0xff] }
 0x40f   : > { %v3956_v30 = vmax.f32 %v3924_v22, 0.0  ;;  %v3925_v52 = vadd.f32 %v3831_v28, %v5268_v17  ;;  %v3586_v17 = vadd.f32 %v6719_v39, %v6591_v56  ;;  %v6992_v39 = vld [vmem:[#allocation8_spill] sm:$0xff]  ;;  %v6996_v28 = vld [vmem:[#allocation11_spill] sm:$0xff] }
 0x410   : > { %v4662_v51 = vpop.f32.mrb[152].mxu0  ;;  %v3954_v32 = vmax.f32 %v3922_v63, 0.0  ;;  %v3923_v37 = vadd.f32 %v3823_v42, %v5256_v15 }
 0x411   : > { %v4663_v54 = vpop.f32.mrb[153].mxu0  ;;  %3988 = vst.msk [vmem:[%s6748_s13 + $0x50] sm:$0xff] %vm224_vm0, %v3956_v30  ;;  %v3957_v45 = vmax.f32 %v3925_v52, 0.0  ;;  %v6998_v30 = vld [vmem:[#allocation12_spill] sm:$0xff] }
 0x412   : > { %v4664_v11 = vadd.f32 %v4663_v54, %v4662_v51  ;;  %v4665_v6 = vpop.f32.mrb[154].mxu0  ;;  %3986 = vst.msk [vmem:[%s6748_s13 + $0x40] sm:$0xff] %vm224_vm0, %v3954_v32  ;;  %v3955_v14 = vmax.f32 %v3923_v37, 0.0  ;;  %v4756_v43 = vpop.f32.mrb[140].mxu1  ;;  %v6993_v51 = vld [vmem:[#allocation10_spill] sm:$0xff] }
 0x413   : > { %v4666_v7 = vpop.f32.mrb[155].mxu0  ;;  %3989 = vst.msk [vmem:[%s6748_s13 + $0x58] sm:$0xff] %vm224_vm0, %v3957_v45  ;;  %v3844_v18 = vadd.f32 %v4756_v43, %v6677_v35  ;;  %v3835_v58 = vpop.f32.mrb[141].mxu1 }
 0x414   : > { %v4667_v40 = vadd.f32 %v4666_v7, %v4665_v6  ;;  %v6792_v27 = vadd.f32 %v4664_v11, %v3578_v13  ;;  %3987 = vst.msk [vmem:[%s6748_s13 + $0x48] sm:$0xff] %vm224_vm0, %v3955_v14  ;;  %v3836_v62 = vadd.f32 %v3835_v58, %v6665_v55  ;;  %v4757_v31 = vpop.f32.mrb[142].mxu1  ;;  %v6995_v6 = vld [vmem:[#allocation13_spill] sm:$0xff]  ;;  %v7000_v58 = vld [vmem:[#allocation15_spill] sm:$0xff] }
 0x415   : > { %v3928_v19 = vadd.f32 %v3844_v18, %v5283_v20  ;;  %v3847_v35 = vadd.f32 %v4757_v31, %v6679_v57  ;;  %v3838_v36 = vpop.f32.mrb[143].mxu1 }
 0x416   : > { %v6796_v16 = vadd.f32 %v4667_v40, %v3581_v60  ;;  %v3926_v50 = vadd.f32 %v3836_v62, %v6992_v39  ;;  %v3839_v55 = vadd.f32 %v3838_v36, %v6667_v41 }
 0x417   : > { %v3960_v10 = vmax.f32 %v3928_v19, 0.0  ;;  %v3929_v21 = vadd.f32 %v3847_v35, %v6993_v51  ;;  %v7004_v51 = vld [vmem:[#allocation19_spill] sm:$0xff] }
 0x418   : > { %v4668_v38 = vpop.f32.mrb[156].mxu0  ;;  %v3958_v56 = vmax.f32 %v3926_v50, 0.0  ;;  %v3927_v46 = vadd.f32 %v3839_v55, %v6994_v33  ;;  %v7003_v50 = vld [vmem:[#allocation21_spill] sm:$0xff] }
 0x419   : > { %v4669_v48 = vpop.f32.mrb[157].mxu0  ;;  %3992 = vst.msk [vmem:[%s6748_s13 + $0x70] sm:$0xff] %vm224_vm0, %v3960_v10  ;;  %v3961_v57 = vmax.f32 %v3929_v21, 0.0 }
 0x41a   : > { %v4670_v15 = vadd.f32 %v4669_v48, %v4668_v38  ;;  %v4671_v3 = vpop.f32.mrb[158].mxu0  ;;  %3990 = vst.msk [vmem:[%s6748_s13 + $0x60] sm:$0xff] %vm224_vm0, %v3958_v56  ;;  %v3959_v54 = vmax.f32 %v3927_v46, 0.0  ;;  %v4760_v26 = vpop.f32.mrb[144].mxu1  ;;  %v6999_v38 = vld [vmem:[#allocation17_spill] sm:$0xff] }
 0x41b   : > { %v4672_v53 = vpop.f32.mrb[159].mxu0  ;;  %3993 = vst.msk [vmem:[%s6748_s13 + $0x78] sm:$0xff] %vm224_vm0, %v3961_v57  ;;  %v3860_v41 = vadd.f32 %v4760_v26, %v6701_v59  ;;  %v3851_v13 = vpop.f32.mrb[145].mxu1  ;;  %v6997_v59 = vld [vmem:[#allocation14_spill] sm:$0xff] }
 0x41c   : > { %v4673_v49 = vadd.f32 %v4672_v53, %v4671_v3  ;;  %v6816_v4 = vadd.f32 %v4670_v15, %v3586_v17  ;;  %3991 = vst.msk [vmem:[%s6748_s13 + $0x68] sm:$0xff] %vm224_vm0, %v3959_v54  ;;  %v3852_v11 = vadd.f32 %v3851_v13, %v6689_v24  ;;  %v4761_v0 = vpop.f32.mrb[146].mxu1  ;;  %v7006_v54 = vld [vmem:[#allocation20_spill] sm:$0xff] }
 0x41d   : > { %v3932_v8 = vadd.f32 %v3860_v41, %v6995_v6  ;;  %v3863_v60 = vadd.f32 %v4761_v0, %v6703_v47  ;;  %v3854_v22 = vpop.f32.mrb[147].mxu1  ;;  %v7007_v6 = vld [vmem:[#allocation25_spill] sm:$0xff] }
 0x41e   : > { %v6820_v20 = vadd.f32 %v4673_v49, %v3589_v34  ;;  %v3930_v7 = vadd.f32 %v3852_v11, %v6996_v28  ;;  %v3855_v9 = vadd.f32 %v3854_v22, %v6691_v23  ;;  %v7002_v34 = vld [vmem:[#allocation16_spill] sm:$0xff]  ;;  %v7008_v28 = vld [vmem:[#allocation23_spill] sm:$0xff] }
 0x41f   : > { %v3964_v63 = vmax.f32 %v3932_v8, 0.0  ;;  %v3933_v40 = vadd.f32 %v3863_v60, %v6997_v59 }
 0x420   : > { %v3962_v42 = vmax.f32 %v3930_v7, 0.0  ;;  %v3931_v52 = vadd.f32 %v3855_v9, %v6998_v30 }
 0x421   : > { %3996 = vst.msk [vmem:[%s6748_s13 + $0x90] sm:$0xff] %vm224_vm0, %v3964_v63  ;;  %v3965_v24 = vmax.f32 %v3933_v40, 0.0  ;;  %v7009_v63 = vld [vmem:[#allocation26_spill] sm:$0xff]  ;;  %v7010_v40 = vld [vmem:[#allocation24_spill] sm:$0xff] }
 0x422   : > { %3994 = vst.msk [vmem:[%s6748_s13 + $0x80] sm:$0xff] %vm224_vm0, %v3962_v42  ;;  %v3963_v32 = vmax.f32 %v3931_v52, 0.0  ;;  %v4764_v37 = vpop.f32.mrb[148].mxu1 }
 0x423   : > { %3997 = vst.msk [vmem:[%s6748_s13 + $0x98] sm:$0xff] %vm224_vm0, %v3965_v24  ;;  %v3876_v47 = vadd.f32 %v4764_v37, %v6725_v2  ;;  %v3867_v23 = vpop.f32.mrb[149].mxu1  ;;  %v7001_v2 = vld [vmem:[#allocation18_spill] sm:$0xff] }
 0x424   : > { %3995 = vst.msk [vmem:[%s6748_s13 + $0x88] sm:$0xff] %vm224_vm0, %v3963_v32  ;;  %v3868_v45 = vadd.f32 %v3867_v23, %v6713_v25  ;;  %v4765_v14 = vpop.f32.mrb[150].mxu1 }
 0x425   : > { %v3936_v43 = vadd.f32 %v3876_v47, %v6999_v38  ;;  %v3879_v18 = vadd.f32 %v4765_v14, %v6728_v5  ;;  %v3870_v48 = vpop.f32.mrb[151].mxu1 }
 0x426   : > { %v3934_v17 = vadd.f32 %v3868_v45, %v7000_v58  ;;  %v3871_v15 = vadd.f32 %v3870_v48, %v6715_v29 }
 0x427   : > { %v3968_v62 = vmax.f32 %v3936_v43, 0.0  ;;  %v3937_v3 = vadd.f32 %v3879_v18, %v7001_v2 }
 0x428   : > { %v3966_v31 = vmax.f32 %v3934_v17, 0.0  ;;  %v3935_v19 = vadd.f32 %v3871_v15, %v7002_v34 }
 0x429   : > { %4000 = vst.msk [vmem:[%s6748_s13 + $0xb0] sm:$0xff] %vm224_vm0, %v3968_v62  ;;  %v3969_v25 = vmax.f32 %v3937_v3, 0.0 }
 0x42a   : > { %3998 = vst.msk [vmem:[%s6748_s13 + $0xa0] sm:$0xff] %vm224_vm0, %v3966_v31  ;;  %v3967_v35 = vmax.f32 %v3935_v19, 0.0  ;;  %v4768_v53 = vpop.f32.mrb[152].mxu1 }
 0x42b   : > { %4001 = vst.msk [vmem:[%s6748_s13 + $0xb8] sm:$0xff] %vm224_vm0, %v3969_v25  ;;  %v3892_v5 = vadd.f32 %v4768_v53, %v6768_v44  ;;  %v3883_v29 = vpop.f32.mrb[153].mxu1  ;;  %v7005_v44 = vld [vmem:[#allocation22_spill] sm:$0xff] }
 0x42c   : > { %3999 = vst.msk [vmem:[%s6748_s13 + $0xa8] sm:$0xff] %vm224_vm0, %v3967_v35  ;;  %v3884_v36 = vadd.f32 %v3883_v29, %v6742_v61  ;;  %v4769_v39 = vpop.f32.mrb[154].mxu1 }
 0x42d   : > { %v3940_v49 = vadd.f32 %v3892_v5, %v7003_v50  ;;  %v3895_v55 = vadd.f32 %v4769_v39, %v6772_v12  ;;  %v3886_v10 = vpop.f32.mrb[155].mxu1 }
 0x42e   : > { %v3938_v21 = vadd.f32 %v3884_v36, %v7004_v51  ;;  %v3887_v56 = vadd.f32 %v3886_v10, %v6746_v1 }
 0x42f   : > { %v3972_v33 = vmax.f32 %v3940_v49, 0.0  ;;  %v3941_v46 = vadd.f32 %v3895_v55, %v7005_v44 }
 0x430   : > { %v3970_v57 = vmax.f32 %v3938_v21, 0.0  ;;  %v3939_v26 = vadd.f32 %v3887_v56, %v7006_v54 }
 0x431   : > { %4004 = vst.msk [vmem:[%s6748_s13 + $0xd0] sm:$0xff] %vm224_vm0, %v3972_v33  ;;  %v3973_v61 = vmax.f32 %v3941_v46, 0.0 }
 0x432   : > { %4002 = vst.msk [vmem:[%s6748_s13 + $0xc0] sm:$0xff] %vm224_vm0, %v3970_v57  ;;  %v3971_v12 = vmax.f32 %v3939_v26, 0.0  ;;  %v4772_v41 = vpop.f32.mrb[156].mxu1 }
 0x433   : > { %4005 = vst.msk [vmem:[%s6748_s13 + $0xd8] sm:$0xff] %vm224_vm0, %v3973_v61  ;;  %v3908_v13 = vadd.f32 %v4772_v41, %v6816_v4  ;;  %v3899_v1 = vpop.f32.mrb[157].mxu1 }
 0x434   : > { %4003 = vst.msk [vmem:[%s6748_s13 + $0xc8] sm:$0xff] %vm224_vm0, %v3971_v12  ;;  %v3900_v11 = vadd.f32 %v3899_v1, %v6792_v27  ;;  %v4773_v0 = vpop.f32.mrb[158].mxu1 }
 0x435   : > { %v3944_v8 = vadd.f32 %v3908_v13, %v7007_v6  ;;  %v3911_v60 = vadd.f32 %v4773_v0, %v6820_v20  ;;  %v3902_v22 = vpop.f32.mrb[159].mxu1 }
 0x436   : > { %v3942_v7 = vadd.f32 %v3900_v11, %v7008_v28  ;;  %v3903_v4 = vadd.f32 %v3902_v22, %v6796_v16 }
 0x437   : > { %v3976_v9 = vmax.f32 %v3944_v8, 0.0  ;;  %v3945_v27 = vadd.f32 %v3911_v60, %v7009_v63 }
 0x438   : > { %v3974_v59 = vmax.f32 %v3942_v7, 0.0  ;;  %v3943_v42 = vadd.f32 %v3903_v4, %v7010_v40 }
 0x439   : > { %4008 = vst.msk [vmem:[%s6748_s13 + $0xf0] sm:$0xff] %vm224_vm0, %v3976_v9  ;;  %v3977_v20 = vmax.f32 %v3945_v27, 0.0 }
 0x43a   : > { %4006 = vst.msk [vmem:[%s6748_s13 + $0xe0] sm:$0xff] %vm224_vm0, %v3974_v59  ;;  %v3975_v16 = vmax.f32 %v3943_v42, 0.0 }
 0x43b   : > { %4009 = vst.msk [vmem:[%s6748_s13 + $0xf8] sm:$0xff] %vm224_vm0, %v3977_v20 }
 0x43c   : > { %4007 = vst.msk [vmem:[%s6748_s13 + $0xe8] sm:$0xff] %vm224_vm0, %v3975_v16 }
 0x43d   : > { %4904 = shalt.err (!%p4901_p3)
}
 0x43e   : > { %s4905_s26 = scalar_lea.hbm %s6893_s23, 4096  ;;  %s4909_s10 = scalar_lea.hbm %s6951_s5, 8192 }
 0x43f   : > { %p4906_p4 = scmp.ne.s32.totalorder %s6893_s23, %s4905_s26  ;;  %p4910_p9 = scmp.lt.u32.totalorder %s6893_s23, %s6951_s5 }
 0x440   : > { %p4911_p10 = scmp.lt.u32.totalorder %s4909_s10, %s4905_s26  ;;  %p4913_p12 = scmp.lt.u32.totalorder %s4905_s26, %s6893_s23 }
 0x441   : > { %p4907_p7 = pnand %p4906_p4, %p5028_p5 }
 0x442   : > { %p4912_p11 = por %p4911_p10, %p4910_p9 }
 0x443   : > { %p4908_p8 = pneg %p4907_p7 }
 0x444   : > { %p4914_p13 = por %p4913_p12, %p4912_p11 }
 0x446   : > { %p4915_p0 = pnand %p4914_p13, %p4908_p8 }
 0x448   : > { %4918 = shalt.err (!%p4915_p0)
}
 0x449   : > { %s4958_s13 = smov 128   ;;  %s4959_s14 = smov 8  }
 0x44a   : > { %4774 = dma.vmem_to_hbm [thread:$0]  (%p5028_p5), %s6895_s15, 4096, %s6893_s23, %s6905_s22, %s4958_s13, %s4958_s13, %s4959_s14  }
 0x44b PF: > { %p4780_p1 = scmp.ge.s32.totalorder %s4953_s21, 2  ;;  %s4039_s16 = sand.u32 1, %s4941_s18  }
 0x44c   : > { %s4040_s17 = scalar_lea.sflag [#allocation6], %s4039_s16 }
 0x44d   : > { %p4777_p2 = pnand %p4780_p1, %p5032_p6 }
 0x44f   : > { %4936 = dma.done.wait (!%p4777_p2), %s4040_s17, 4096  }
 0x450   : > { %4938 = vsyncadd (!%p4777_p2), %s4040_s17, 4294963200  ;;  %p15_p3 = scmp.ge.s32.totalorder %s5015_s24, 4   ;;  %s7011_s18 = smov %s4945_s19 }
 0x451   : > { %s7012_s19 = smov %s4949_s20  ;;  %s7013_s20 = smov %s5026_s27 }
 0x452   : > { %s7014_s21 = smov %s5015_s24  ;;  %17 = sbr.rel (!%p15_p3) target bundleno = 3 (0x3), region = 81 }
 0x459   :  { %4045 = vsyncpa [#allocation6], 1 }
 0x45a   :  { %4047 = vsyncpa [#allocation6 + $0x1], 1 }

</bundles_post_ra>
